<compile_context>
chip_gen: v7x
topology: tpu7x:2x2x1
jax: 0.10.0
libtpu: 0.0.40
codegen_flags: <defaults>
</compile_context>

<pallas_src>
import numpy as np
import jax
import jax.numpy as jnp
from jax.experimental import pallas as pl
from jax.experimental.pallas import tpu as pltpu

H, W = 10, 20            # board height / width implied by the module
HP = 16                  # padded rows per board (2 top + 10 real + 4 bottom)
PAD_TOP = 2
MARGIN = 8               # scratch halo rows (sublane-aligned; only 1 row is ever read)
C1, C2, C3 = 16, 32, 64
L1, L2 = W * C1, W * C2  # 320, 640 lane widths of conv1 / conv2 activations
K1 = 128                 # conv1 H-im2col K (5 taps * 20 lanes = 100, zero-padded to 128)


# --------------------------------------------------------------------------- #
# Kernel: full CNN_lay (conv1/conv2/conv_collapse/conv5 + folded BN + relu)    #
# for a block of bt boards stacked along the matmul M dimension.               #
# --------------------------------------------------------------------------- #
def _cnn_kernel(x_ref, m1_ref, b1_ref, m2_ref, b2_ref, wc_ref, bc_ref,
                w5_ref, b5_ref, out_ref, s1s, s3s):
    f32, bf16 = jnp.float32, jnp.bfloat16
    nr = out_ref.shape[0]                          # bt * HP (static)

    # Row-validity mask ([nr, 1]), computed once; lane-broadcast at each use.
    rib = jax.lax.broadcasted_iota(jnp.int32, (nr, 1), 0) & (HP - 1)
    rv = jnp.logical_and(rib >= PAD_TOP, rib < PAD_TOP + H)

    # ---- conv1 5x5 pad 2 (+ folded BN1, relu): one [nr,128]@[128,320] GEMM --
    a1 = jnp.dot(x_ref[...], m1_ref[...], preferred_element_type=f32)
    s1 = jnp.where(rv, jnp.maximum(a1 + b1_ref[...], 0.0), 0.0)   # pad rows -> 0 (board isolation)

    # ---- conv2 3x3 pad 1 (+ folded BN2, relu): one [nr,960]@[960,640] GEMM --
    # Zero the halo rows (only +-1 row is ever read), then write s1 (aligned offset).
    s1s[0:MARGIN, :] = jnp.zeros((MARGIN, L1), f32)
    s1s[MARGIN + nr:MARGIN + nr + MARGIN, :] = jnp.zeros((MARGIN, L1), f32)
    s1s[MARGIN:MARGIN + nr, :] = s1
    lhs2 = jnp.concatenate(
        [s1s[MARGIN - 1:MARGIN - 1 + nr, :],       # H tap 0: row r-1
         s1s[MARGIN:MARGIN + nr, :],               # H tap 1: row r
         s1s[MARGIN + 1:MARGIN + 1 + nr, :]],      # H tap 2: row r+1
        axis=-1).astype(bf16)
    a2 = jnp.dot(lhs2, m2_ref[...], preferred_element_type=f32)
    s2 = jnp.maximum(a2 + b2_ref[...], 0.0).astype(bf16)  # pad rows masked later (at s3)

    # ---- conv_collapse (1,20) (+ folded BN4, relu): one [nr,640]@[640,64] ---
    a3 = jnp.dot(s2, wc_ref[...], preferred_element_type=f32)
    s3 = jnp.where(rv, jnp.maximum(a3 + bc_ref[...], 0.0), 0.0)

    # ---- conv5 (3,1) pad (1,0) (+ folded BN5, relu): one [nr,192]@[192,64] --
    s3s[0:MARGIN, :] = jnp.zeros((MARGIN, C3), f32)
    s3s[MARGIN + nr:MARGIN + nr + MARGIN, :] = jnp.zeros((MARGIN, C3), f32)
    s3s[MARGIN:MARGIN + nr, :] = s3
    lhs5 = jnp.concatenate(
        [s3s[MARGIN - 1:MARGIN - 1 + nr, :],
         s3s[MARGIN:MARGIN + nr, :],
         s3s[MARGIN + 1:MARGIN + 1 + nr, :]],
        axis=-1).astype(bf16)
    a5 = jnp.dot(lhs5, w5_ref[...], preferred_element_type=f32)
    out = jnp.maximum(a5 + b5_ref[...], 0.0)

    # Lane-dense [nr, 128] output block (unmasked full-vreg stores); lanes 64+ are zero.
    out_ref[...] = jnp.concatenate([out, jnp.zeros_like(out)], axis=-1)


def _round_up(x, m):
    return (x + m - 1) // m * m


def cnn_lay_pallas(boards, kp, bt=64):
    """boards: NCHW [N, 1, 10, 20] float32 -> CNN_lay output, NCHW [N, 64, 10, 1]."""
    n = boards.shape[0]
    n_pad = _round_up(max(n, 1), bt)
    nr = bt * HP                                           # matmul M per grid step
    n_rows = n_pad * HP

    # Stack boards along rows: 16 rows/board = 2 zero-pad + 10 real + 4 zero-pad.
    x = boards[:, 0, :, :].astype(jnp.float32)             # [N, 10, 20]
    x = jnp.pad(x, ((0, n_pad - n), (PAD_TOP, HP - H - PAD_TOP), (0, 0)))
    x_stack = x.reshape(n_rows, W)

    # Host-side H-im2col for conv1: lane block i holds rows shifted by (i - 2).
    xs = jnp.pad(x_stack, ((2, 2), (0, 0)))
    x_im2col = jnp.concatenate([xs[i:i + n_rows, :] for i in range(5)], axis=-1)
    x_im2col = jnp.pad(x_im2col, ((0, 0), (0, K1 - 5 * W))).astype(jnp.bfloat16)

    rep = lambda i: (0, 0)
    out = pl.pallas_call(
        _cnn_kernel,
        out_shape=jax.ShapeDtypeStruct((n_rows, 2 * C3), jnp.float32),
        grid=(n_pad // bt,),
        in_specs=[
            pl.BlockSpec((nr, K1), lambda i: (i, 0)),      # im2col'd boards (bf16)
            pl.BlockSpec((K1, L1), rep),                   # conv1 weights [128, 320]
            pl.BlockSpec((1, L1), rep),                    # conv1+bn1 bias (per w,c)
            pl.BlockSpec((3 * L1, L2), rep),               # conv2 weights [960, 640]
            pl.BlockSpec((1, L2), rep),
            pl.BlockSpec((L2, C3), rep),                   # conv_collapse weights [640, 64]
            pl.BlockSpec((1, C3), rep),
            pl.BlockSpec((3 * C3, C3), rep),               # conv5 weights [192, 64]
            pl.BlockSpec((1, C3), rep),
        ],
        out_specs=pl.BlockSpec((nr, 2 * C3), lambda i: (i, 0)),
        scratch_shapes=[
            pltpu.VMEM((nr + 2 * MARGIN, L1), jnp.float32),  # conv1-output halo buffer
            pltpu.VMEM((nr + 2 * MARGIN, C3), jnp.float32),  # conv4-output halo buffer
        ],
        compiler_params=pltpu.CompilerParams(
            dimension_semantics=("parallel",),             # boards independent (v7x: 2 TCs)
            vmem_limit_bytes=32 * 1024 * 1024),
    )(x_im2col, kp["m1"], kp["b1"], kp["m2"], kp["b2"],
      kp["wc"], kp["bc"], kp["w5"], kp["b5"])

    feat = out[:, :C3].reshape(n_pad, HP, C3)[:n, PAD_TOP:PAD_TOP + H, :]   # [N, 10, 64]
    return jnp.transpose(feat, (0, 2, 1))[:, :, :, None]                    # NCHW [N, 64, 10, 1]


# --------------------------------------------------------------------------- #
# Host-side glue: parameter init, BN folding, banded-weight construction       #
# --------------------------------------------------------------------------- #
def _bn_init(key, c):
    k1, k2, k3, k4 = jax.random.split(key, 4)
    gamma = 1.0 + 0.1 * jax.random.normal(k1, (c,), jnp.float32)
    beta = 0.05 * jax.random.normal(k2, (c,), jnp.float32)
    mean = 0.05 * jax.random.normal(k3, (c,), jnp.float32)
    var = 1.0 + 0.1 * jnp.abs(jax.random.normal(k4, (c,), jnp.float32))
    return (gamma, beta, mean, var)


def init_params(key):
    ks = iter(jax.random.split(key, 16))
    nrm = lambda k, s, sc: sc * jax.random.normal(k, s, jnp.float32)
    p = {}
    p["c1w"] = nrm(next(ks), (16, 1, 5, 5), 0.1);   p["c1b"] = nrm(next(ks), (16,), 0.05)
    p["bn1"] = _bn_init(next(ks), 16)
    p["c2w"] = nrm(next(ks), (32, 16, 3, 3), 0.1);  p["c2b"] = nrm(next(ks), (32,), 0.05)
    p["bn2"] = _bn_init(next(ks), 32)
    p["ccw"] = nrm(next(ks), (64, 32, 1, 20), 0.1); p["ccb"] = nrm(next(ks), (64,), 0.05)
    p["bn4"] = _bn_init(next(ks), 64)
    p["c5w"] = nrm(next(ks), (64, 64, 3, 1), 0.1);  p["c5b"] = nrm(next(ks), (64,), 0.05)
    p["bn5"] = _bn_init(next(ks), 64)
    return p


def _fold_bn(w, b, bn, eps=1e-5):
    gamma, beta, mean, var = bn
    s = gamma / jnp.sqrt(var + eps)
    return w * s[:, None, None, None], (b - mean) * s + beta


def prep_kernel_params(p):
    c1w, c1b = _fold_bn(p["c1w"], p["c1b"], p["bn1"])
    c2w, c2b = _fold_bn(p["c2w"], p["c2b"], p["bn2"])
    ccw, ccb = _fold_bn(p["ccw"], p["ccb"], p["bn4"])
    c5w, c5b = _fold_bn(p["c5w"], p["c5b"], p["bn5"])
    c1w, c1b, c2w, c2b, ccw, ccb, c5w, c5b = map(
        np.asarray, (c1w, c1b, c2w, c2b, ccw, ccb, c5w, c5b))

    # conv1 banded weights -> one [K1, 320] matrix over the (tap, column) im2col axis:
    # m1[i*W + u, w*16 + co] = c1w[co, 0, i, u - w + 2]
    m1 = np.zeros((5, W, L1), np.float32)
    for i in range(5):
        for w in range(W):
            for j in range(5):
                u = w + j - 2
                if 0 <= u < W:
                    m1[i, u, w * C1:(w + 1) * C1] = c1w[:, 0, i, j]
    m1 = np.concatenate([m1.reshape(5 * W, L1),
                         np.zeros((K1 - 5 * W, L1), np.float32)], axis=0)

    # conv2 banded weights -> one [960, 640] matrix (3 H-taps stacked along K):
    # m2[i*320 + u*16 + ci, w*32 + co] = c2w[co, ci, i, u - w + 1]
    m2 = np.zeros((3, L1, L2), np.float32)
    for i in range(3):
        for w in range(W):
            for j in range(3):
                u = w + j - 1
                if 0 <= u < W:
                    m2[i, u * C1:(u + 1) * C1, w * C2:(w + 1) * C2] = c2w[:, :, i, j].T
    m2 = m2.reshape(3 * L1, L2)

    # conv_collapse: wc[w*32+ci, co] = ccw[co, ci, 0, w]
    wc = np.transpose(ccw[:, :, 0, :], (2, 1, 0)).reshape(L2, C3)
    # conv5 (3 H-taps stacked along K): w5[i*64+ci, co] = c5w[co, ci, i, 0]
    w5 = np.transpose(c5w[:, :, :, 0], (2, 1, 0)).reshape(3 * C3, C3)

    bf16, f32 = jnp.bfloat16, jnp.float32
    return {
        "m1": jnp.asarray(m1, bf16), "b1": jnp.asarray(np.tile(c1b, W)[None, :], f32),
        "m2": jnp.asarray(m2, bf16), "b2": jnp.asarray(np.tile(c2b, W)[None, :], f32),
        "wc": jnp.asarray(wc, bf16), "bc": jnp.asarray(ccb[None, :], f32),
        "w5": jnp.asarray(w5, bf16), "b5": jnp.asarray(c5b[None, :], f32),
    }


# --------------------------------------------------------------------------- #
# Pure-JAX f32 reference (same semantics as the PyTorch module, eval-mode BN)  #
# --------------------------------------------------------------------------- #
def _bn_eval(x, bn, eps=1e-5):
    gamma, beta, mean, var = bn
    inv = gamma / jnp.sqrt(var + eps)
    return (x - mean[None, :, None, None]) * inv[None, :, None, None] \
        + beta[None, :, None, None]


def _conv_nchw(x, w, b, pad):
    y = jax.lax.conv_general_dilated(
        x, w, window_strides=(1, 1),
        padding=((pad[0], pad[0]), (pad[1], pad[1])),
        dimension_numbers=("NCHW", "OIHW", "NCHW"),
        precision=jax.lax.Precision.HIGHEST)
    return y + b[None, :, None, None]


def _cnn_ref(x, p):
    x = jax.nn.relu(_bn_eval(_conv_nchw(x, p["c1w"], p["c1b"], (2, 2)), p["bn1"]))
    x = jax.nn.relu(_bn_eval(_conv_nchw(x, p["c2w"], p["c2b"], (1, 1)), p["bn2"]))
    x = jax.nn.relu(_bn_eval(_conv_nchw(x, p["ccw"], p["ccb"], (0, 0)), p["bn4"]))
    x = jax.nn.relu(_bn_eval(_conv_nchw(x, p["c5w"], p["c5b"], (1, 0)), p["bn5"]))
    return x


# --------------------------------------------------------------------------- #
if __name__ == "__main__":
    N = 12                                   # small demo batch (exercises batch padding)
    key = jax.random.PRNGKey(0)
    kx, kpar = jax.random.split(key, 2)
    boards = jax.random.normal(kx, (N, 1, H, W), jnp.float32)

    params = init_params(kpar)
    kparams = prep_kernel_params(params)

    # bt=8 -> 2 grid steps of 128 rows each (keeps grid >= 2 so "parallel" can shard cores)
    conv_out = jax.block_until_ready(cnn_lay_pallas(boards, kparams, bt=8))
    assert conv_out.shape == (N, C3, H, 1)

    conv_ref = jax.block_until_ready(_cnn_ref(boards, params))
    err = float(jnp.max(jnp.abs(conv_out - conv_ref)))
    scale = float(jnp.max(jnp.abs(conv_ref)))
    # bf16 operands / f32 accumulation vs a HIGHEST-precision f32 reference: relaxed check.
    assert err <= 0.05 * max(scale, 1.0) + 0.05, f"max abs err {err} (ref scale {scale})"

    print("KERNEL_OK")
</pallas_src>

<mosaic_0001>
module attributes {stable_mosaic.version = 11 : i64} {
  func.func @_cnn_kernel(%arg0: i32, %arg1: memref<128x128xbf16, #tpu.memory_space<vmem>>, %arg2: memref<128x320xbf16, #tpu.memory_space<vmem>>, %arg3: memref<1x320xf32, #tpu.memory_space<vmem>>, %arg4: memref<960x640xbf16, #tpu.memory_space<vmem>>, %arg5: memref<1x640xf32, #tpu.memory_space<vmem>>, %arg6: memref<640x64xbf16, #tpu.memory_space<vmem>>, %arg7: memref<1x64xf32, #tpu.memory_space<vmem>>, %arg8: memref<192x64xbf16, #tpu.memory_space<vmem>>, %arg9: memref<1x64xf32, #tpu.memory_space<vmem>>, %arg10: memref<128x128xf32, #tpu.memory_space<vmem>>, %arg11: memref<144x320xf32, #tpu.memory_space<vmem>>, %arg12: memref<144x64xf32, #tpu.memory_space<vmem>>) attributes {dimension_semantics = [#tpu.dimension_semantics<parallel>], iteration_bounds = array<i64: 2>, scalar_prefetch = 0 : i64, scratch_operands = 2 : i64, tpu.core_type = #tpu.core_type<tc>, window_params = [{transform_indices = @transform_0, window_bounds = array<i64: 128, 128>}, {pipeline_mode = #tpu.pipeline_mode<synchronous>, transform_indices = @transform_1, window_bounds = array<i64: 128, 320>}, {pipeline_mode = #tpu.pipeline_mode<synchronous>, transform_indices = @transform_2, window_bounds = array<i64: 1, 320>}, {pipeline_mode = #tpu.pipeline_mode<synchronous>, transform_indices = @transform_3, window_bounds = array<i64: 960, 640>}, {pipeline_mode = #tpu.pipeline_mode<synchronous>, transform_indices = @transform_4, window_bounds = array<i64: 1, 640>}, {pipeline_mode = #tpu.pipeline_mode<synchronous>, transform_indices = @transform_5, window_bounds = array<i64: 640, 64>}, {pipeline_mode = #tpu.pipeline_mode<synchronous>, transform_indices = @transform_6, window_bounds = array<i64: 1, 64>}, {pipeline_mode = #tpu.pipeline_mode<synchronous>, transform_indices = @transform_7, window_bounds = array<i64: 192, 64>}, {pipeline_mode = #tpu.pipeline_mode<synchronous>, transform_indices = @transform_8, window_bounds = array<i64: 1, 64>}, {transform_indices = @transform_9, window_bounds = array<i64: 128, 128>}]} {
    %0 = tpu.iota {dimensions = array<i32: 0>} : vector<128x1xi32>
    %c15_i32 = arith.constant 15 : i32
    %1 = vector.broadcast %c15_i32 : i32 to vector<128x1xi32>
    %2 = arith.andi %0, %1 : vector<128x1xi32>
    %c2_i32 = arith.constant 2 : i32
    %3 = vector.broadcast %c2_i32 : i32 to vector<128x1xi32>
    %4 = arith.cmpi sge, %2, %3 : vector<128x1xi32>
    %c12_i32 = arith.constant 12 : i32
    %5 = vector.broadcast %c12_i32 : i32 to vector<128x1xi32>
    %6 = arith.cmpi slt, %2, %5 : vector<128x1xi32>
    %7 = arith.andi %4, %6 : vector<128x1xi1>
    %c0 = arith.constant 0 : index
    %c0_0 = arith.constant 0 : index
    %8 = vector.load %arg1[%c0, %c0_0] : memref<128x128xbf16, #tpu.memory_space<vmem>>, vector<128x128xbf16>
    %c0_1 = arith.constant 0 : index
    %c0_2 = arith.constant 0 : index
    %9 = vector.load %arg2[%c0_1, %c0_2] : memref<128x320xbf16, #tpu.memory_space<vmem>>, vector<128x320xbf16>
    %cst = arith.constant dense<0.000000e+00> : vector<128x320xf32>
    %10 = tpu.matmul %8, %9, %cst {dimension_numbers = #tpu.dot_dimension_numbers<[1], [0], [0], [1], [0, 0, 1, 1], [], []>} : vector<128x128xbf16>, vector<128x320xbf16>, vector<128x320xf32> -> vector<128x320xf32>
    %c0_3 = arith.constant 0 : index
    %c0_4 = arith.constant 0 : index
    %11 = vector.load %arg3[%c0_3, %c0_4] : memref<1x320xf32, #tpu.memory_space<vmem>>, vector<1x320xf32>
    %12 = vector.broadcast %11 : vector<1x320xf32> to vector<128x320xf32>
    %13 = arith.addf %10, %12 : vector<128x320xf32>
    %cst_5 = arith.constant 0.000000e+00 : f32
    %14 = vector.broadcast %cst_5 : f32 to vector<128x320xf32>
    %15 = arith.maximumf %13, %14 : vector<128x320xf32>
    %cst_6 = arith.constant 0.000000e+00 : f32
    %16 = vector.shape_cast %7 : vector<128x1xi1> to vector<128x1xi1>
    %17 = vector.broadcast %16 : vector<128x1xi1> to vector<128x320xi1>
    %18 = vector.broadcast %cst_6 : f32 to vector<128x320xf32>
    %19 = arith.select %17, %15, %18 : vector<128x320xi1>, vector<128x320xf32>
    %cst_7 = arith.constant 0.000000e+00 : f32
    %20 = vector.broadcast %cst_7 : f32 to vector<8x320xf32>
    %c0_8 = arith.constant 0 : index
    %c0_9 = arith.constant 0 : index
    %21 = vector.load %arg11[%c0_8, %c0_9] : memref<144x320xf32, #tpu.memory_space<vmem>>, vector<8x320xf32>
    tpu.vector_store %arg11[%c0_8, %c0_9], %20 {strides = array<i32>} : memref<144x320xf32, #tpu.memory_space<vmem>>, vector<8x320xf32>,
    %cst_10 = arith.constant 0.000000e+00 : f32
    %22 = vector.broadcast %cst_10 : f32 to vector<8x320xf32>
    %c136 = arith.constant 136 : index
    %c0_11 = arith.constant 0 : index
    %23 = vector.load %arg11[%c136, %c0_11] : memref<144x320xf32, #tpu.memory_space<vmem>>, vector<8x320xf32>
    tpu.vector_store %arg11[%c136, %c0_11], %22 {strides = array<i32>} : memref<144x320xf32, #tpu.memory_space<vmem>>, vector<8x320xf32>,
    %c8 = arith.constant 8 : index
    %c0_12 = arith.constant 0 : index
    %24 = vector.load %arg11[%c8, %c0_12] : memref<144x320xf32, #tpu.memory_space<vmem>>, vector<128x320xf32>
    tpu.vector_store %arg11[%c8, %c0_12], %19 {strides = array<i32>} : memref<144x320xf32, #tpu.memory_space<vmem>>, vector<128x320xf32>,
    %c7 = arith.constant 7 : index
    %c0_13 = arith.constant 0 : index
    %25 = vector.load %arg11[%c7, %c0_13] : memref<144x320xf32, #tpu.memory_space<vmem>>, vector<128x320xf32>
    %c8_14 = arith.constant 8 : index
    %c0_15 = arith.constant 0 : index
    %26 = vector.load %arg11[%c8_14, %c0_15] : memref<144x320xf32, #tpu.memory_space<vmem>>, vector<128x320xf32>
    %c9 = arith.constant 9 : index
    %c0_16 = arith.constant 0 : index
    %27 = vector.load %arg11[%c9, %c0_16] : memref<144x320xf32, #tpu.memory_space<vmem>>, vector<128x320xf32>
    %28 = tpu.concatenate %25, %26, %27 in 1 : vector<128x320xf32>, vector<128x320xf32>, vector<128x320xf32> -> vector<128x960xf32>
    %29 = arith.truncf %28 : vector<128x960xf32> to vector<128x960xbf16>
    %c0_17 = arith.constant 0 : index
    %c0_18 = arith.constant 0 : index
    %30 = vector.load %arg4[%c0_17, %c0_18] : memref<960x640xbf16, #tpu.memory_space<vmem>>, vector<960x640xbf16>
    %cst_19 = arith.constant dense<0.000000e+00> : vector<128x640xf32>
    %31 = tpu.matmul %29, %30, %cst_19 {dimension_numbers = #tpu.dot_dimension_numbers<[1], [0], [0], [1], [0, 0, 1, 1], [], []>} : vector<128x960xbf16>, vector<960x640xbf16>, vector<128x640xf32> -> vector<128x640xf32>
    %c0_20 = arith.constant 0 : index
    %c0_21 = arith.constant 0 : index
    %32 = vector.load %arg5[%c0_20, %c0_21] : memref<1x640xf32, #tpu.memory_space<vmem>>, vector<1x640xf32>
    %33 = vector.broadcast %32 : vector<1x640xf32> to vector<128x640xf32>
    %34 = arith.addf %31, %33 : vector<128x640xf32>
    %cst_22 = arith.constant 0.000000e+00 : f32
    %35 = vector.broadcast %cst_22 : f32 to vector<128x640xf32>
    %36 = arith.maximumf %34, %35 : vector<128x640xf32>
    %37 = arith.truncf %36 : vector<128x640xf32> to vector<128x640xbf16>
    %c0_23 = arith.constant 0 : index
    %c0_24 = arith.constant 0 : index
    %38 = vector.load %arg6[%c0_23, %c0_24] : memref<640x64xbf16, #tpu.memory_space<vmem>>, vector<640x64xbf16>
    %cst_25 = arith.constant dense<0.000000e+00> : vector<128x64xf32>
    %39 = tpu.matmul %37, %38, %cst_25 {dimension_numbers = #tpu.dot_dimension_numbers<[1], [0], [0], [1], [0, 0, 1, 1], [], []>} : vector<128x640xbf16>, vector<640x64xbf16>, vector<128x64xf32> -> vector<128x64xf32>
    %c0_26 = arith.constant 0 : index
    %c0_27 = arith.constant 0 : index
    %40 = vector.load %arg7[%c0_26, %c0_27] : memref<1x64xf32, #tpu.memory_space<vmem>>, vector<1x64xf32>
    %41 = vector.broadcast %40 : vector<1x64xf32> to vector<128x64xf32>
    %42 = arith.addf %39, %41 : vector<128x64xf32>
    %cst_28 = arith.constant 0.000000e+00 : f32
    %43 = vector.broadcast %cst_28 : f32 to vector<128x64xf32>
    %44 = arith.maximumf %42, %43 : vector<128x64xf32>
    %cst_29 = arith.constant 0.000000e+00 : f32
    %45 = vector.shape_cast %7 : vector<128x1xi1> to vector<128x1xi1>
    %46 = vector.broadcast %45 : vector<128x1xi1> to vector<128x64xi1>
    %47 = vector.broadcast %cst_29 : f32 to vector<128x64xf32>
    %48 = arith.select %46, %44, %47 : vector<128x64xi1>, vector<128x64xf32>
    %cst_30 = arith.constant 0.000000e+00 : f32
    %49 = vector.broadcast %cst_30 : f32 to vector<8x64xf32>
    %c0_31 = arith.constant 0 : index
    %c0_32 = arith.constant 0 : index
    %50 = vector.load %arg12[%c0_31, %c0_32] : memref<144x64xf32, #tpu.memory_space<vmem>>, vector<8x64xf32>
    tpu.vector_store %arg12[%c0_31, %c0_32], %49 {strides = array<i32>} : memref<144x64xf32, #tpu.memory_space<vmem>>, vector<8x64xf32>,
    %cst_33 = arith.constant 0.000000e+00 : f32
    %51 = vector.broadcast %cst_33 : f32 to vector<8x64xf32>
    %c136_34 = arith.constant 136 : index
    %c0_35 = arith.constant 0 : index
    %52 = vector.load %arg12[%c136_34, %c0_35] : memref<144x64xf32, #tpu.memory_space<vmem>>, vector<8x64xf32>
    tpu.vector_store %arg12[%c136_34, %c0_35], %51 {strides = array<i32>} : memref<144x64xf32, #tpu.memory_space<vmem>>, vector<8x64xf32>,
    %c8_36 = arith.constant 8 : index
    %c0_37 = arith.constant 0 : index
    %53 = vector.load %arg12[%c8_36, %c0_37] : memref<144x64xf32, #tpu.memory_space<vmem>>, vector<128x64xf32>
    tpu.vector_store %arg12[%c8_36, %c0_37], %48 {strides = array<i32>} : memref<144x64xf32, #tpu.memory_space<vmem>>, vector<128x64xf32>,
    %c7_38 = arith.constant 7 : index
    %c0_39 = arith.constant 0 : index
    %54 = vector.load %arg12[%c7_38, %c0_39] : memref<144x64xf32, #tpu.memory_space<vmem>>, vector<128x64xf32>
    %c8_40 = arith.constant 8 : index
    %c0_41 = arith.constant 0 : index
    %55 = vector.load %arg12[%c8_40, %c0_41] : memref<144x64xf32, #tpu.memory_space<vmem>>, vector<128x64xf32>
    %c9_42 = arith.constant 9 : index
    %c0_43 = arith.constant 0 : index
    %56 = vector.load %arg12[%c9_42, %c0_43] : memref<144x64xf32, #tpu.memory_space<vmem>>, vector<128x64xf32>
    %57 = tpu.concatenate %54, %55, %56 in 1 : vector<128x64xf32>, vector<128x64xf32>, vector<128x64xf32> -> vector<128x192xf32>
    %58 = arith.truncf %57 : vector<128x192xf32> to vector<128x192xbf16>
    %c0_44 = arith.constant 0 : index
    %c0_45 = arith.constant 0 : index
    %59 = vector.load %arg8[%c0_44, %c0_45] : memref<192x64xbf16, #tpu.memory_space<vmem>>, vector<192x64xbf16>
    %cst_46 = arith.constant dense<0.000000e+00> : vector<128x64xf32>
    %60 = tpu.matmul %58, %59, %cst_46 {dimension_numbers = #tpu.dot_dimension_numbers<[1], [0], [0], [1], [0, 0, 1, 1], [], []>} : vector<128x192xbf16>, vector<192x64xbf16>, vector<128x64xf32> -> vector<128x64xf32>
    %c0_47 = arith.constant 0 : index
    %c0_48 = arith.constant 0 : index
    %61 = vector.load %arg9[%c0_47, %c0_48] : memref<1x64xf32, #tpu.memory_space<vmem>>, vector<1x64xf32>
    %62 = vector.broadcast %61 : vector<1x64xf32> to vector<128x64xf32>
    %63 = arith.addf %60, %62 : vector<128x64xf32>
    %cst_49 = arith.constant 0.000000e+00 : f32
    %64 = vector.broadcast %cst_49 : f32 to vector<128x64xf32>
    %65 = arith.maximumf %63, %64 : vector<128x64xf32>
    %cst_50 = arith.constant 0.000000e+00 : f32
    %66 = vector.broadcast %cst_50 : f32 to vector<128x64xf32>
    %67 = tpu.concatenate %65, %66 in 1 : vector<128x64xf32>, vector<128x64xf32> -> vector<128x128xf32>
    %c0_51 = arith.constant 0 : index
    %c0_52 = arith.constant 0 : index
    %68 = vector.load %arg10[%c0_51, %c0_52] : memref<128x128xf32, #tpu.memory_space<vmem>>, vector<128x128xf32>
    tpu.vector_store %arg10[%c0_51, %c0_52], %67 {strides = array<i32>} : memref<128x128xf32, #tpu.memory_space<vmem>>, vector<128x128xf32>,
    return
  }
  func.func @transform_0(%arg0: i32) -> (i32, i32) {
    %c0_i32 = arith.constant 0 : i32
    %c0_i32_0 = arith.constant 0 : i32
    return %arg0, %c0_i32 : i32, i32
  }
  func.func @transform_1(%arg0: i32) -> (i32, i32) {
    %c0_i32 = arith.constant 0 : i32
    %c0_i32_0 = arith.constant 0 : i32
    %c0_i32_1 = arith.constant 0 : i32
    return %c0_i32, %c0_i32_0 : i32, i32
  }
  func.func @transform_2(%arg0: i32) -> (i32, i32) {
    %c0_i32 = arith.constant 0 : i32
    %c0_i32_0 = arith.constant 0 : i32
    %c0_i32_1 = arith.constant 0 : i32
    return %c0_i32, %c0_i32_0 : i32, i32
  }
  func.func @transform_3(%arg0: i32) -> (i32, i32) {
    %c0_i32 = arith.constant 0 : i32
    %c0_i32_0 = arith.constant 0 : i32
    %c0_i32_1 = arith.constant 0 : i32
    return %c0_i32, %c0_i32_0 : i32, i32
  }
  func.func @transform_4(%arg0: i32) -> (i32, i32) {
    %c0_i32 = arith.constant 0 : i32
    %c0_i32_0 = arith.constant 0 : i32
    %c0_i32_1 = arith.constant 0 : i32
    return %c0_i32, %c0_i32_0 : i32, i32
  }
  func.func @transform_5(%arg0: i32) -> (i32, i32) {
    %c0_i32 = arith.constant 0 : i32
    %c0_i32_0 = arith.constant 0 : i32
    %c0_i32_1 = arith.constant 0 : i32
    return %c0_i32, %c0_i32_0 : i32, i32
  }
  func.func @transform_6(%arg0: i32) -> (i32, i32) {
    %c0_i32 = arith.constant 0 : i32
    %c0_i32_0 = arith.constant 0 : i32
    %c0_i32_1 = arith.constant 0 : i32
    return %c0_i32, %c0_i32_0 : i32, i32
  }
  func.func @transform_7(%arg0: i32) -> (i32, i32) {
    %c0_i32 = arith.constant 0 : i32
    %c0_i32_0 = arith.constant 0 : i32
    %c0_i32_1 = arith.constant 0 : i32
    return %c0_i32, %c0_i32_0 : i32, i32
  }
  func.func @transform_8(%arg0: i32) -> (i32, i32) {
    %c0_i32 = arith.constant 0 : i32
    %c0_i32_0 = arith.constant 0 : i32
    %c0_i32_1 = arith.constant 0 : i32
    return %c0_i32, %c0_i32_0 : i32, i32
  }
  func.func @transform_9(%arg0: i32) -> (i32, i32) {
    %c0_i32 = arith.constant 0 : i32
    %c0_i32_0 = arith.constant 0 : i32
    return %arg0, %c0_i32 : i32, i32
  }
}

</mosaic_0001>

<bundles_post_ra>
// kernel: tpu_custom_call.1
= control target key start
LH: loop header
LB: loop body
LE: loop exit
PB: predicated region body
PF: predicated region fallthrough
CT: control target
= control target key end

     0   :  { %s11911_s0 = inlined_call_operand.hbm [shape: bf16[256,128], index: 0, kind: input, shape index: {}]   ;;  %s11912_s1 = inlined_call_operand.vmem [shape: bf16[128,320], index: 1, kind: input, shape index: {}]   ;;  %s11913_s2 = inlined_call_operand.hbm [shape: f32[1,320], index: 2, kind: input, shape index: {}]   ;;  %s11914_s3 = inlined_call_operand.hbm [shape: bf16[960,640], index: 3, kind: input, shape index: {}]   ;;  %s11915_s4 = inlined_call_operand.hbm [shape: f32[1,640], index: 4, kind: input, shape index: {}]   ;;  %s11916_s5 = inlined_call_operand.vmem [shape: bf16[640,64], index: 5, kind: input, shape index: {}]   ;;  %s11917_s6 = inlined_call_operand.hbm [shape: f32[1,64], index: 6, kind: input, shape index: {}]   ;;  %s11918_s7 = inlined_call_operand.vmem [shape: bf16[192,64], index: 7, kind: input, shape index: {}]   ;;  %s11919_s8 = inlined_call_operand.hbm [shape: f32[1,64], index: 8, kind: input, shape index: {}]   ;;  %s11920_s9 = inlined_call_operand.hbm [shape: f32[256,128], index: 9, kind: output, shape index: {}]  }
   0x1   :  { %12037 = sst [smem:[#allocation73_spill]] %s11913_s2 }
   0x2   :  { %12038 = sst [smem:[#allocation74_spill]] %s11915_s4 }
   0x3   :  { %12039 = sst [smem:[#allocation75_spill]] %s11920_s9 }
   0x4   :  { %14 = vsyncpa [#allocation5], 0 }
   0x5   :  { %16 = vsyncpa [#allocation5 + $0x1], 0 }
   0x6   :  { %17 = vsyncpa [#allocation8], 0 }
   0x7   :  { %18 = vsyncpa [#allocation11], 0 }
   0x8   :  { %19 = vsyncpa [#allocation14], 0 }
   0x9   :  { %20 = vsyncpa [#allocation6], 0 }
   0xa   :  { %22 = vsyncpa [#allocation6 + $0x1], 0  ;;  %s9324_s30 = smov 0   ;;  %s9326_s10 = smov 0  }
   0xb   :  { %s9328_s11 = smov 0   ;;  %s9330_s12 = smov 0  }
   0xc LB: > { %s9258_s13 = smov [#allocation7]   ;;  %s9345_s15 = sadd.s32 4294967295, %s9256_s12   ;;  %s9256_s12 = sphi %s9330_s12, %s12583_s12   ;;  %s9252_s11 = sphi %s9328_s11, %s12582_s11   ;;  %s9248_s10 = sphi %s9326_s10, %s12581_s10   ;;  %s9244_s30 = sphi %s9324_s30, %s12580_s30  }
   0xd   : > { %s269_s14 = sshll.u32 %s9258_s13, 4  ;;  %p7069_p0 = scmp.ge.s32.totalorder %s9256_s12, 1  ;;  %s9350_s14 = int_to_ptr.vmem [resolvable:$true] %s269_s14 }
   0xe   : > { %p11922_p1 = scmp.eq.s32.totalorder %s9345_s15, 0  ;;  %p253_p2 = scmp.lt.s32.totalorder %s9256_s12, 3 }
   0xf   : > { %s9259_s17 = smov [#allocation10]   ;;  %s9260_s19 = smov [#allocation9]  }
  0x10   : > { %p9352_p3 = pnand %p7069_p0, %p253_p2  ;;  %s293_s18 = sshll.u32 %s9259_s17, 4  ;;  %s9359_s18 = int_to_ptr.vmem [resolvable:$true] %s293_s18 }
  0x11   : > { %s279_s20 = sshll.u32 %s9260_s19, 4  ;;  %s12042_s2 = sld [smem:[#allocation73_spill]]  ;;  %s9367_s20 = int_to_ptr.vmem [resolvable:$true] %s279_s20 }
  0x12   : > { %s12040_s16 = scalar_select %p9352_p3, 1, 0 }
  0x13   : > { %p8232_p5 = pneg %p9352_p3 }
  0x15   : > { %p9363_p6 = pnand %p8232_p5, %p11922_p1 }
  0x17   : > { %s9008_s24 = scalar_lea.hbm %s12042_s2, 48  ;;  %p9377_p8 = pneg %p9363_p6 }
  0x18   : > { %p9009_p7 = scmp.ne.s32.totalorder %s12042_s2, %s9008_s24  ;;  %p9015_p11 = scmp.lt.u32.totalorder %s9008_s24, %s12042_s2 }
  0x1a   : > { %p9011_p9 = pnand %p9377_p8, %p9009_p7 }
  0x1c   : > { %p9012_p10 = pneg %p9011_p9 }
  0x1e   : > { %p9017_p12 = pnand %p9015_p11, %p9012_p10 }
  0x20   : > { %9020 = shalt.err (!%p9017_p12)
}
  0x21   : > { %s9021_s13 = scalar_lea.vmem %s9350_s14, 48  ;;  %s9028_s17 = scalar_lea.vmem %s9350_s14, 64 }
  0x22   : > { %p9022_p13 = scmp.ne.s32.totalorder %s9350_s14, %s9021_s13  ;;  %p9029_p5 = scmp.lt.s32.totalorder %s9350_s14, %s9350_s14 }
  0x23   : > { %p9030_p7 = scmp.lt.s32.totalorder %s9028_s17, %s9021_s13 }
  0x24   : > { %p9024_p0 = pnand %p9022_p13, %p9377_p8 }
  0x25   : > { %p9031_p9 = por %p9030_p7, %p9029_p5 }
  0x26   : > { %p9025_p2 = pneg %p9024_p0 }
  0x28   : > { %p9032_p4 = pnand %p9031_p9, %p9025_p2 }
  0x2a   : > { %9035 = shalt.err (!%p9032_p4)
}
  0x2b   : > { %8235 = dma.hbm_to_vmem [thread:$0]  (!%p9363_p6), %s12042_s2, 48, %s9350_s14, [#allocation8]  }
  0x2c   : > { %s12044_s4 = sld [smem:[#allocation74_spill]] }
  0x32   : > { %s9036_s25 = scalar_lea.hbm %s12044_s4, 80 }
  0x33   : > { %p9037_p10 = scmp.ne.s32.totalorder %s12044_s4, %s9036_s25  ;;  %p9043_p4 = scmp.lt.u32.totalorder %s9036_s25, %s12044_s4 }
  0x35   : > { %p9039_p11 = pnand %p9037_p10, %p9377_p8 }
  0x37   : > { %p9040_p12 = pneg %p9039_p11 }
  0x39   : > { %p9045_p13 = pnand %p9043_p4, %p9040_p12 }
  0x3b   : > { %9048 = shalt.err (!%p9045_p13)
}
  0x3c   : > { %s9049_s14 = scalar_lea.vmem %s9359_s18, 80  ;;  %s9056_s17 = scalar_lea.vmem %s9359_s18, 96 }
  0x3d   : > { %p9050_p0 = scmp.ne.s32.totalorder %s9359_s18, %s9049_s14  ;;  %p9057_p7 = scmp.lt.s32.totalorder %s9359_s18, %s9359_s18 }
  0x3e   : > { %p9058_p9 = scmp.lt.s32.totalorder %s9056_s17, %s9049_s14 }
  0x3f   : > { %p9052_p2 = pnand %p9050_p0, %p9377_p8 }
  0x40   : > { %p9059_p10 = por %p9058_p9, %p9057_p7 }
  0x41   : > { %p9053_p5 = pneg %p9052_p2 }
  0x43   : > { %p9060_p11 = pnand %p9059_p10, %p9053_p5 }
  0x45   : > { %9063 = shalt.err (!%p9060_p11)
}
  0x46   : > { %8241 = dma.hbm_to_vmem [thread:$0]  (!%p9363_p6), %s12044_s4, 80, %s9359_s18, [#allocation11]  }
  0x47   : > { %s9064_s25 = scalar_lea.hbm %s11914_s3, 38400 }
  0x48   : > { %p9065_p12 = scmp.ne.s32.totalorder %s11914_s3, %s9064_s25  ;;  %p9071_p0 = scmp.lt.u32.totalorder %s9064_s25, %s11914_s3 }
  0x4a   : > { %p9067_p4 = pnand %p9065_p12, %p9377_p8 }
  0x4c   : > { %p9068_p13 = pneg %p9067_p4 }
  0x4e   : > { %p9073_p2 = pnand %p9071_p0, %p9068_p13 }
  0x50   : > { %9076 = shalt.err (!%p9073_p2)
}
  0x51   : > { %s9077_s18 = scalar_lea.vmem %s9367_s20, 38400  ;;  %p9085_p10 = scmp.lt.s32.totalorder %s9367_s20, %s9367_s20 }
  0x52   : > { %p9078_p5 = scmp.ne.s32.totalorder %s9367_s20, %s9077_s18  ;;  %p9086_p11 = scmp.lt.s32.totalorder %s9077_s18, %s9077_s18 }
  0x54   : > { %p9080_p7 = pnand %p9078_p5, %p9377_p8  ;;  %p9087_p12 = por %p9086_p11, %p9085_p10 }
  0x56   : > { %p9081_p9 = pneg %p9080_p7 }
  0x58   : > { %p9088_p4 = pnand %p9087_p12, %p9081_p9 }
  0x5a   : > { %9091 = shalt.err (!%p9088_p4)
}
  0x5b   : > { %s9261_s14 = smov 320   ;;  %s9262_s17 = smov 20  }
  0x5c   : > { %8238 = dma.hbm_to_vmem [thread:$0]  (!%p9363_p6), %s11914_s3, 38400, %s9367_s20, [#allocation8], %s9261_s14, %s9261_s14, %s9262_s17  }
  0x5d   : > { %s9263_s23 = smov [#allocation12]   ;;  %s9264_s25 = smov [#allocation13]  }
  0x5e   : > { %s307_s24 = sshll.u32 %s9263_s23, 4  ;;  %s321_s26 = sshll.u32 %s9264_s25, 4  ;;  %s308_s24 = int_to_ptr.vmem [resolvable:$true] %s307_s24  ;;  %s322_s26 = int_to_ptr.vmem [resolvable:$true] %s321_s26 }
  0x5f   : > { %s9092_s13 = scalar_lea.hbm %s11917_s6, 16 }
  0x60   : > { %p9093_p13 = scmp.ne.s32.totalorder %s11917_s6, %s9092_s13  ;;  %p9099_p5 = scmp.lt.u32.totalorder %s9092_s13, %s11917_s6 }
  0x62   : > { %p9095_p0 = pnand %p9093_p13, %p9377_p8 }
  0x64   : > { %p9096_p2 = pneg %p9095_p0 }
  0x66   : > { %p9101_p7 = pnand %p9099_p5, %p9096_p2 }
  0x68   : > { %9104 = shalt.err (!%p9101_p7)
}
  0x69   : > { %s9105_s20 = scalar_lea.vmem %s308_s24, 16  ;;  %s9112_s14 = scalar_lea.vmem %s308_s24, 32 }
  0x6a   : > { %p9106_p9 = scmp.ne.s32.totalorder %s308_s24, %s9105_s20  ;;  %p9113_p12 = scmp.lt.s32.totalorder %s308_s24, %s308_s24 }
  0x6b   : > { %p9114_p4 = scmp.lt.s32.totalorder %s9112_s14, %s9105_s20 }
  0x6c   : > { %p9108_p10 = pnand %p9106_p9, %p9377_p8 }
  0x6d   : > { %p9115_p1 = por %p9114_p4, %p9113_p12 }
  0x6e   : > { %p9109_p11 = pneg %p9108_p10 }
  0x70   : > { %p9116_p3 = pnand %p9115_p1, %p9109_p11 }
  0x72   : > { %9119 = shalt.err (!%p9116_p3)
}
  0x73   : > { %8244 = dma.hbm_to_vmem [thread:$0]  (!%p9363_p6), %s11917_s6, 16, %s308_s24, [#allocation11]  }
  0x74   : > { %s9120_s19 = scalar_lea.hbm %s11919_s8, 16 }
  0x75   : > { %p9121_p13 = scmp.ne.s32.totalorder %s11919_s8, %s9120_s19  ;;  %p9127_p3 = scmp.lt.u32.totalorder %s9120_s19, %s11919_s8 }
  0x77   : > { %p9123_p0 = pnand %p9121_p13, %p9377_p8 }
  0x79   : > { %p9124_p1 = pneg %p9123_p0 }
  0x7b   : > { %p9129_p2 = pnand %p9127_p3, %p9124_p1 }
  0x7d   : > { %9132 = shalt.err (!%p9129_p2)
}
  0x7e   : > { %s9133_s29 = scalar_lea.vmem %s322_s26, 16  ;;  %s9140_s24 = scalar_lea.vmem %s322_s26, 32 }
  0x7f   : > { %p9134_p5 = scmp.ne.s32.totalorder %s322_s26, %s9133_s29  ;;  %p9141_p10 = scmp.lt.s32.totalorder %s322_s26, %s322_s26 }
  0x80   : > { %p9142_p11 = scmp.lt.s32.totalorder %s9140_s24, %s9133_s29 }
  0x81   : > { %p9136_p7 = pnand %p9134_p5, %p9377_p8 }
  0x82   : > { %p9143_p12 = por %p9142_p11, %p9141_p10 }
  0x83   : > { %p9137_p9 = pneg %p9136_p7 }
  0x85   : > { %p9144_p4 = pnand %p9143_p12, %p9137_p9 }
  0x87   : > { %9147 = shalt.err (!%p9144_p4)
}
  0x88   : > { %8247 = dma.hbm_to_vmem [thread:$0]  (!%p9363_p6), %s11919_s8, 16, %s322_s26, [#allocation14]  }
  0x89   : > { %s7068_s27 = sadd.s32 4294967294, %s9256_s12   ;;  %s9484_s21 = sadd.s32 1, %s9256_s12  }
  0x8a   : > { %s35_s20 = sadd.s32 1, %s9252_s11  ;;  %s32_s14 = ssub.s32 %s9256_s12, %s9484_s21 }
  0x8b   : > { %p42_p8 = scmp.ne.s32.totalorder %s9252_s11, %s9248_s10  ;;  %p33_p13 = scmp.eq.s32.totalorder %s32_s14, 0 }
  0x8c   : > { %p43_p0 = scmp.eq.s32.totalorder %s9256_s12, 0  ;;  %p48_p1 = scmp.ne.s32.totalorder %s9248_s10, %s9244_s30 }
  0x8d   : > { %p240_p3 = scmp.eq.s32.totalorder %s9345_s15, 1  ;;  %p12045_p5 = scmp.eq.s32.totalorder %s9345_s15, 0 }
  0x8e   : > { %s9496_s2 = scalar_select %p33_p13, %s9252_s11, %s35_s20  }
  0x8f   : > { %p44_p2 = por %p43_p0, %p42_p8  ;;  %p9500_p7 = por %p12045_p5, %p48_p1 }
  0x90   : > { %p9504_p6 = por %p240_p3, %p42_p8  ;;  %p246_p9 = scmp.eq.s32.totalorder %s7068_s27, 1 }
  0x91   : > { %p8261_p10 = scmp.lt.s32.totalorder %s9256_s12, 2  ;;  %s332_s4 = sand.u32 1, %s9252_s11  }
  0x92   : > { %s12047_s26 = scalar_select %p9504_p6, 1, 0 }
  0x93   : > { %p9510_p11 = por %p246_p9, %p48_p1  ;;  %s7076_s19 = sshll.u32 %s332_s4, 6 }
  0x94   : > { %s7510_s22 = sshll.u32 %s9256_s12, 10  ;;  %s336_s29 = scalar_lea.vmem [#allocation4], %s7076_s19 }
  0x95   : > { %s12048_s9 = scalar_select %p9510_p11, 1, 0 }
  0x96   : > { %s9518_s28 = scalar_lea.hbm %s11911_s0, %s7510_s22  ;;  %s343_s24 = sshll.u32 %s336_s29, 4  ;;  %s9524_s24 = int_to_ptr.vmem [resolvable:$true] %s343_s24 }
  0x97   : > { %p9520_p12 = pnand %p8261_p10, %p44_p2  ;;  %s9526_s18 = scalar_lea.sflag [#allocation5], %s332_s4 }
  0x98   : > { %s9148_s27 = scalar_lea.hbm %s9518_s28, 1024  ;;  %s9153_s19 = scalar_lea.hbm %s11911_s0, 2048 }
  0x99   : > { %p9149_p4 = scmp.ne.s32.totalorder %s9518_s28, %s9148_s27  ;;  %p9150_p8 = pneg %p9520_p12 }
  0x9a   : > { %p9154_p1 = scmp.lt.u32.totalorder %s9518_s28, %s11911_s0  ;;  %p9155_p3 = scmp.lt.u32.totalorder %s9153_s19, %s9148_s27 }
  0x9b   : > { %p9151_p13 = pnand %p9150_p8, %p9149_p4  ;;  %p9157_p5 = scmp.lt.u32.totalorder %s9148_s27, %s9518_s28 }
  0x9c   : > { %p9156_p2 = por %p9155_p3, %p9154_p1 }
  0x9d   : > { %p9152_p0 = pneg %p9151_p13 }
  0x9e   : > { %p9158_p9 = por %p9157_p5, %p9156_p2 }
  0xa0   : > { %p9159_p10 = pnand %p9158_p9, %p9152_p0 }
  0xa2   : > { %9162 = shalt.err (!%p9159_p10)
}
  0xa3   : > { %s9163_s4 = scalar_lea.vmem %s9524_s24, 1024  ;;  %s9265_s25 = smov [#allocation4]  }
  0xa4   : > { %p9164_p4 = scmp.ne.s32.totalorder %s9524_s24, %s9163_s4  ;;  %s9168_s29 = sshll.u32 %s9265_s25, 4  ;;  %s9169_s29 = int_to_ptr.vmem [resolvable:$false] %s9168_s29 }
  0xa5   : > { %s9170_s20 = scalar_lea.vmem %s9169_s29, 2048  ;;  %p9171_p6 = scmp.lt.s32.totalorder %s9524_s24, %s9169_s29 }
  0xa6   : > { %p9166_p13 = pnand %p9164_p4, %p9150_p8  ;;  %p9172_p1 = scmp.lt.s32.totalorder %s9170_s20, %s9163_s4 }
  0xa8   : > { %p9167_p11 = pneg %p9166_p13  ;;  %p9173_p3 = por %p9172_p1, %p9171_p6 }
  0xaa   : > { %p9174_p2 = pnand %p9173_p3, %p9167_p11 }
  0xac   : > { %9177 = shalt.err (!%p9174_p2)
}
  0xad   : > { %s9266_s27 = smov 64   ;;  %s9267_s14 = smov 4  }
  0xae   : > { %8251 = dma.hbm_to_vmem [thread:$0]  (!%p9520_p12), %s9518_s28, 1024, %s9524_s24, %s9526_s18, %s9266_s27, %s9266_s27, %s9267_s14  }
  0xaf   : > { %p12050_p8 = scmp.ne.s32.totalorder %s12040_s16, 0 }
  0xb1   : > { %355 = sbr.rel (%p12050_p8) target bundleno = 1769 (0x6e9), region = 56 }
  0xb8   : > { %s9557_s19 = sand.u32 1, %s9248_s10  }
  0xb9   : > { %s7080_s22 = sshll.u32 %s9557_s19, 6  ;;  %s358_s23 = scalar_lea.sflag [#allocation5], %s9557_s19 }
  0xba   : > { %s9561_s4 = scalar_lea.vmem [#allocation4], %s7080_s22 }
  0xbb   : > { %9223 = dma.done.wait (%p9500_p7), %s358_s23, 1024  }
  0xbc   : > { %9225 = vsyncadd (%p9500_p7), %s358_s23, 4294966272  ;;  %p12051_p6 = scmp.eq.s32.totalorder %s9345_s15, 0 }
  0xbe   : > { %9227 = dma.done.wait (%p12051_p6), [#allocation8], 38448   ;;  %p12052_p11 = pmov %p12051_p6 }
  0xbf   : > { %p12053_p12 = pmov %p12051_p6 }
  0xc0   : > { %9229 = vsyncadd (%p12052_p11), [#allocation8], 4294928848 }
  0xc1   : > { %9231 = dma.done.wait (%p12053_p12), [#allocation11], 96   ;;  %p12054_p0 = pmov %p12051_p6 }
  0xc3   : > { %9233 = vsyncadd (%p12054_p0), [#allocation11], 4294967200  ;;  %p12055_p5 = pmov %p12054_p0 }
  0xc4   : > { %p12056_p9 = pmov %p12054_p0 }
  0xc5   : > { %9235 = dma.done.wait (%p12055_p5), [#allocation14], 16  }
  0xc6   : > { %9237 = vsyncadd (%p12056_p9), [#allocation14], 4294967280  ;;  %v11927_v0 = vmov 0   ;;  %v8479_v1 = vld [vmem:[%s11912_s1 + $0x4] ss:$12 sps:$4 sm:$0xff]   ;;  %v8504_v30 = vld [vmem:[%s9561_s4 + $0x8] sm:$0xff]  }
  0xc7   : > { %773 = vmatprep.mubr.bf16.mxu0 %v11927_v0  ;;  %v8481_v2 = vld [vmem:[%s11912_s1] ss:$12 sps:$4 sm:$0xff]   ;;  %741 = vmatprep.subr.bf16.mxu0 %v8479_v1  ;;  %v8482_v3 = vld [vmem:[%s11912_s1 + $0x1c] ss:$12 sps:$4 sm:$0xff]   ;;  %v8484_v4 = vld [vmem:[%s11912_s1 + $0x18] ss:$12 sps:$4 sm:$0xff]  }
  0xc8   : > { %742 = vmatpush1.bf16.msra.mxu0 %v8481_v2  ;;  %v8485_v5 = vld [vmem:[%s11912_s1 + $0x34] ss:$12 sps:$4 sm:$0xff]   ;;  %v8487_v6 = vld [vmem:[%s11912_s1 + $0x30] ss:$12 sps:$4 sm:$0xff]   ;;  %v8488_v7 = vld [vmem:[%s11912_s1 + $0x4c] ss:$12 sps:$4 sm:$0xff]  }
  0xc9   : > { %743 = vmatprep.subr.bf16.mxu0 %v8482_v3  ;;  %v8490_v8 = vld [vmem:[%s11912_s1 + $0x48] ss:$12 sps:$4 sm:$0xff]   ;;  %v8503_v9 = vld [vmem:[%s9561_s4] sm:$0xff]   ;;  %v8510_v18 = vld [vmem:[%s11912_s1 + $0x50] ss:$12 sps:$4 sm:$0xff]   ;;  %vm11953_vm0 = vcmask 523264  }
  0xca   : > { %v8491_v10 = vld [vmem:[%s11912_s1 + $0x64] ss:$12 sps:$4 sm:$0xff]   ;;  %v8493_v11 = vld [vmem:[%s11912_s1 + $0x60] ss:$12 sps:$4 sm:$0xff]   ;;  %7880 = vmatprep.mubr.bf16.mxu1 %v8503_v9  ;;  %v8506_v12 = vld [vmem:[%s11912_s1 + $0x8] ss:$12 sps:$4 sm:$0xff]  }
  0xcb   : > { %v8507_v13 = vld [vmem:[%s11912_s1 + $0x20] ss:$12 sps:$4 sm:$0xff]   ;;  %v8494_v14 = vld [vmem:[%s11912_s1 + $0x7c] ss:$12 sps:$4 sm:$0xff]   ;;  %7864 = vmatprep.subr.bf16.mxu1 %v8506_v12  ;;  %v8509_v15 = vld [vmem:[%s11912_s1 + $0x38] ss:$12 sps:$4 sm:$0xff]  }
  0xcc   : > { %744 = vmatpush1.bf16.msra.mxu0 %v8484_v4  ;;  %7865 = vmatpush3.bf16.msra.mxu1 %v8506_v12  ;;  %v8496_v16 = vld [vmem:[%s11912_s1 + $0x78] ss:$12 sps:$4 sm:$0xff]   ;;  %v8497_v17 = vld [vmem:[%s11912_s1 + $0x94] ss:$12 sps:$4 sm:$0xff]   ;;  %v8499_v19 = vld [vmem:[%s11912_s1 + $0x90] ss:$12 sps:$4 sm:$0xff]  }
  0xcd   : > { %745 = vmatprep.subr.bf16.mxu0 %v8485_v5  ;;  %7866 = vmatprep.subr.bf16.mxu1 %v8507_v13  ;;  %v8500_v20 = vld [vmem:[%s11912_s1 + $0xac] ss:$12 sps:$4 sm:$0xff]   ;;  %v8512_v21 = vld [vmem:[%s11912_s1 + $0x68] ss:$12 sps:$4 sm:$0xff]   ;;  %v8527_v26 = vld [vmem:[#allocation9 + $0x2c] ss:$20 sps:$4 sm:$0xff]  }
  0xce   : > { %v8502_v22 = vld [vmem:[%s11912_s1 + $0xa8] ss:$12 sps:$4 sm:$0xff]   ;;  %v8513_v24 = vld [vmem:[%s11912_s1 + $0x80] ss:$12 sps:$4 sm:$0xff]   ;;  %v8519_v25 = vld [vmem:[#allocation9] ss:$20 sps:$4 sm:$0xff]  }
  0xcf   : > { %v8521_v23 = vld [vmem:[#allocation9 + $0x4] ss:$20 sps:$4 sm:$0xff]   ;;  %v8515_v27 = vld [vmem:[%s11912_s1 + $0x98] ss:$12 sps:$4 sm:$0xff]   ;;  %v8525_v28 = vld [vmem:[#allocation9 + $0x28] ss:$20 sps:$4 sm:$0xff]  }
  0xd0   : > { %746 = vmatpush1.bf16.msra.mxu0 %v8487_v6  ;;  %7867 = vmatpush3.bf16.msra.mxu1 %v8507_v13  ;;  %v8533_v29 = vld [vmem:[#allocation9 + $0x54] ss:$20 sps:$4 sm:$0xff]   ;;  %v8516_v31 = vld [vmem:[%s11912_s1 + $0xb0] ss:$12 sps:$4 sm:$0xff]   ;;  %v8531_v32 = vld [vmem:[#allocation9 + $0x50] ss:$20 sps:$4 sm:$0xff]  }
  0xd1   : > { %747 = vmatprep.subr.bf16.mxu0 %v8488_v7  ;;  %7868 = vmatprep.subr.bf16.mxu1 %v8509_v15  ;;  %v8539_v33 = vld [vmem:[#allocation9 + $0x7c] ss:$20 sps:$4 sm:$0xff]   ;;  %v8524_v34 = vld [vmem:[#allocation9 + $0xc] ss:$20 sps:$4 sm:$0xff]   ;;  %v8545_v36 = vld [vmem:[#allocation9 + $0xa4] ss:$20 sps:$4 sm:$0xff]  }
  0xd2   : > { %v8537_v35 = vld [vmem:[#allocation9 + $0x78] ss:$20 sps:$4 sm:$0xff]   ;;  %v8522_v37 = vld [vmem:[#allocation9 + $0x8] ss:$20 sps:$4 sm:$0xff]   ;;  %v8528_v40 = vld [vmem:[#allocation9 + $0x30] ss:$20 sps:$4 sm:$0xff]  }
  0xd3   : > { %v8505_v38 = vld [vmem:[%s9561_s4 + $0x10] sm:$0xff]   ;;  %v8530_v39 = vld [vmem:[#allocation9 + $0x34] ss:$20 sps:$4 sm:$0xff]   ;;  %v8542_v48 = vld [vmem:[#allocation9 + $0x84] ss:$20 sps:$4 sm:$0xff]   ;;  %vm11976_vm4 = vcmask 1046528  }
  0xd4   : > { %748 = vmatpush1.bf16.msra.mxu0 %v8490_v8  ;;  %7869 = vmatpush3.bf16.msra.mxu1 %v8509_v15  ;;  %v8543_v41 = vld [vmem:[#allocation9 + $0xa0] ss:$20 sps:$4 sm:$0xff]   ;;  %v8536_v42 = vld [vmem:[#allocation9 + $0x5c] ss:$20 sps:$4 sm:$0xff]   ;;  %v8534_v46 = vld [vmem:[#allocation9 + $0x58] ss:$20 sps:$4 sm:$0xff]  }
  0xd5   : > { %749 = vmatprep.subr.bf16.mxu0 %v8491_v10  ;;  %7870 = vmatprep.subr.bf16.mxu1 %v8510_v18  ;;  %v8551_v43 = vld [vmem:[#allocation9 + $0xcc] ss:$20 sps:$4 sm:$0xff]   ;;  %v8549_v44 = vld [vmem:[#allocation9 + $0xc8] ss:$20 sps:$4 sm:$0xff]   ;;  %v8508_v47 = vld [vmem:[%s9561_s4 + $0x18] sm:$0xff]   ;;  %v9269_v10 = vmov 0.0  }
  0xd6   : > { %v8557_v45 = vld [vmem:[#allocation9 + $0xf4] ss:$20 sps:$4 sm:$0xff]   ;;  %v8511_v49 = vld [vmem:[%s9561_s4 + $0x20] sm:$0xff]   ;;  %v8555_v50 = vld [vmem:[#allocation9 + $0xf0] ss:$20 sps:$4 sm:$0xff]   ;;  %1079 = vst [vmem:[#allocation2] sm:$0xff] %v9269_v10 }
  0xd7   : > { %v8563_v51 = vld [vmem:[#allocation9 + $0x11c] ss:$20 sps:$4 sm:$0xff]   ;;  %v8540_v52 = vld [vmem:[#allocation9 + $0x80] ss:$20 sps:$4 sm:$0xff]   ;;  %v8561_v54 = vld [vmem:[#allocation9 + $0x118] ss:$20 sps:$4 sm:$0xff]  }
  0xd8   : > { %750 = vmatpush1.bf16.msra.mxu0 %v8493_v11  ;;  %7871 = vmatpush3.bf16.msra.mxu1 %v8510_v18  ;;  %v8548_v53 = vld [vmem:[#allocation9 + $0xac] ss:$20 sps:$4 sm:$0xff]   ;;  %v8546_v55 = vld [vmem:[#allocation9 + $0xa8] ss:$20 sps:$4 sm:$0xff]   ;;  %v8552_v59 = vld [vmem:[#allocation9 + $0xd0] ss:$20 sps:$4 sm:$0xff]  }
  0xd9   : > { %751 = vmatprep.subr.bf16.mxu0 %v8494_v14  ;;  %7872 = vmatprep.subr.bf16.mxu1 %v8512_v21  ;;  %v8514_v56 = vld [vmem:[%s9561_s4 + $0x28] sm:$0xff]   ;;  %v8517_v58 = vld [vmem:[%s9561_s4 + $0x30] sm:$0xff]   ;;  %v8518_v62 = vld [vmem:[%s9561_s4 + $0x38] sm:$0xff]   ;;  %1080 = vst [vmem:[#allocation2 + $0x8] sm:$0xff] %v9269_v10  ;;  %s9270_s4 = smov 64   ;;  %s7511_s14 = sshll.u32 %s9345_s15, 11 }
  0xda   : > { %v8554_v57 = vld [vmem:[#allocation9 + $0xd4] ss:$20 sps:$4 sm:$0xff]   ;;  %v8560_v60 = vld [vmem:[#allocation9 + $0xfc] ss:$20 sps:$4 sm:$0xff]   ;;  %v8558_v61 = vld [vmem:[#allocation9 + $0xf8] ss:$20 sps:$4 sm:$0xff]  }
  0xdb   : > { %v8566_v63 = vld [vmem:[#allocation9 + $0x124] ss:$20 sps:$4 sm:$0xff]   ;;  %v8564_v1 = vld [vmem:[#allocation9 + $0x120] ss:$20 sps:$4 sm:$0xff]   ;;  %v8570_v5 = vld [vmem:[#allocation9 + $0x148] ss:$20 sps:$4 sm:$0xff]  }
  0xdc   : > { %752 = vmatpush1.bf16.msra.mxu0 %v8496_v16  ;;  %7873 = vmatpush3.bf16.msra.mxu1 %v8512_v21  ;;  %v8569_v2 = vld [vmem:[#allocation9 + $0x144] ss:$20 sps:$4 sm:$0xff]   ;;  %v8572_v3 = vld [vmem:[#allocation9 + $0x14c] ss:$20 sps:$4 sm:$0xff]   ;;  %v8578_v7 = vld [vmem:[#allocation9 + $0x174] ss:$20 sps:$4 sm:$0xff]  }
  0xdd   : > { %753 = vmatprep.subr.bf16.mxu0 %v8497_v17  ;;  %7874 = vmatprep.subr.bf16.mxu1 %v8513_v24  ;;  %v8567_v4 = vld [vmem:[#allocation9 + $0x140] ss:$20 sps:$4 sm:$0xff]   ;;  %v8573_v8 = vld [vmem:[#allocation9 + $0x168] ss:$20 sps:$4 sm:$0xff]   ;;  %1083 = vst [vmem:[#allocation2 + $0x198] sm:$0xff] %v9269_v10  ;;  %1084 = vst [vmem:[#allocation2 + $0x1a0] sm:$0xff] %v9269_v10 }
  0xde   : > { %v8575_v6 = vld [vmem:[#allocation9 + $0x16c] ss:$20 sps:$4 sm:$0xff]   ;;  %v8581_v11 = vld [vmem:[#allocation9 + $0x194] ss:$20 sps:$4 sm:$0xff]   ;;  %v8584_v12 = vld [vmem:[#allocation9 + $0x19c] ss:$20 sps:$4 sm:$0xff]  }
  0xdf   : > { %v8579_v13 = vld [vmem:[#allocation9 + $0x190] ss:$20 sps:$4 sm:$0xff]   ;;  %v8582_v14 = vld [vmem:[#allocation9 + $0x198] ss:$20 sps:$4 sm:$0xff]   ;;  %v8588_v18 = vld [vmem:[#allocation9 + $0x1c0] ss:$20 sps:$4 sm:$0xff]  }
  0xe0   : > { %754 = vmatpush1.bf16.msra.mxu0 %v8499_v19  ;;  %7875 = vmatpush3.bf16.msra.mxu1 %v8513_v24  ;;  %v8587_v15 = vld [vmem:[#allocation9 + $0x1bc] ss:$20 sps:$4 sm:$0xff]   ;;  %v8590_v16 = vld [vmem:[#allocation9 + $0x1c4] ss:$20 sps:$4 sm:$0xff]   ;;  %v8591_v21 = vld [vmem:[#allocation9 + $0x1e0] ss:$20 sps:$4 sm:$0xff]  }
  0xe1   : > { %755 = vmatprep.subr.bf16.mxu0 %v8500_v20  ;;  %7876 = vmatprep.subr.bf16.mxu1 %v8515_v27  ;;  %v8585_v17 = vld [vmem:[#allocation9 + $0x1b8] ss:$20 sps:$4 sm:$0xff]   ;;  %v8602_v24 = vld [vmem:[#allocation9 + $0x214] ss:$20 sps:$4 sm:$0xff]   ;;  %1082 = vst.msk [vmem:[#allocation2 + $0x10] sm:$0xff] %vm11953_vm0, %v9269_v10  ;;  %1085 = vst.msk [vmem:[#allocation2 + $0x1a8] sm:$0xff] %vm11953_vm0, %v9269_v10 }
  0xe2   : > { %v8593_v19 = vld [vmem:[#allocation9 + $0x1e4] ss:$20 sps:$4 sm:$0xff]   ;;  %v8596_v20 = vld [vmem:[#allocation9 + $0x1ec] ss:$20 sps:$4 sm:$0xff]   ;;  %6499 = vst.msk [vmem:[#allocation3] sm:$0xff] %vm11953_vm0, %v9269_v10  ;;  %6500 = vst.msk [vmem:[#allocation3 + $0x88] sm:$0xff] %vm11953_vm0, %v9269_v10 }
  0xe3   : > { %vm11974_vm8 = vsmask.f32 4352  ;;  %s12575_s17 = sld [smem:[#allocation75_spill]]  ;;  %s6934_s15 = scalar_lea.sflag [#allocation6], %s9557_s19 }
  0xe4   : > { %756 = vmatpush1.bf16.msra.mxu0 %v8502_v22  ;;  %7877 = vmatpush3.bf16.msra.mxu1 %v8515_v27  ;;  %v8594_v22 = vld [vmem:[#allocation9 + $0x1e8] ss:$20 sps:$4 sm:$0xff]   ;;  %p12577_p10 = scmp.ne.s32.totalorder %s12047_s26, 0  ;;  %s9271_s13 = smov [#allocation15]  }
  0xe5   : > { %4437 = vmatprep.subr.bf16.mxu0 %v8521_v23  ;;  %7878 = vmatprep.subr.bf16.mxu1 %v8516_v31  ;;  %v8599_v23 = vld [vmem:[#allocation9 + $0x20c] ss:$20 sps:$4 sm:$0xff]   ;;  %v8605_v27 = vld [vmem:[#allocation9 + $0x234] ss:$20 sps:$4 sm:$0xff]   ;;  %s9182_s18 = sshll.u32 %s9271_s13, 4  ;;  %s9183_s18 = int_to_ptr.vmem [resolvable:$false] %s9182_s18 }
  0xe6   : > { %s9184_s25 = scalar_lea.vmem %s9183_s18, 4096 }
  0xe7   : > { %774 = vmatmul.mubr.bf16.vlgmr.msra.gmra.mrb[0].mxu0 %v8503_v9  ;;  %v8576_v9 = vld [vmem:[#allocation9 + $0x170] ss:$20 sps:$4 sm:$0xff]  }
  0xe8   : > { %783 = vmatprep.mubr.bf16.mxu0 %v11927_v0  ;;  %4438 = vmatpush1.bf16.msra.mxu0 %v8519_v25  ;;  %v8597_v25 = vld [vmem:[#allocation9 + $0x208] ss:$20 sps:$4 sm:$0xff]  }
  0xe9   : > { %4439 = vmatprep.subr.bf16.mxu0 %v8527_v26  ;;  %7879 = vmatpush3.bf16.msra.mxu1 %v8516_v31  ;;  %v8600_v26 = vld [vmem:[#allocation9 + $0x210] ss:$20 sps:$4 sm:$0xff]   ;;  %s11862_s28 = scalar_lea.hbm %s12575_s17, %s7511_s14 }
  0xea   : > { %4889 = vmatprep.subr.bf16.mxu1 %v8524_v34  ;;  %v8611_v31 = vld [vmem:[#allocation9 + $0x25c] ss:$20 sps:$4 sm:$0xff]   ;;  %v8612_v34 = vld [vmem:[#allocation9 + $0x260] ss:$20 sps:$4 sm:$0xff]  }
  0xec   : > { %4440 = vmatpush1.bf16.msra.mxu0 %v8525_v28  ;;  %7881 = vmatmul.mubr.bf16.vlgmr.msra.gmra.mrb[0].mxu1 %v8504_v30  ;;  %v8608_v28 = vld [vmem:[#allocation9 + $0x23c] ss:$20 sps:$4 sm:$0xff]  }
  0xed   : > { %4441 = vmatprep.subr.bf16.mxu0 %v8533_v29  ;;  %7884 = vmatprep.mubr.bf16.mxu1 %v8505_v38  ;;  %v8603_v29 = vld [vmem:[#allocation9 + $0x230] ss:$20 sps:$4 sm:$0xff]  }
  0xee   : > { %4890 = vmatpush1.bf16.msra.mxu1 %v8522_v37  ;;  %v8620_v37 = vld [vmem:[#allocation9 + $0x28c] ss:$20 sps:$4 sm:$0xff]  }
  0xef   : > { %784 = vmatmul.mubr.bf16.gmra.mrb[4].mxu0 %v8504_v30  ;;  %4891 = vmatprep.subr.bf16.mxu1 %v8530_v39  ;;  %v8606_v30 = vld [vmem:[#allocation9 + $0x238] ss:$20 sps:$4 sm:$0xff]  }
  0xf0   : > { %793 = vmatprep.mubr.bf16.mxu0 %v11927_v0  ;;  %4442 = vmatpush1.bf16.msra.mxu0 %v8531_v32  ;;  %v8614_v32 = vld [vmem:[#allocation9 + $0x264] ss:$20 sps:$4 sm:$0xff]  }
  0xf1   : > { %4443 = vmatprep.subr.bf16.mxu0 %v8539_v33  ;;  %v8609_v33 = vld [vmem:[#allocation9 + $0x258] ss:$20 sps:$4 sm:$0xff]  }
  0xf2   : > { %4892 = vmatpush1.bf16.msra.mxu1 %v8528_v40 }
  0xf3   : > { %4893 = vmatprep.subr.bf16.mxu1 %v8536_v42 }
  0xf4   : > { %4444 = vmatpush1.bf16.msra.mxu0 %v8537_v35  ;;  %7885 = vmatmul.mubr.bf16.gmra.mrb[4].mxu1 %v8508_v47  ;;  %v419_v35 = vlaneseq }
  0xf5   : > { %4445 = vmatprep.subr.bf16.mxu0 %v8545_v36  ;;  %7888 = vmatprep.mubr.bf16.mxu1 %v8511_v49  ;;  %v8617_v36 = vld [vmem:[#allocation9 + $0x284] ss:$20 sps:$4 sm:$0xff]  }
  0xf6   : > { %4894 = vmatpush1.bf16.msra.mxu1 %v8534_v46 }
  0xf7   : > { %794 = vmatmul.mubr.bf16.gmra.mrb[8].mxu0 %v8505_v38  ;;  %4895 = vmatprep.subr.bf16.mxu1 %v8542_v48  ;;  %v9671_v38 = vshrl.u32 %v419_v35, 7 }
  0xf8   : > { %803 = vmatprep.mubr.bf16.mxu0 %v11927_v0  ;;  %4446 = vmatpush1.bf16.msra.mxu0 %v8543_v41  ;;  %v9675_v41 = vld [vmem:[#allocation7] sm:$0x7] }
  0xf9   : > { %4447 = vmatprep.subr.bf16.mxu0 %v8551_v43  ;;  %12057 = vst [vmem:[#allocation21_spill] sm:$0xff] %v9671_v38  ;;  %v11926_v39 = vsub.s32 0, %v9671_v38  ;;  %v421_v40 = vadd.s32 8, %v9671_v38  ;;  %v11925_v42 = vsub.s32 1, %v9671_v38  ;;  %v422_v43 = vadd.s32 16, %v9671_v38 }
  0xfa   : > { %4896 = vmatpush1.bf16.msra.mxu1 %v8540_v52  ;;  %v9696_v52 = vadd.s32 48, %v9671_v38  ;;  %v9725_v10 = vadd.s32 64, %v9671_v38 }
  0xfb   : > { %4897 = vmatprep.subr.bf16.mxu1 %v8548_v53  ;;  %v9684_v46 = vrot.slane %v9675_v41, %v11926_v39  ;;  %v9689_v48 = vrot.slane %v9675_v41, %v11925_v42 }
  0xfc   : > { %4448 = vmatpush1.bf16.msra.mxu0 %v8549_v44  ;;  %7889 = vmatmul.mubr.bf16.gmra.mrb[8].mxu1 %v8514_v56  ;;  %v423_v44 = vadd.s32 24, %v9671_v38 }
  0xfd   : > { %4449 = vmatprep.subr.bf16.mxu0 %v8557_v45  ;;  %7892 = vmatprep.mubr.bf16.mxu1 %v8517_v58  ;;  %v436_v45 = vand.u32 15, %v9671_v38 }
  0xfe   : > { %4898 = vmatpush1.bf16.msra.mxu1 %v8546_v55  ;;  %v9699_v55 = vadd.s32 56, %v9671_v38 }
  0xff   : > { %804 = vmatmul.mubr.bf16.gmra.mrb[12].mxu0 %v8508_v47  ;;  %4899 = vmatprep.subr.bf16.mxu1 %v8554_v57  ;;  %v437_v47 = vand.u32 15, %v421_v40  ;;  %vm9701_vm1 = vcmp.ge.s32.totalorder %v436_v45, 2 }
 0x100   : > { %813 = vmatprep.mubr.bf16.mxu0 %v11927_v0  ;;  %4450 = vmatpush1.bf16.msra.mxu0 %v8555_v50  ;;  %v424_v50 = vadd.s32 32, %v9671_v38 }
 0x101   : > { %4451 = vmatprep.subr.bf16.mxu0 %v8563_v51  ;;  %v9693_v51 = vadd.s32 40, %v9671_v38  ;;  %vm9706_vm2 = vcmp.lt.s32.totalorder %v437_v47, 12 }
 0x102   : > { %4900 = vmatpush1.bf16.msra.mxu1 %v8552_v59  ;;  %v12061_v59 = vmov 0 }
 0x103   : > { %4901 = vmatprep.subr.bf16.mxu1 %v8560_v60  ;;  %v12062_v59 = vsel %vm9706_vm2, 4294967295, %v12061_v59 }
 0x104   : > { %4452 = vmatpush1.bf16.msra.mxu0 %v8561_v54  ;;  %7893 = vmatmul.mubr.bf16.gmra.mrb[12].mxu1 %v8518_v62  ;;  %v439_v54 = vand.u32 15, %v423_v44  ;;  %12063 = vst [vmem:[#allocation23_spill] sm:$0xff] %v12062_v59 }
 0x105   : > { %4453 = vmatprep.subr.bf16.mxu0 %v8569_v2 }
 0x106   : > { %4902 = vmatpush1.bf16.msra.mxu1 %v8558_v61  ;;  %vm9719_vm5 = vcmp.lt.s32.totalorder %v439_v54, 12 }
 0x107   : > { %814 = vmatmul.mubr.bf16.gmra.mrb[16].mxu0 %v8511_v49  ;;  %4903 = vmatprep.subr.bf16.mxu1 %v8566_v63  ;;  %v438_v49 = vand.u32 15, %v422_v43  ;;  %v440_v63 = vand.u32 15, %v424_v50 }
 0x108   : > { %823 = vmatprep.mubr.bf16.mxu0 %v11927_v0  ;;  %4454 = vmatpush1.bf16.msra.mxu0 %v8567_v4  ;;  %v441_v4 = vand.u32 15, %v9693_v51 }
 0x109   : > { %4455 = vmatprep.subr.bf16.mxu0 %v8575_v6  ;;  %vm9711_vm3 = vcmp.ge.s32.totalorder %v438_v49, 2  ;;  %vm9761_vm6 = vcmp.ge.s32.totalorder %v440_v63, 2 }
 0x10a   : > { %4904 = vmatpush1.bf16.msra.mxu1 %v8564_v1  ;;  %vm9773_vm7 = vcmp.lt.s32.totalorder %v441_v4, 12 }
 0x10b   : > { %4905 = vmatprep.subr.bf16.mxu1 %v8572_v3 }
 0x10c   : > { %4456 = vmatpush1.bf16.msra.mxu0 %v8573_v8  ;;  %v12067_v8 = vmov 0 }
 0x10d   : > { %4457 = vmatprep.subr.bf16.mxu0 %v8581_v11  ;;  %v12068_v8 = vsel %vm9719_vm5, 4294967295, %v12067_v8 }
 0x10e   : > { %4906 = vmatpush1.bf16.msra.mxu1 %v8570_v5  ;;  %v442_v5 = vand.u32 15, %v9696_v52  ;;  %12069 = vst [vmem:[#allocation25_spill] sm:$0xff] %v12068_v8  ;;  %v12081_v52 = vmov 0 }
 0x10f   : > { %824 = vmatmul.mubr.bf16.gmra.mrb[20].mxu0 %v8514_v56  ;;  %4907 = vmatprep.subr.bf16.mxu1 %v8578_v7  ;;  %v12058_v56 = vmov 0 }
 0x110   : > { %833 = vmatprep.mubr.bf16.mxu0 %v11927_v0  ;;  %4458 = vmatpush1.bf16.msra.mxu0 %v8579_v13  ;;  %v12059_v56 = vsel %vm9701_vm1, 4294967295, %v12058_v56  ;;  %v1134_v13 = vld [vmem:[#allocation2] sm:$0x80]  ;;  %vm9822_vm9 = vcmp.ge.s32.totalorder %v442_v5, 2 }
 0x111   : > { %4459 = vmatprep.subr.bf16.mxu0 %v8587_v15  ;;  %12060 = vst [vmem:[#allocation22_spill] sm:$0xff] %v12059_v56  ;;  %v9733_v15 = vadd.s32 80, %v9671_v38 }
 0x112   : > { %4908 = vmatpush1.bf16.msra.mxu1 %v8576_v9  ;;  %v443_v9 = vand.u32 15, %v9699_v55 }
 0x113   : > { %4909 = vmatprep.subr.bf16.mxu1 %v8584_v12 }
 0x114   : > { %4460 = vmatpush1.bf16.msra.mxu0 %v8585_v17  ;;  %vm9832_vm10 = vcmp.lt.s32.totalorder %v443_v9, 12 }
 0x115   : > { %4461 = vmatprep.subr.bf16.mxu0 %v8593_v19  ;;  %v12082_v52 = vsel %vm9832_vm10, 4294967295, %v12081_v52 }
 0x116   : > { %4910 = vmatpush1.bf16.msra.mxu1 %v8582_v14  ;;  %v9730_v14 = vadd.s32 72, %v9671_v38  ;;  %12083 = vst [vmem:[#allocation31_spill] sm:$0xff] %v12082_v52 }
 0x117   : > { %834 = vmatmul.mubr.bf16.gmra.mrb[24].mxu0 %v8517_v58  ;;  %4911 = vmatprep.subr.bf16.mxu1 %v8590_v16 }
 0x118   : > { %843 = vmatprep.mubr.bf16.mxu0 %v11927_v0  ;;  %4462 = vmatpush1.bf16.msra.mxu0 %v8591_v21 }
 0x119   : > { %4463 = vmatprep.subr.bf16.mxu0 %v8599_v23  ;;  %v9745_v23 = vadd.s32 96, %v9671_v38 }
 0x11a   : > { %4912 = vmatpush1.bf16.msra.mxu1 %v8588_v18  ;;  %v1135_v18 = vld [vmem:[#allocation2 + $0x8] sm:$0x80] }
 0x11b   : > { %4913 = vmatprep.subr.bf16.mxu1 %v8596_v20  ;;  %v9738_v20 = vadd.s32 88, %v9671_v38 }
 0x11c   : > { %4464 = vmatpush1.bf16.msra.mxu0 %v8597_v25 }
 0x11d   : > { %4465 = vmatprep.subr.bf16.mxu0 %v8605_v27 }
 0x11e   : > { %4914 = vmatpush1.bf16.msra.mxu1 %v8594_v22 }
 0x11f   : > { %844 = vmatmul.mubr.bf16.gmra.mrb[28].mxu0 %v8518_v62  ;;  %4915 = vmatprep.subr.bf16.mxu1 %v8602_v24  ;;  %v12064_v62 = vmov 0  ;;  %v9748_v24 = vadd.s32 104, %v9671_v38 }
 0x120   : > { %4466 = vmatpush1.bf16.msra.mxu0 %v8603_v29  ;;  %v12065_v62 = vsel %vm9711_vm3, 4294967295, %v12064_v62  ;;  %v444_v29 = vand.u32 15, %v9725_v10 }
 0x121   : > { %4467 = vmatprep.subr.bf16.mxu0 %v8611_v31  ;;  %12066 = vst [vmem:[#allocation24_spill] sm:$0xff] %v12065_v62 }
 0x122   : > { %4916 = vmatpush1.bf16.msra.mxu1 %v8600_v26  ;;  %vm9873_vm11 = vcmp.ge.s32.totalorder %v444_v29, 2 }
 0x123   : > { %4917 = vmatprep.subr.bf16.mxu1 %v8608_v28 }
 0x124   : > { %4468 = vmatpush1.bf16.msra.mxu0 %v8609_v33 }
 0x125   : > { %4550 = vmatprep.subr.bf16.mxu0 %v8617_v36 }
 0x126   : > { %4918 = vmatpush1.bf16.msra.mxu1 %v8606_v30 }
 0x127   : > { %4919 = vmatprep.subr.bf16.mxu1 %v8614_v32 }
 0x12a   : > { %4920 = vmatpush1.bf16.msra.mxu1 %v8612_v34  ;;  %v445_v34 = vand.u32 15, %v9730_v14 }
 0x12b   : > { %5002 = vmatprep.subr.bf16.mxu1 %v8620_v37  ;;  %v12071_v37 = vmov 0 }
 0x12c   : > { %v12072_v37 = vsel %vm9761_vm6, 4294967295, %v12071_v37  ;;  %vm9890_vm12 = vcmp.lt.s32.totalorder %v445_v34, 12 }
 0x12d   : > { %12073 = vst [vmem:[#allocation27_spill] sm:$0xff] %v12072_v37  ;;  %v12107_v37 = vand.u32 15, %v9738_v20 }
 0x12f   : > { %vm9957_vm14 = vcmp.lt.s32.totalorder %v12107_v37, 12 }
 0x1ba   : > { %v775_v53 = vpop.f32.mrb[0].mxu0 }
 0x1bb   : > { %v776_v57 = vadd.f32 %v775_v53, %v9684_v46  ;;  %v777_v58 = vpop.f32.mrb[1].mxu0 }
 0x1bc   : > { %v778_v60 = vadd.f32 %v777_v58, %v9689_v48  ;;  %v779_v61 = vpop.f32.mrb[2].mxu0 }
 0x1bd   : > { %v951_v1 = vmax.f32 %v776_v57, 0.0  ;;  %v780_v2 = vadd.f32 %v779_v61, %v9684_v46  ;;  %v781_v3 = vpop.f32.mrb[3].mxu0  ;;  %v12074_v57 = vmov 0 }
 0x1be   : > { %v952_v6 = vmax.f32 %v778_v60, 0.0  ;;  %v782_v7 = vadd.f32 %v781_v3, %v9689_v48  ;;  %v12075_v57 = vsel %vm9773_vm7, 4294967295, %v12074_v57 }
 0x1bf   : > { %v1031_v11 = vsel %vm9701_vm1, %v951_v1, 0.0  ;;  %v954_v12 = vmax.f32 %v780_v2, 0.0  ;;  %12076 = vst [vmem:[#allocation28_spill] sm:$0xff] %v12075_v57 }
 0x1c0   : > { %1086 = vst [vmem:[#allocation2 + $0x18] sm:$0xff] %v1031_v11  ;;  %v1032_v16 = vsel %vm9701_vm1, %v952_v6, 0.0  ;;  %v955_v17 = vmax.f32 %v782_v7, 0.0  ;;  %v1243_v19 = vrot.slane %v1031_v11, 1  ;;  %v1697_v27 = vpack.c.bf16 %v1031_v11, %v1134_v13  ;;  %v9789_v11 = vpop.f32.mrb[0].mxu1 }
 0x1c1   : > { %1087 = vst [vmem:[#allocation2 + $0x20] sm:$0xff] %v1032_v16  ;;  %v9742_v21 = vsel %vm9706_vm2, %v954_v12, 0.0  ;;  %v1244_v22 = vrot.slane %v1032_v16, 1  ;;  %v9757_v32 = vpack.c.bf16 %v1032_v16, %v1135_v18  ;;  %v9797_v18 = vpop.f32.mrb[1].mxu1 }
 0x1c2   : > { %12070 = vst [vmem:[#allocation26_spill] sm:$0xff] %v9742_v21  ;;  %v9752_v25 = vsel %vm9706_vm2, %v955_v17, 0.0  ;;  %v785_v26 = vpop.f32.mrb[4].mxu0  ;;  %v1246_v28 = vrot.slane %v9742_v21, 1  ;;  %v2158_v58 = vshrl.u32 %v1697_v27, 16  ;;  %v2161_v1 = vshll.u32 %v1697_v27, 16 }
 0x1c3   : > { %v786_v30 = vadd.f32 %v785_v26, %v9684_v46  ;;  %v787_v31 = vpop.f32.mrb[5].mxu0  ;;  %v8314_v33 = vpack.i.bf16 %v1244_v22, %v1243_v19  ;;  %v1248_v60 = vrot.slane %v9752_v25, 1  ;;  %v2175_v2 = vshrl.u32 %v9757_v32, 16 }
 0x1c4   : > { %v788_v35 = vadd.f32 %v787_v31, %v9689_v48  ;;  %v789_v36 = vpop.f32.mrb[6].mxu0  ;;  %v1247_v40 = vsel %vm11976_vm4, %v1243_v19, %v1246_v28  ;;  %v2178_v13 = vshll.u32 %v9757_v32, 16  ;;  %v9803_v26 = vrot.slane %v2158_v58, 3  ;;  %v9808_v31 = vpop.f32.mrb[2].mxu1 }
 0x1c5   : > { %v957_v45 = vmax.f32 %v786_v30, 0.0  ;;  %v790_v47 = vadd.f32 %v789_v36, %v9684_v46  ;;  %v791_v49 = vpop.f32.mrb[7].mxu0  ;;  %8315 = vrot.lane.b32.xlu0 %v8314_v33, %s9270_s4  ;;  %v1249_v4 = vsel %vm11976_vm4, %v1244_v22, %v1248_v60 }
 0x1c6   : > { %v958_v53 = vmax.f32 %v788_v35, 0.0  ;;  %v792_v54 = vadd.f32 %v791_v49, %v9689_v48  ;;  %v8319_v16 = vpack.i.bf16 %v1249_v4, %v1247_v40  ;;  %v9818_v49 = vrot.slane %v2161_v1, 4 }
 0x1c7   : > { %v9780_v61 = vsel %vm9711_vm3, %v957_v45, 0.0  ;;  %v960_v63 = vmax.f32 %v790_v47, 0.0  ;;  %v9815_v45 = vpop.f32.mrb[3].mxu1 }
 0x1c8   : > { %v9785_v3 = vsel %vm9711_vm3, %v958_v53, 0.0  ;;  %v961_v6 = vmax.f32 %v792_v54, 0.0  ;;  %v1252_v7 = vrot.slane %v9780_v61, 1  ;;  %v1705_v30 = vpack.c.bf16 %v9780_v61, %v9742_v21 }
 0x1c9   : > { %v9793_v12 = vsel %vm9719_vm5, %v960_v63, 0.0  ;;  %v1254_v17 = vrot.slane %v9785_v3, 1  ;;  %8320 = vrot.lane.b32.xlu0 %v8319_v16, %s9270_s4  ;;  %v2177_v53 = vrot.slane %v2175_v2, 3  ;;  %v12078_v54 = vmov 0 }
 0x1ca   : > { %v9801_v19 = vsel %vm9719_vm5, %v961_v6, 0.0  ;;  %v795_v22 = vpop.f32.mrb[8].mxu0  ;;  %v1253_v27 = vsel %vm11976_vm4, %v1246_v28, %v1252_v7  ;;  %v1258_v36 = vrot.slane %v9793_v12, 1  ;;  %v12079_v54 = vsel %vm9822_vm9, 4294967295, %v12078_v54 }
 0x1cb   : > { %12077 = vst [vmem:[#allocation29_spill] sm:$0xff] %v9801_v19  ;;  %v796_v32 = vadd.f32 %v795_v22, %v9684_v46  ;;  %v797_v33 = vpop.f32.mrb[9].mxu0  ;;  %v1255_v35 = vsel %vm11976_vm4, %v1248_v60, %v1254_v17  ;;  %v1260_v40 = vrot.slane %v9801_v19, 1  ;;  %12080 = vst [vmem:[#allocation30_spill] sm:$0xff] %v12079_v54  ;;  %v1706_v2 = vpack.c.bf16 %v9785_v3, %v9752_v25 }
 0x1cc   : > { %v798_v28 = vadd.f32 %v797_v33, %v9689_v48  ;;  %v799_v47 = vpop.f32.mrb[10].mxu0  ;;  %v8324_v58 = vpack.i.bf16 %v1255_v35, %v1253_v27  ;;  %v1259_v4 = vsel %vm11976_vm4, %v1252_v7, %v1258_v36  ;;  %v2180_v27 = vrot.slane %v2178_v13, 4 }
 0x1cd   : > { %v963_v60 = vmax.f32 %v796_v32, 0.0  ;;  %v800_v63 = vadd.f32 %v799_v47, %v9684_v46  ;;  %v801_v6 = vpop.f32.mrb[11].mxu0  ;;  %v1261_v16 = vsel %vm11976_vm4, %v1254_v17, %v1260_v40  ;;  %v2166_v32 = vshrl.u32 %v1705_v30, 16 }
 0x1ce   : > { %v964_v22 = vmax.f32 %v798_v28, 0.0  ;;  %v802_v1 = vadd.f32 %v801_v6, %v9689_v48  ;;  %8325 = vrot.lane.b32.xlu1 %v8324_v58, %s9270_s4  ;;  %v8329_v5 = vpack.i.bf16 %v1261_v16, %v1259_v4  ;;  %v2183_v33 = vshrl.u32 %v1706_v2, 16  ;;  %v9847_v28 = vpop.f32.mrb[4].mxu1 }
 0x1cf   : > { %v9841_v7 = vsel %vm9761_vm6, %v963_v60, 0.0  ;;  %v966_v17 = vmax.f32 %v800_v63, 0.0  ;;  %v2186_v35 = vshll.u32 %v1706_v2, 16  ;;  %v2168_v58 = vrot.slane %v2166_v32, 3  ;;  %v9854_v63 = vpop.f32.mrb[5].mxu1 }
 0x1d0   : > { %12084 = vst [vmem:[#allocation32_spill] sm:$0xff] %v9841_v7  ;;  %v9845_v55 = vsel %vm9761_vm6, %v964_v22, 0.0  ;;  %v967_v9 = vmax.f32 %v802_v1, 0.0  ;;  %v2169_v6 = vshll.u32 %v1705_v30, 16  ;;  %v1264_v60 = vrot.slane %v9841_v7, 1  ;;  %v9862_v2 = vpop.f32.mrb[6].mxu1 }
 0x1d1   : > { %12085 = vst [vmem:[#allocation33_spill] sm:$0xff] %v9845_v55  ;;  %v9851_v47 = vsel %vm9773_vm7, %v966_v17, 0.0  ;;  %v2185_v16 = vrot.slane %v2183_v33, 3  ;;  %v2188_v22 = vrot.slane %v2186_v35, 4  ;;  %v1266_v1 = vrot.slane %v9845_v55, 1 }
 0x1d2   : > { %v9858_v13 = vsel %vm9773_vm7, %v967_v9, 0.0  ;;  %v805_v4 = vpop.f32.mrb[12].mxu0  ;;  %8330 = vrot.lane.b32.xlu1 %v8329_v5, %s9270_s4  ;;  %v2164_v30 = vor.u32 %v9818_v49, %v9803_v26  ;;  %v2171_v42 = vrot.slane %v2169_v6, 4  ;;  %v1265_v39 = vsel %vm11976_vm4, %v1258_v36, %v1264_v60  ;;  %v9868_v9 = vpop.f32.mrb[7].mxu1 }
 0x1d3   : > { %12086 = vst [vmem:[#allocation34_spill] sm:$0xff] %v9858_v13  ;;  %v806_v17 = vadd.f32 %v805_v4, %v9684_v46  ;;  %v807_v32 = vpop.f32.mrb[13].mxu0  ;;  %v12087_v33 = vmov 0  ;;  %v2181_v35 = vor.u32 %v2180_v27, %v2177_v53  ;;  %v9877_v51 = vor.u32 %v2188_v22, %v2185_v16  ;;  %v8618_v27 = vld [vmem:[#allocation9 + $0x288] ss:$20 sps:$4 sm:$0xff]  }
 0x1d4   : > { %v808_v0 = vadd.f32 %v807_v32, %v9689_v48  ;;  %v809_v5 = vpop.f32.mrb[14].mxu0  ;;  %v12088_v33 = vsel %vm9873_vm11, 4294967295, %v12087_v33  ;;  %v1267_v26 = vsel %vm11976_vm4, %v1260_v40, %v1266_v1  ;;  %v9881_v4 = vor.u32 %v2171_v42, %v2168_v58  ;;  %v8615_v32 = vld [vmem:[#allocation9 + $0x280] ss:$20 sps:$4 sm:$0xff]  }
 0x1d5   : > { %12089 = vst [vmem:[#allocation35_spill] sm:$0xff] %v12088_v33  ;;  %v969_v49 = vmax.f32 %v806_v17, 0.0  ;;  %v810_v6 = vadd.f32 %v809_v5, %v9684_v46  ;;  %v811_v36 = vpop.f32.mrb[15].mxu0  ;;  %v8334_v50 = vpack.i.bf16 %v1267_v26, %v1265_v39  ;;  %v9886_v29 = vsel %vm11974_vm8, %v2181_v35, %v9877_v51  ;;  %v8623_v42 = vld [vmem:[#allocation9 + $0x2ac] ss:$20 sps:$4 sm:$0xff]   ;;  %v9916_v35 = vpop.f32.mrb[8].mxu1 }
 0x1d6   : > { %v970_v44 = vmax.f32 %v808_v0, 0.0  ;;  %v812_v10 = vadd.f32 %v811_v36, %v9689_v48  ;;  %12090 = vst [vmem:[#allocation36_spill] sm:$0xff] %v9886_v29  ;;  %v12091_v53 = vmov 0  ;;  %v1270_v40 = vrot.slane %v9851_v47, 1  ;;  %4469 = vmatprep.mubr.bf16.mxu0 %v9886_v29  ;;  %4921 = vmatprep.mubr.bf16.mxu1 %v9886_v29  ;;  %v8626_v58 = vld [vmem:[#allocation9 + $0x2b4] ss:$20 sps:$4 sm:$0xff]  }
 0x1d7   : > { %v12092_v53 = vsel %vm9890_vm12, 4294967295, %v12091_v53  ;;  %v9897_v39 = vsel %vm9822_vm9, %v969_v49, 0.0  ;;  %v972_v0 = vmax.f32 %v810_v6, 0.0  ;;  %v9903_v14 = vsel %vm11974_vm8, %v2164_v30, %v9881_v4  ;;  %12097 = vst [vmem:[#allocation41_spill] sm:$0xff] %v9916_v35  ;;  %v8621_v30 = vld [vmem:[#allocation9 + $0x2a8] ss:$20 sps:$4 sm:$0xff]   ;;  %8335 = vrot.lane.b32.xlu0 %v8334_v50, %s9270_s4 }
 0x1d8   : > { %12093 = vst [vmem:[#allocation37_spill] sm:$0xff] %v12092_v53  ;;  %12094 = vst [vmem:[#allocation38_spill] sm:$0xff] %v9897_v39  ;;  %v1272_v34 = vrot.slane %v9858_v13, 1  ;;  %v9908_v16 = vsel %vm9822_vm9, %v970_v44, 0.0  ;;  %v973_v22 = vmax.f32 %v812_v10, 0.0  ;;  %4470 = vmatmul.mubr.bf16.vlgmr.msra.gmra.mrb[32].mxu0 %v9903_v14  ;;  %4922 = vmatmul.mubr.bf16.vlgmr.msra.gmra.mrb[16].mxu1 %v9903_v14  ;;  %v1271_v17 = vsel %vm11976_vm4, %v1264_v60, %v1270_v40  ;;  %v9926_v6 = vpop.f32.mrb[9].mxu1 }
 0x1d9   : > { %12095 = vst [vmem:[#allocation39_spill] sm:$0xff] %v9903_v14  ;;  %12096 = vst [vmem:[#allocation40_spill] sm:$0xff] %v9908_v16  ;;  %v9914_v5 = vadd.s32 112, %v9671_v38  ;;  %v9920_v26 = vsel %vm9832_vm10, %v972_v0, 0.0  ;;  %v1714_v49 = vpack.c.bf16 %v9845_v55, %v9801_v19  ;;  %4551 = vmatpush1.bf16.msra.mxu0 %v8615_v32  ;;  %v8624_v60 = vld [vmem:[#allocation9 + $0x2b0] ss:$20 sps:$4 sm:$0xff]   ;;  %v1713_v0 = vpack.c.bf16 %v9841_v7, %v9793_v12 }
 0x1da   : > { %12098 = vst [vmem:[#allocation42_spill] sm:$0xff] %v9920_v26  ;;  %v1273_v44 = vsel %vm11976_vm4, %v1266_v1, %v1272_v34  ;;  %12099 = vst [vmem:[#allocation43_spill] sm:$0xff] %v9926_v6  ;;  %v8629_v36 = vld [vmem:[#allocation9 + $0x2d4] ss:$20 sps:$4 sm:$0xff]   ;;  %v9930_v10 = vsel %vm9832_vm10, %v973_v22, 0.0  ;;  %v815_v43 = vpop.f32.mrb[16].mxu0  ;;  %5003 = vmatpush1.bf16.msra.mxu1 %v8618_v27  ;;  %4552 = vmatprep.subr.bf16.mxu0 %v8623_v42 }
 0x1db   : > { %v8339_v14 = vpack.i.bf16 %v1273_v44, %v1271_v17  ;;  %v9935_v1 = vpop.f32.mrb[10].mxu1  ;;  %v8632_v29 = vld [vmem:[#allocation9 + $0x2dc] ss:$20 sps:$4 sm:$0xff]   ;;  %1108 = vst [vmem:[#allocation2 + $0xc8] sm:$0xff] %v9930_v10  ;;  %v816_v32 = vadd.f32 %v815_v43, %v9684_v46  ;;  %v817_v55 = vpop.f32.mrb[17].mxu0  ;;  %v2303_v6 = vshrl.u32 %v1714_v49, 16  ;;  %5004 = vmatprep.subr.bf16.mxu1 %v8626_v58 }
 0x1dc   : > { %12100 = vst [vmem:[#allocation44_spill] sm:$0xff] %v9935_v1  ;;  %v2306_v22 = vshll.u32 %v1714_v49, 16  ;;  %v9940_v17 = vpop.f32.mrb[11].mxu1  ;;  %v818_v44 = vadd.f32 %v817_v55, %v9689_v48  ;;  %v819_v50 = vpop.f32.mrb[18].mxu0  ;;  %v12102_v27 = vand.u32 15, %v9733_v15  ;;  %v12103_v42 = vmov 0 }
 0x1dd   : > { %12101 = vst [vmem:[#allocation45_spill] sm:$0xff] %v9940_v17  ;;  %8340 = vrot.lane.b32.xlu1 %v8339_v14, %s9270_s4  ;;  %v2294_v43 = vshrl.u32 %v1713_v0, 16  ;;  %v2297_v1 = vshll.u32 %v1713_v0, 16  ;;  %v12106_v49 = vrot.slane %v9897_v39, 1  ;;  %v975_v7 = vmax.f32 %v816_v32, 0.0  ;;  %v821_v17 = vpop.f32.mrb[19].mxu0  ;;  %4553 = vmatpush1.bf16.msra.mxu0 %v8621_v30 }
 0x1de   : > { %vm9946_vm13 = vcmp.ge.s32.totalorder %v12102_v27, 2  ;;  %v820_v58 = vadd.f32 %v819_v50, %v9684_v46  ;;  %v2305_v55 = vrot.slane %v2303_v6, 3  ;;  %v2308_v57 = vrot.slane %v2306_v22, 4  ;;  %v8627_v14 = vld [vmem:[#allocation9 + $0x2d0] ss:$20 sps:$4 sm:$0xff]   ;;  %5005 = vmatpush1.bf16.msra.mxu1 %v8624_v60  ;;  %4554 = vmatprep.subr.bf16.mxu0 %v8629_v36 }
 0x1df   : > { %v12104_v42 = vsel %vm9946_vm13, 4294967295, %v12103_v42  ;;  %v1277_v19 = vsel %vm11976_vm4, %v1270_v40, %v12106_v49  ;;  %v976_v52 = vmax.f32 %v818_v44, 0.0  ;;  %v822_v15 = vadd.f32 %v821_v17, %v9689_v48  ;;  %5006 = vmatprep.subr.bf16.mxu1 %v8632_v29  ;;  %v8633_v22 = vld [vmem:[#allocation9 + $0x2f8] ss:$20 sps:$4 sm:$0xff]  }
 0x1e0   : > { %12105 = vst [vmem:[#allocation46_spill] sm:$0xff] %v12104_v42  ;;  %v2296_v27 = vrot.slane %v2294_v43, 3  ;;  %v2299_v35 = vrot.slane %v2297_v1, 4  ;;  %v12108_v0 = vmov 0  ;;  %v9963_v40 = vsel %vm9873_vm11, %v975_v7, 0.0  ;;  %v9977_v7 = vpop.f32.mrb[12].mxu1 }
 0x1e1   : > { %v12109_v0 = vsel %vm9957_vm14, 4294967295, %v12108_v0  ;;  %12111 = vst [vmem:[#allocation48_spill] sm:$0xff] %v9963_v40  ;;  %v978_v6 = vmax.f32 %v820_v58, 0.0  ;;  %v9965_v30 = vor.u32 %v2308_v57, %v2305_v55  ;;  %v12112_v50 = vrot.slane %v9908_v16, 1  ;;  %v8630_v1 = vld [vmem:[#allocation9 + $0x2d8] ss:$20 sps:$4 sm:$0xff]   ;;  %4555 = vmatpush1.bf16.msra.mxu0 %v8627_v14 }
 0x1e2   : > { %12110 = vst [vmem:[#allocation47_spill] sm:$0xff] %v12109_v0  ;;  %v9972_v20 = vsel %vm9873_vm11, %v976_v52, 0.0  ;;  %v979_v37 = vmax.f32 %v822_v15, 0.0  ;;  %v9974_v60 = vor.u32 %v2299_v35, %v2296_v27  ;;  %v8635_v35 = vld [vmem:[#allocation9 + $0x2fc] ss:$20 sps:$4 sm:$0xff]   ;;  %v825_v43 = vpop.f32.mrb[20].mxu0  ;;  %v1722_v15 = vpack.c.bf16 %v9908_v16, %v9858_v13  ;;  %5007 = vmatpush1.bf16.msra.mxu1 %v8630_v1 }
 0x1e3   : > { %v1279_v32 = vsel %vm11976_vm4, %v1272_v34, %v12112_v50  ;;  %1111 = vst [vmem:[#allocation2 + $0xe0] sm:$0xff] %v9972_v20  ;;  %v9982_v57 = vsel %vm9890_vm12, %v978_v6, 0.0  ;;  %v9987_v29 = vsel %vm11974_vm8, %v9877_v51, %v9965_v30  ;;  %v9989_v34 = vpop.f32.mrb[13].mxu1  ;;  %v8638_v17 = vld [vmem:[#allocation9 + $0x304] ss:$20 sps:$4 sm:$0xff]   ;;  %v11952_v49 = vrot.slane %v9930_v10, 1  ;;  %4556 = vmatprep.subr.bf16.mxu0 %v8635_v35 }
 0x1e4   : > { %12113 = vst [vmem:[#allocation49_spill] sm:$0xff] %v9987_v29  ;;  %v8344_v52 = vpack.i.bf16 %v1279_v32, %v1277_v19  ;;  %12114 = vst [vmem:[#allocation50_spill] sm:$0xff] %v9989_v34  ;;  %v9993_v44 = vsel %vm9890_vm12, %v979_v37, 0.0  ;;  %4479 = vmatprep.mubr.bf16.mxu0 %v9987_v29  ;;  %4931 = vmatprep.mubr.bf16.mxu1 %v9987_v29  ;;  %v10000_v51 = vsel %vm11974_vm8, %v9881_v4, %v9974_v60  ;;  %v10004_v58 = vpop.f32.mrb[14].mxu1  ;;  %v827_v14 = vpop.f32.mrb[21].mxu0  ;;  %v12121_v13 = vmov 0 }
 0x1e5   : > { %12115 = vst [vmem:[#allocation51_spill] sm:$0xff] %v10000_v51  ;;  %v11947_v19 = vrot.slane %v9920_v26, 1  ;;  %12116 = vst [vmem:[#allocation52_spill] sm:$0xff] %v10004_v58  ;;  %v826_v55 = vadd.f32 %v825_v43, %v9684_v46  ;;  %4480 = vmatmul.mubr.bf16.gmra.mrb[36].mxu0 %v10000_v51  ;;  %4932 = vmatmul.mubr.bf16.gmra.mrb[20].mxu1 %v10000_v51  ;;  %v10013_v4 = vadd.s32 120, %v9671_v38  ;;  %v10016_v6 = vpop.f32.mrb[15].mxu1  ;;  %v829_v37 = vpop.f32.mrb[22].mxu0 }
 0x1e6   : > { %1114 = vst [vmem:[#allocation2 + $0xf8] sm:$0xff] %v9993_v44  ;;  %12117 = vst [vmem:[#allocation53_spill] sm:$0xff] %v10016_v6  ;;  %v8641_v50 = vld [vmem:[#allocation9 + $0x324] ss:$20 sps:$4 sm:$0xff]   ;;  %v828_v32 = vadd.f32 %v827_v14, %v9689_v48  ;;  %8345 = vrot.lane.b32.xlu0 %v8344_v52, %s9270_s4  ;;  %v12118_v43 = vrot.slane %v9897_v39, 1  ;;  %v12119_v51 = vrot.slane %v9908_v16, 1  ;;  %v1721_v52 = vpack.c.bf16 %v9897_v39, %v9851_v47 }
 0x1e7   : > { %v12120_v29 = vand.u32 15, %v9745_v23  ;;  %v8636_v14 = vld [vmem:[#allocation9 + $0x300] ss:$20 sps:$4 sm:$0xff]   ;;  %v981_v6 = vmax.f32 %v826_v55, 0.0  ;;  %v830_v58 = vadd.f32 %v829_v37, %v9684_v46  ;;  %v2375_v53 = vshrl.u32 %v1722_v15, 16  ;;  %4557 = vmatpush1.bf16.msra.mxu0 %v8633_v22  ;;  %5008 = vmatprep.subr.bf16.mxu1 %v8638_v17 }
 0x1e8   : > { %v1283_v36 = vsel %vm11976_vm4, %v12118_v43, %v11947_v19  ;;  %v1285_v27 = vsel %vm11976_vm4, %v12119_v51, %v11952_v49  ;;  %v831_v43 = vpop.f32.mrb[23].mxu0  ;;  %v8639_v16 = vld [vmem:[#allocation9 + $0x320] ss:$20 sps:$4 sm:$0xff]   ;;  %v982_v51 = vmax.f32 %v828_v32, 0.0  ;;  %v2366_v49 = vshrl.u32 %v1721_v52, 16  ;;  %4558 = vmatprep.subr.bf16.mxu0 %v8641_v50  ;;  %5009 = vmatpush1.bf16.msra.mxu1 %v8636_v14 }
 0x1e9   : > { %vm10032_vm15 = vcmp.ge.s32.totalorder %v12120_v29, 2  ;;  %v8349_v19 = vpack.i.bf16 %v1285_v27, %v1283_v36  ;;  %v832_v23 = vadd.f32 %v831_v43, %v9689_v48  ;;  %v2378_v29 = vshll.u32 %v1722_v15, 16  ;;  %v8644_v55 = vld [vmem:[#allocation9 + $0x32c] ss:$20 sps:$4 sm:$0xff]  }
 0x1ea   : > { %v12122_v13 = vsel %vm10032_vm15, 4294967295, %v12121_v13  ;;  %v12124_v34 = vand.u32 15, %v9748_v24  ;;  %v12125_v33 = vmov 0  ;;  %v10048_v36 = vsel %vm9946_vm13, %v981_v6, 0.0  ;;  %v8647_v15 = vld [vmem:[#allocation9 + $0x34c] ss:$20 sps:$4 sm:$0xff]   ;;  %5010 = vmatprep.subr.bf16.mxu1 %v8644_v55 }
 0x1eb   : > { %12123 = vst [vmem:[#allocation54_spill] sm:$0xff] %v12122_v13  ;;  %v984_v1 = vmax.f32 %v830_v58, 0.0  ;;  %8350 = vrot.lane.b32.xlu1 %v8349_v19, %s9270_s4  ;;  %v2377_v35 = vrot.slane %v2375_v53, 3  ;;  %v2369_v27 = vshll.u32 %v1721_v52, 16  ;;  %v10053_v24 = vsel %vm9946_vm13, %v982_v51, 0.0  ;;  %v835_v50 = vpop.f32.mrb[24].mxu0  ;;  %4559 = vmatpush1.bf16.msra.mxu0 %v8639_v16 }
 0x1ec   : > { %vm10042_vm0 = vcmp.lt.s32.totalorder %v12124_v34, 12  ;;  %v985_v34 = vmax.f32 %v832_v23, 0.0  ;;  %v2380_v32 = vrot.slane %v2378_v29, 4  ;;  %v2368_v22 = vrot.slane %v2366_v49, 3  ;;  %1117 = vst [vmem:[#allocation2 + $0x110] sm:$0xff] %v10053_v24  ;;  %v837_v51 = vpop.f32.mrb[25].mxu0  ;;  %4560 = vmatprep.subr.bf16.mxu0 %v8647_v15 }
 0x1ed   : > { %v12126_v33 = vsel %vm10042_vm0, 4294967295, %v12125_v33  ;;  %v10058_v17 = vsel %vm9957_vm14, %v984_v1, 0.0  ;;  %v2371_v58 = vrot.slane %v2369_v27, 4  ;;  %v1288_v19 = vrot.slane %v9963_v40, 1  ;;  %v8642_v27 = vld [vmem:[#allocation9 + $0x328] ss:$20 sps:$4 sm:$0xff]  }
 0x1ee   : > { %12127 = vst [vmem:[#allocation55_spill] sm:$0xff] %v12126_v33  ;;  %v1290_v53 = vrot.slane %v9972_v20, 1  ;;  %v10064_v6 = vsel %vm9957_vm14, %v985_v34, 0.0  ;;  %v10066_v37 = vor.u32 %v2380_v32, %v2377_v35  ;;  %v451_v49 = vand.u32 15, %v10013_v4  ;;  %v839_v55 = vpop.f32.mrb[26].mxu0  ;;  %5011 = vmatpush1.bf16.msra.mxu1 %v8642_v27 }
 0x1ef   : > { %v12128_v52 = vsub.s32 2, %v9671_v38  ;;  %1120 = vst [vmem:[#allocation2 + $0x128] sm:$0xff] %v10064_v6  ;;  %v836_v14 = vadd.f32 %v835_v50, %v9684_v46  ;;  %v10076_v23 = vor.u32 %v2371_v58, %v2368_v22  ;;  %v12129_v29 = vrot.slane %v9920_v26, 1  ;;  %v8645_v50 = vld [vmem:[#allocation9 + $0x348] ss:$20 sps:$4 sm:$0xff]  }
 0x1f0   : > { %v12130_v4 = vrot.slane %v9930_v10, 1  ;;  %v838_v16 = vadd.f32 %v837_v51, %v9689_v48  ;;  %v1294_v32 = vrot.slane %v9982_v57, 1  ;;  %v12132_v22 = vand.u32 15, %v9914_v5  ;;  %4561 = vmatpush1.bf16.msra.mxu0 %v8645_v50 }
 0x1f1   : > { %v10072_v43 = vrot.slane %v9675_v41, %v12128_v52  ;;  %v1289_v1 = vsel %vm11976_vm4, %v12129_v29, %v1288_v19  ;;  %v10087_v41 = vsel %vm11974_vm8, %v9965_v30, %v10066_v37  ;;  %v12133_v58 = vmov 0  ;;  %v8650_v52 = vld [vmem:[#allocation9 + $0x354] ss:$20 sps:$4 sm:$0xff]   ;;  %v841_v29 = vpop.f32.mrb[27].mxu0 }
 0x1f2   : > { %v1291_v35 = vsel %vm11976_vm4, %v12130_v4, %v1290_v53  ;;  %12131 = vst [vmem:[#allocation56_spill] sm:$0xff] %v10087_v41  ;;  %vm10093_vm12 = vcmp.ge.s32.totalorder %v12132_v22, 2  ;;  %v987_v15 = vmax.f32 %v836_v14, 0.0  ;;  %4489 = vmatprep.mubr.bf16.mxu0 %v10087_v41  ;;  %4941 = vmatprep.mubr.bf16.mxu1 %v10087_v41  ;;  %v10102_v30 = vsel %vm11974_vm8, %v9974_v60, %v10076_v23  ;;  %v8657_v41 = vld [vmem:[#allocation9 + $0x398] ss:$20 sps:$4 sm:$0xff]  }
 0x1f3   : > { %v8354_v34 = vpack.i.bf16 %v1291_v35, %v1289_v1  ;;  %v12134_v58 = vsel %vm10093_vm12, 4294967295, %v12133_v58  ;;  %12136 = vst [vmem:[#allocation58_spill] sm:$0xff] %v10102_v30  ;;  %v840_v51 = vadd.f32 %v839_v55, %v9684_v46  ;;  %v8653_v1 = vld [vmem:[#allocation9 + $0x374] ss:$20 sps:$4 sm:$0xff]   ;;  %v988_v4 = vmax.f32 %v838_v16, 0.0  ;;  %4490 = vmatmul.mubr.bf16.gmra.mrb[40].mxu0 %v10102_v30  ;;  %4942 = vmatmul.mubr.bf16.gmra.mrb[24].mxu1 %v10102_v30 }
 0x1f4   : > { %12135 = vst [vmem:[#allocation57_spill] sm:$0xff] %v12134_v58  ;;  %v842_v14 = vadd.f32 %v841_v29, %v9689_v48  ;;  %v1295_v35 = vsel %vm11976_vm4, %v1288_v19, %v1294_v32  ;;  %vm10110_vm14 = vcmp.lt.s32.totalorder %v451_v49, 12  ;;  %v12137_v22 = vmov 0  ;;  %v8648_v29 = vld [vmem:[#allocation9 + $0x350] ss:$20 sps:$4 sm:$0xff]   ;;  %5012 = vmatprep.subr.bf16.mxu1 %v8650_v52  ;;  %4562 = vmatprep.subr.bf16.mxu0 %v8653_v1  ;;  %v845_v52 = vpop.f32.mrb[28].mxu0 }
 0x1f5   : > { %v12138_v22 = vsel %vm10110_vm14, 4294967295, %v12137_v22  ;;  %v10117_v55 = vsel %vm10032_vm15, %v987_v15, 0.0  ;;  %v990_v5 = vmax.f32 %v840_v51, 0.0  ;;  %8355 = vrot.lane.b32.xlu0 %v8354_v34, %s9270_s4  ;;  %v12140_v16 = vrot.slane %v9993_v44, 1  ;;  %v8651_v15 = vld [vmem:[#allocation9 + $0x370] ss:$20 sps:$4 sm:$0xff]   ;;  %5013 = vmatpush1.bf16.msra.mxu1 %v8648_v29 }
 0x1f6   : > { %12139 = vst [vmem:[#allocation59_spill] sm:$0xff] %v12138_v22  ;;  %v10125_v19 = vsel %vm10032_vm15, %v988_v4, 0.0  ;;  %v991_v49 = vmax.f32 %v842_v14, 0.0  ;;  %v1730_v60 = vpack.c.bf16 %v9972_v20, %v9930_v10  ;;  %v8656_v51 = vld [vmem:[#allocation9 + $0x37c] ss:$20 sps:$4 sm:$0xff]   ;;  %v1729_v27 = vpack.c.bf16 %v9963_v40, %v9920_v26  ;;  %4563 = vmatpush1.bf16.msra.mxu0 %v8651_v15 }
 0x1f7   : > { %v1297_v38 = vsel %vm11976_vm4, %v1290_v53, %v12140_v16  ;;  %1123 = vst [vmem:[#allocation2 + $0x140] sm:$0xff] %v10125_v19  ;;  %v10132_v53 = vsel %vm10042_vm0, %v990_v5, 0.0  ;;  %v897_v34 = vadd.f32 %v9789_v11, %v10072_v43  ;;  %v8654_v10 = vld [vmem:[#allocation9 + $0x378] ss:$20 sps:$4 sm:$0xff]   ;;  %v8659_v20 = vld [vmem:[#allocation9 + $0x39c] ss:$20 sps:$4 sm:$0xff]   ;;  %v846_v11 = vadd.f32 %v845_v52, %v9684_v46  ;;  %5014 = vmatprep.subr.bf16.mxu1 %v8656_v51 }
 0x1f8   : > { %v8359_v30 = vpack.i.bf16 %v1297_v38, %v1295_v35  ;;  %v10141_v50 = vsel %vm10042_vm0, %v991_v49, 0.0  ;;  %v2447_v5 = vshrl.u32 %v1730_v60, 16  ;;  %v2450_v4 = vshll.u32 %v1730_v60, 16  ;;  %v847_v35 = vpop.f32.mrb[29].mxu0  ;;  %v8662_v14 = vld [vmem:[#allocation9 + $0x3a4] ss:$20 sps:$4 sm:$0xff]   ;;  %4564 = vmatprep.subr.bf16.mxu0 %v8659_v20 }
 0x1f9   : > { %1126 = vst [vmem:[#allocation2 + $0x158] sm:$0xff] %v10141_v50  ;;  %v2438_v16 = vshrl.u32 %v1729_v27, 16  ;;  %v2441_v1 = vshll.u32 %v1729_v27, 16  ;;  %v959_v38 = vmax.f32 %v897_v34, 0.0  ;;  %v848_v40 = vadd.f32 %v847_v35, %v9689_v48  ;;  %5015 = vmatpush1.bf16.msra.mxu1 %v8654_v10  ;;  %v8665_v51 = vld [vmem:[#allocation9 + $0x3c4] ss:$20 sps:$4 sm:$0xff]  }
 0x1fa   : > { %8360 = vrot.lane.b32.xlu1 %v8359_v30, %s9270_s4  ;;  %v2449_v21 = vrot.slane %v2447_v5, 3  ;;  %v2452_v49 = vrot.slane %v2450_v4, 4  ;;  %v849_v30 = vpop.f32.mrb[30].mxu0  ;;  %v12141_v26 = vrot.slane %v10048_v36, 1  ;;  %v993_v33 = vmax.f32 %v846_v11, 0.0  ;;  %4565 = vmatpush1.bf16.msra.mxu0 %v8657_v41 }
 0x1fb   : > { %v2440_v52 = vrot.slane %v2438_v16, 3  ;;  %v2443_v39 = vrot.slane %v2441_v1, 4  ;;  %v850_v27 = vadd.f32 %v849_v30, %v9684_v46  ;;  %v851_v34 = vpop.f32.mrb[31].mxu0  ;;  %v994_v5 = vmax.f32 %v848_v40, 0.0  ;;  %5016 = vmatprep.subr.bf16.mxu1 %v8662_v14  ;;  %v8668_v11 = vld [vmem:[#allocation9 + $0x3cc] ss:$20 sps:$4 sm:$0xff]   ;;  %4566 = vmatprep.subr.bf16.mxu0 %v8665_v51 }
 0x1fc   : > { %v1301_v60 = vsel %vm11976_vm4, %v1294_v32, %v12141_v26  ;;  %v10152_v29 = vor.u32 %v2452_v49, %v2449_v21  ;;  %v852_v4 = vadd.f32 %v851_v34, %v9689_v48  ;;  %v1039_v35 = vsel %vm9711_vm3, %v959_v38, 0.0  ;;  %v8660_v48 = vld [vmem:[#allocation9 + $0x3a0] ss:$20 sps:$4 sm:$0xff]   ;;  %v8702_v22 = vld [vmem:[#allocation9 + $0x4b8] ss:$20 sps:$4 sm:$0xff]  }
 0x1fd   : > { %v10159_v26 = vsel %vm10093_vm12, %v993_v33, 0.0  ;;  %v10161_v32 = vor.u32 %v2443_v39, %v2440_v52  ;;  %v996_v15 = vmax.f32 %v850_v27, 0.0  ;;  %vm12142_vm8 = vcmask 523264   ;;  %v8663_v14 = vld [vmem:[#allocation9 + $0x3c0] ss:$20 sps:$4 sm:$0xff]   ;;  %5017 = vmatpush1.bf16.msra.mxu1 %v8660_v48 }
 0x1fe   : > { %1094 = vst.msk [vmem:[#allocation2 + $0x58] sm:$0xff] %vm12142_vm8, %v1039_v35  ;;  %v12143_v46 = vrot.slane %v10053_v24, 1  ;;  %v12144_v21 = vrot.slane %v9993_v44, 1  ;;  %vm12145_vm3 = vsmask.f32 4352  ;;  %v10177_v39 = vsel %vm10093_vm12, %v994_v5, 0.0  ;;  %5018 = vmatprep.subr.bf16.mxu1 %v8668_v11  ;;  %4567 = vmatpush1.bf16.msra.mxu0 %v8663_v14 }
 0x1ff   : > { %v10173_v33 = vsel %vm12145_vm3, %v10066_v37, %v10152_v29  ;;  %v997_v20 = vmax.f32 %v852_v4, 0.0  ;;  %1129 = vst [vmem:[#allocation2 + $0x170] sm:$0xff] %v10177_v39  ;;  %v10186_v37 = vsel %vm12145_vm3, %v10076_v23, %v10161_v32  ;;  %v10190_v10 = vsel %vm10110_vm14, %v996_v15, 0.0  ;;  %vm12150_vm3 = vmmov %vm12142_vm8 }
 0x200   : > { %v1303_v40 = vsel %vm11976_vm4, %v12144_v21, %v12143_v46  ;;  %12146 = vst [vmem:[#allocation60_spill] sm:$0xff] %v10173_v33  ;;  %4499 = vmatprep.mubr.bf16.mxu0 %v10173_v33  ;;  %4951 = vmatprep.mubr.bf16.mxu1 %v10173_v33  ;;  %12147 = vst [vmem:[#allocation61_spill] sm:$0xff] %v10186_v37  ;;  %v889_v23 = vadd.f32 %v9797_v18, %v10072_v43  ;;  %v1306_v30 = vrot.slane %v10058_v17, 1  ;;  %v8666_v18 = vld [vmem:[#allocation9 + $0x3c8] ss:$20 sps:$4 sm:$0xff]  }
 0x201   : > { %v8364_v41 = vpack.i.bf16 %v1303_v40, %v1301_v60  ;;  %4500 = vmatmul.mubr.bf16.gmra.mrb[44].mxu0 %v10186_v37  ;;  %4952 = vmatmul.mubr.bf16.gmra.mrb[28].mxu1 %v10186_v37  ;;  %1131 = vst [vmem:[#allocation2 + $0x180] sm:$0xff] %v10190_v10  ;;  %v10197_v1 = vsel %vm10110_vm14, %v997_v20, 0.0  ;;  %v900_v49 = vadd.f32 %v9808_v31, %v10072_v43  ;;  %v8671_v60 = vld [vmem:[#allocation9 + $0x3ec] ss:$20 sps:$4 sm:$0xff]   ;;  %v1308_v34 = vrot.slane %v10064_v6, 1 }
 0x202   : > { %1132 = vst [vmem:[#allocation2 + $0x188] sm:$0xff] %v10197_v1  ;;  %v892_v5 = vadd.f32 %v9815_v45, %v10072_v43  ;;  %v953_v4 = vmax.f32 %v889_v23, 0.0  ;;  %v12148_v35 = vrot.slane %v10048_v36, 1  ;;  %v913_v46 = vadd.f32 %v9847_v28, %v10072_v43  ;;  %v8674_v21 = vld [vmem:[#allocation9 + $0x3f4] ss:$20 sps:$4 sm:$0xff]   ;;  %4568 = vmatprep.subr.bf16.mxu0 %v8671_v60  ;;  %5019 = vmatpush1.bf16.msra.mxu1 %v8666_v18 }
 0x203   : > { %8365 = vrot.lane.b32.xlu0 %v8364_v41, %s9270_s4  ;;  %v962_v31 = vmax.f32 %v900_v49, 0.0  ;;  %v12149_v45 = vrot.slane %v10053_v24, 1  ;;  %v1738_v20 = vpack.c.bf16 %v10053_v24, %v9993_v44  ;;  %v905_v41 = vadd.f32 %v9854_v63, %v10072_v43  ;;  %v8669_v23 = vld [vmem:[#allocation9 + $0x3e8] ss:$20 sps:$4 sm:$0xff]   ;;  %5020 = vmatprep.subr.bf16.mxu1 %v8674_v21  ;;  %v8678_v21 = vld [vmem:[#allocation9 + $0x418] ss:$20 sps:$4 sm:$0xff]  }
 0x204   : > { %v1307_v15 = vsel %vm11976_vm4, %v12148_v35, %v1306_v30  ;;  %v956_v48 = vmax.f32 %v892_v5, 0.0  ;;  %v1033_v28 = vsel %vm9701_vm1, %v953_v4, 0.0  ;;  %v971_v49 = vmax.f32 %v913_v46, 0.0  ;;  %v8677_v35 = vld [vmem:[#allocation9 + $0x414] ss:$20 sps:$4 sm:$0xff]   ;;  %4569 = vmatpush1.bf16.msra.mxu0 %v8669_v23 }
 0x205   : > { %v1309_v40 = vsel %vm11976_vm4, %v12149_v45, %v1308_v34  ;;  %v1042_v51 = vsel %vm9719_vm5, %v962_v31, 0.0  ;;  %1088 = vst.msk [vmem:[#allocation2 + $0x28] sm:$0xff] %vm12142_vm8, %v1033_v28  ;;  %v2519_v63 = vshrl.u32 %v1738_v20, 16  ;;  %v2522_v24 = vshll.u32 %v1738_v20, 16  ;;  %v8672_v5 = vld [vmem:[#allocation9 + $0x3f0] ss:$20 sps:$4 sm:$0xff]   ;;  %vm12151_vm4 = vmmov %vm12150_vm3  ;;  %4570 = vmatprep.subr.bf16.mxu0 %v8677_v35 }
 0x206   : > { %v8369_v11 = vpack.i.bf16 %v1309_v40, %v1307_v15  ;;  %1097 = vst.msk [vmem:[#allocation2 + $0x70] sm:$0xff] %vm12150_vm3, %v1042_v51  ;;  %v1036_v44 = vsel %vm9706_vm2, %v956_v48, 0.0  ;;  %v965_v14 = vmax.f32 %v905_v41, 0.0  ;;  %v1051_v60 = vsel %vm9822_vm9, %v971_v49, 0.0  ;;  %v8680_v46 = vld [vmem:[#allocation9 + $0x41c] ss:$20 sps:$4 sm:$0xff]   ;;  %vm12152_vm8 = vmmov %vm12150_vm3  ;;  %5021 = vmatpush1.bf16.msra.mxu1 %v8672_v5 }
 0x207   : > { %1091 = vst.msk [vmem:[#allocation2 + $0x40] sm:$0xff] %vm12151_vm4, %v1036_v44  ;;  %v1737_v4 = vpack.c.bf16 %v10048_v36, %v9982_v57  ;;  %v916_v31 = vadd.f32 %v9862_v2, %v10072_v43  ;;  %v908_v15 = vadd.f32 %v9868_v9, %v10072_v43  ;;  %v2521_v18 = vrot.slane %v2519_v63, 3  ;;  %v12154_v20 = vld [vmem:[#allocation41_spill] sm:$0xff]  ;;  %vm12155_vm4 = vmmov %vm12150_vm3  ;;  %5022 = vmatprep.subr.bf16.mxu1 %v8680_v46  ;;  %v8686_v35 = vld [vmem:[#allocation9 + $0x444] ss:$20 sps:$4 sm:$0xff]  }
 0x208   : > { %8370 = vrot.lane.b32.xlu1 %v8369_v11, %s9270_s4  ;;  %1106 = vst.msk [vmem:[#allocation2 + $0xb8] sm:$0xff] %vm12152_vm8, %v1051_v60  ;;  %v2524_v45 = vrot.slane %v2522_v24, 4  ;;  %v1045_v48 = vsel %vm9761_vm6, %v965_v14, 0.0  ;;  %v929_v41 = vadd.f32 %v12154_v20, %v10072_v43  ;;  %v8675_v28 = vld [vmem:[#allocation9 + $0x410] ss:$20 sps:$4 sm:$0xff]   ;;  %v1312_v63 = vrot.slane %v10117_v55, 1  ;;  %vm12160_vm8 = vmmov %vm12155_vm4 }
 0x209   : > { %1100 = vst.msk [vmem:[#allocation2 + $0x88] sm:$0xff] %vm12155_vm4, %v1045_v48  ;;  %v2510_v2 = vshrl.u32 %v1737_v4, 16  ;;  %v2513_v51 = vshll.u32 %v1737_v4, 16  ;;  %v974_v11 = vmax.f32 %v916_v31, 0.0  ;;  %v968_v9 = vmax.f32 %v908_v15, 0.0  ;;  %4571 = vmatpush1.bf16.msra.mxu0 %v8675_v28 }
 0x20a   : > { %v10251_v49 = vor.u32 %v2524_v45, %v2521_v18  ;;  %v983_v44 = vmax.f32 %v929_v41, 0.0  ;;  %v1314_v24 = vrot.slane %v10125_v19, 1  ;;  %v8683_v14 = vld [vmem:[#allocation9 + $0x43c] ss:$20 sps:$4 sm:$0xff]   ;;  %vm12158_vm3 = vsmask.f32 4352  ;;  %5023 = vmatpush1.bf16.msra.mxu1 %v8678_v21 }
 0x20b   : > { %v2512_v60 = vrot.slane %v2510_v2, 3  ;;  %v2515_v23 = vrot.slane %v2513_v51, 4  ;;  %v1054_v48 = vsel %vm9832_vm10, %v974_v11, 0.0  ;;  %v1048_v4 = vsel %vm9773_vm7, %v968_v9, 0.0  ;;  %v12163_v18 = vld [vmem:[#allocation29_spill] sm:$0xff]  ;;  %4572 = vmatprep.subr.bf16.mxu0 %v8683_v14  ;;  %5024 = vmatprep.subr.bf16.mxu1 %v8686_v35  ;;  %v12175_v41 = vld [vmem:[#allocation50_spill] sm:$0xff] }
 0x20c   : > { %v10262_v31 = vsel %vm12158_vm3, %v10152_v29, %v10251_v49  ;;  %1109 = vst.msk [vmem:[#allocation2 + $0xd0] sm:$0xff] %vm12160_vm8, %v1054_v48  ;;  %v1063_v5 = vsel %vm9946_vm13, %v983_v44, 0.0  ;;  %vm12161_vm10 = vcmask 1046528   ;;  %v12164_v29 = vld [vmem:[#allocation32_spill] sm:$0xff]  ;;  %vm12165_vm3 = vmmov %vm12155_vm4  ;;  %v8681_v11 = vld [vmem:[#allocation9 + $0x438] ss:$20 sps:$4 sm:$0xff]   ;;  %v945_v35 = vadd.f32 %v9977_v7, %v10072_v43 }
 0x20d   : > { %12159 = vst [vmem:[#allocation41_spill] sm:$0xff] %v10262_v31  ;;  %1103 = vst.msk [vmem:[#allocation2 + $0xa0] sm:$0xff] %vm12155_vm4, %v1048_v4  ;;  %v1313_v15 = vsel %vm12161_vm10, %v1306_v30, %v1312_v63  ;;  %4509 = vmatprep.mubr.bf16.mxu0 %v10262_v31  ;;  %4961 = vmatprep.mubr.bf16.mxu1 %v10262_v31  ;;  %v10278_v2 = vor.u32 %v2515_v23, %v2512_v60  ;;  %v12166_v30 = vld [vmem:[#allocation43_spill] sm:$0xff]  ;;  %v1318_v44 = vrot.slane %v10132_v53, 1  ;;  %v12168_v60 = vld [vmem:[#allocation33_spill] sm:$0xff] }
 0x20e   : > { %vm12162_vm7 = vmmov %vm12161_vm10  ;;  %1118 = vst.msk [vmem:[#allocation2 + $0x118] sm:$0xff] %vm12165_vm3, %v1063_v5  ;;  %v921_v9 = vadd.f32 %v12166_v30, %v10072_v43  ;;  %v1320_v48 = vrot.slane %v10141_v50, 1  ;;  %v8684_v4 = vld [vmem:[#allocation9 + $0x440] ss:$20 sps:$4 sm:$0xff]   ;;  %v8689_v45 = vld [vmem:[#allocation9 + $0x464] ss:$20 sps:$4 sm:$0xff]   ;;  %4573 = vmatpush1.bf16.msra.mxu0 %v8681_v11  ;;  %vm12174_vm4 = vnez %v12109_v0  ;;  %v937_v27 = vadd.f32 %v12175_v41, %v10072_v43 }
 0x20f   : > { %v1315_v46 = vsel %vm12162_vm7, %v1308_v34, %v1314_v24  ;;  %v12167_v34 = vld [vmem:[#allocation44_spill] sm:$0xff]  ;;  %vm12169_vm7 = vsmask.f32 4352  ;;  %v1319_v23 = vsel %vm12161_vm10, %v1312_v63, %v1318_v44  ;;  %vm12172_vm8 = vmmov %vm12161_vm10  ;;  %5025 = vmatpush1.bf16.msra.mxu1 %v8684_v4  ;;  %4574 = vmatprep.subr.bf16.mxu0 %v8689_v45  ;;  %v995_v11 = vmax.f32 %v945_v35, 0.0  ;;  %v10402_v20 = vld [vmem:[#allocation2 + $0xb8] sm:$0xff] }
 0x210   : > { %v8374_v51 = vpack.i.bf16 %v1315_v46, %v1313_v15  ;;  %v932_v28 = vadd.f32 %v12167_v34, %v10072_v43  ;;  %v10292_v15 = vsel %vm12169_vm7, %v10161_v32, %v10278_v2  ;;  %v12171_v46 = vld [vmem:[#allocation45_spill] sm:$0xff]  ;;  %v977_v21 = vmax.f32 %v921_v9, 0.0  ;;  %v8687_v5 = vld [vmem:[#allocation9 + $0x460] ss:$20 sps:$4 sm:$0xff]   ;;  %vm12176_vm7 = vmmov %vm12165_vm3 }
 0x211   : > { %12170 = vst [vmem:[#allocation29_spill] sm:$0xff] %v10292_v15  ;;  %v924_v30 = vadd.f32 %v12171_v46, %v10072_v43  ;;  %v8692_v34 = vld [vmem:[#allocation9 + $0x46c] ss:$20 sps:$4 sm:$0xff]   ;;  %4510 = vmatmul.mubr.bf16.gmra.mrb[48].mxu0 %v10292_v15  ;;  %4962 = vmatmul.mubr.bf16.gmra.mrb[32].mxu1 %v10292_v15  ;;  %v1321_v32 = vsel %vm12172_vm8, %v1314_v24, %v1320_v48  ;;  %v8690_v7 = vld [vmem:[#allocation9 + $0x468] ss:$20 sps:$4 sm:$0xff]   ;;  %vm12179_vm8 = vmmov %vm12165_vm3  ;;  %v989_v4 = vmax.f32 %v937_v27, 0.0 }
 0x212   : > { %8375 = vrot.lane.b32.xlu0 %v8374_v51, %s9270_s4  ;;  %v986_v14 = vmax.f32 %v932_v28, 0.0  ;;  %v8379_v51 = vpack.i.bf16 %v1321_v32, %v1319_v23  ;;  %v1746_v46 = vpack.c.bf16 %v10125_v19, %v10064_v6  ;;  %v1057_v28 = vsel %vm9873_vm11, %v977_v21, 0.0  ;;  %v8695_v23 = vld [vmem:[#allocation9 + $0x48c] ss:$20 sps:$4 sm:$0xff]   ;;  %5026 = vmatprep.subr.bf16.mxu1 %v8692_v34  ;;  %v8698_v41 = vld [vmem:[#allocation9 + $0x494] ss:$20 sps:$4 sm:$0xff]  }
 0x213   : > { %v980_v38 = vmax.f32 %v924_v30, 0.0  ;;  %v1745_v24 = vpack.c.bf16 %v10117_v55, %v10058_v17  ;;  %1112 = vst.msk [vmem:[#allocation2 + $0xe8] sm:$0xff] %vm12165_vm3, %v1057_v28  ;;  %v12177_v6 = vld [vmem:[#allocation37_spill] sm:$0xff]  ;;  %v12180_v32 = vld [vmem:[#allocation52_spill] sm:$0xff]  ;;  %4575 = vmatpush1.bf16.msra.mxu0 %v8687_v5  ;;  %v1069_v27 = vsel %vm10032_vm15, %v989_v4, 0.0  ;;  %5027 = vmatpush1.bf16.msra.mxu1 %v8690_v7  ;;  %v12183_v5 = vld [vmem:[#allocation34_spill] sm:$0xff] }
 0x214   : > { %v1066_v63 = vsel %vm12174_vm4, %v986_v14, 0.0  ;;  %8380 = vrot.lane.b32.xlu1 %v8379_v51, %s9270_s4  ;;  %vm12178_vm10 = vnez %v12177_v6  ;;  %v2591_v30 = vshrl.u32 %v1746_v46, 16  ;;  %v2594_v21 = vshll.u32 %v1746_v46, 16  ;;  %v8693_v46 = vld [vmem:[#allocation9 + $0x488] ss:$20 sps:$4 sm:$0xff]   ;;  %4576 = vmatprep.subr.bf16.mxu0 %v8695_v23 }
 0x215   : > { %1121 = vst.msk [vmem:[#allocation2 + $0x130] sm:$0xff] %vm12176_vm7, %v1066_v63  ;;  %v1060_v19 = vsel %vm12178_vm10, %v980_v38, 0.0  ;;  %v2582_v45 = vshrl.u32 %v1745_v24, 16  ;;  %v2585_v14 = vshll.u32 %v1745_v24, 16  ;;  %v948_v28 = vadd.f32 %v12180_v32, %v10072_v43  ;;  %v12181_v38 = vld [vmem:[#allocation53_spill] sm:$0xff]  ;;  %vm12182_vm7 = vmmov %vm12165_vm3  ;;  %5028 = vmatprep.subr.bf16.mxu1 %v8698_v41  ;;  %v12194_v0 = vld [vmem:[#allocation48_spill] sm:$0xff] }
 0x216   : > { %1115 = vst.msk [vmem:[#allocation2 + $0x100] sm:$0xff] %vm12179_vm8, %v1060_v19  ;;  %v1075_v63 = vsel %vm10093_vm12, %v995_v11, 0.0  ;;  %v2593_v51 = vrot.slane %v2591_v30, 3  ;;  %v2596_v16 = vrot.slane %v2594_v21, 4  ;;  %v940_v35 = vadd.f32 %v12181_v38, %v10072_v43  ;;  %v8696_v23 = vld [vmem:[#allocation9 + $0x490] ss:$20 sps:$4 sm:$0xff]  }
 0x217   : > { %1130 = vst.msk [vmem:[#allocation2 + $0x178] sm:$0xff] %vm12165_vm3, %v1075_v63  ;;  %v2584_v34 = vrot.slane %v2582_v45, 3  ;;  %v2587_v24 = vrot.slane %v2585_v14, 4  ;;  %v998_v19 = vmax.f32 %v948_v28, 0.0  ;;  %v1324_v30 = vrot.slane %v10159_v26, 1  ;;  %v12184_v63 = vld [vmem:[#allocation38_spill] sm:$0xff]  ;;  %4577 = vmatpush1.bf16.msra.mxu0 %v8693_v46  ;;  %5029 = vmatpush1.bf16.msra.mxu1 %v8696_v23 }
 0x218   : > { %v10332_v32 = vor.u32 %v2596_v16, %v2593_v51  ;;  %1124 = vst.msk [vmem:[#allocation2 + $0x148] sm:$0xff] %vm12182_vm7, %v1069_v27  ;;  %v992_v11 = vmax.f32 %v940_v35, 0.0  ;;  %v1326_v43 = vrot.slane %v10177_v39, 1  ;;  %vm12185_vm8 = vsmask.f32 4352  ;;  %v10357_v51 = vld [vmem:[#allocation2 + $0x28] sm:$0xff] }
 0x219   : > { %v10339_v4 = vor.u32 %v2587_v24, %v2584_v34  ;;  %v1078_v7 = vsel %vm10110_vm14, %v998_v19, 0.0  ;;  %vm12188_vm7 = vcmask 1046528   ;;  %v8701_v35 = vld [vmem:[#allocation9 + $0x4b4] ss:$20 sps:$4 sm:$0xff]   ;;  %v8704_v27 = vld [vmem:[#allocation9 + $0x4bc] ss:$20 sps:$4 sm:$0xff]  }
 0x21a   : > { %v10346_v16 = vsel %vm12185_vm8, %v10251_v49, %v10332_v32  ;;  %1133 = vst.msk [vmem:[#allocation2 + $0x190] sm:$0xff] %vm12165_vm3, %v1078_v7  ;;  %v1072_v41 = vsel %vm10042_vm0, %v992_v11, 0.0  ;;  %v1325_v14 = vsel %vm12188_vm7, %v1318_v44, %v1324_v30  ;;  %vm12189_vm15 = vmmov %vm12188_vm7  ;;  %v1330_v34 = vrot.slane %v10190_v10, 1  ;;  %v8699_v24 = vld [vmem:[#allocation9 + $0x4b0] ss:$20 sps:$4 sm:$0xff]   ;;  %v10383_v45 = vld [vmem:[#allocation2 + $0x58] sm:$0xff]  ;;  %4578 = vmatprep.subr.bf16.mxu0 %v8701_v35  ;;  %5030 = vmatprep.subr.bf16.mxu1 %v8704_v27 }
 0x21b   : > { %12186 = vst [vmem:[#allocation32_spill] sm:$0xff] %v10346_v16  ;;  %v1327_v28 = vsel %vm12189_vm15, %v1320_v48, %v1326_v43  ;;  %4519 = vmatprep.mubr.bf16.mxu0 %v10346_v16  ;;  %4971 = vmatprep.mubr.bf16.mxu1 %v10346_v16  ;;  %v10364_v49 = vsel %vm12185_vm8, %v10278_v2, %v10339_v4  ;;  %1127 = vst.msk [vmem:[#allocation2 + $0x160] sm:$0xff] %vm12165_vm3, %v1072_v41  ;;  %v1332_v48 = vrot.slane %v10197_v1, 1  ;;  %v8707_v46 = vld [vmem:[#allocation9 + $0x4dc] ss:$20 sps:$4 sm:$0xff]   ;;  %v12191_v19 = vld [vmem:[#allocation40_spill] sm:$0xff] }
 0x21c   : > { %12190 = vst [vmem:[#allocation43_spill] sm:$0xff] %v10364_v49  ;;  %v8384_v44 = vpack.i.bf16 %v1327_v28, %v1325_v14  ;;  %v12192_v7 = vld [vmem:[#allocation42_spill] sm:$0xff]  ;;  %4520 = vmatmul.mubr.bf16.gmra.mrb[52].mxu0 %v10364_v49  ;;  %4972 = vmatmul.mubr.bf16.gmra.mrb[36].mxu1 %v10364_v49  ;;  %v1754_v2 = vpack.c.bf16 %v10177_v39, %v10141_v50  ;;  %v10377_v14 = vld [vmem:[#allocation2 + $0x40] sm:$0xff]  ;;  %v1183_v28 = vld [vmem:[#allocation2 + $0x188] sm:$0x7f]  ;;  %v1245_v38 = vrot.slane %v10357_v51, 1 }
 0x21d   : > { %v1753_v41 = vpack.c.bf16 %v10159_v26, %v10132_v53  ;;  %vm12193_vm15 = vmmov %vm12188_vm7  ;;  %v1333_v11 = vsel %vm12188_vm7, %v1326_v43, %v1332_v48  ;;  %v8394_v21 = vpack.i.bf16 %v1332_v48, %v1330_v34  ;;  %v8710_v6 = vld [vmem:[#allocation9 + $0x4e4] ss:$20 sps:$4 sm:$0xff]   ;;  %v1762_v43 = vpack.c.bf16 %v1183_v28, %v1183_v28  ;;  %4579 = vmatpush1.bf16.msra.mxu0 %v8699_v24 }
 0x21e   : > { %8385 = vrot.lane.b32.xlu0 %v8384_v44, %s9270_s4  ;;  %v1331_v1 = vsel %vm12193_vm15, %v1324_v30, %v1330_v34  ;;  %v2663_v39 = vshrl.u32 %v1754_v2, 16  ;;  %v2666_v13 = vshll.u32 %v1754_v2, 16  ;;  %v1250_v30 = vrot.slane %v10377_v14, 1  ;;  %v10387_v34 = vld [vmem:[#allocation2 + $0x70] sm:$0xff]  ;;  %4580 = vmatprep.subr.bf16.mxu0 %v8707_v46  ;;  %v8713_v35 = vld [vmem:[#allocation9 + $0x504] ss:$20 sps:$4 sm:$0xff]   ;;  %vm12195_vm8 = vmmov %vm12188_vm7 }
 0x21f   : > { %v8389_v50 = vpack.i.bf16 %v1333_v11, %v1331_v1  ;;  %v2654_v58 = vshrl.u32 %v1753_v41, 16  ;;  %v2657_v9 = vshll.u32 %v1753_v41, 16  ;;  %v8705_v48 = vld [vmem:[#allocation9 + $0x4d8] ss:$20 sps:$4 sm:$0xff]   ;;  %v1256_v2 = vrot.slane %v10383_v45, 1  ;;  %v10393_v42 = vld [vmem:[#allocation2 + $0x88] sm:$0xff]  ;;  %5031 = vmatpush1.bf16.msra.mxu1 %v8702_v22  ;;  %vm12196_vm3 = vmmov %vm12188_vm7 }
 0x220   : > { %v2665_v23 = vrot.slane %v2663_v39, 3  ;;  %v2668_v11 = vrot.slane %v2666_v13, 4  ;;  %v1251_v41 = vsel %vm12195_vm8, %v1245_v38, %v1250_v30  ;;  %v2735_v44 = vshrl.u32 %v1762_v43, 16  ;;  %5032 = vmatprep.subr.bf16.mxu1 %v8710_v6  ;;  %vm12199_vm7 = vmmov %vm12196_vm3 }
 0x221   : > { %8390 = vrot.lane.b32.xlu1 %v8389_v50, %s9270_s4  ;;  %v2656_v1 = vrot.slane %v2654_v58, 3  ;;  %v2659_v27 = vrot.slane %v2657_v9, 4  ;;  %v2738_v28 = vshll.u32 %v1762_v43, 16  ;;  %v8399_v52 = vpack.i.bf16 %v1251_v41, %v1245_v38  ;;  %v10397_v58 = vld [vmem:[#allocation2 + $0xa0] sm:$0xff]  ;;  %4581 = vmatpush1.bf16.msra.mxu0 %v8705_v48 }
 0x222   : > { %8395 = vrot.lane.b32.xlu0 %v8394_v21, %s9270_s4  ;;  %v2669_v24 = vor.u32 %v2668_v11, %v2665_v23  ;;  %v1257_v50 = vsel %vm12196_vm3, %v1250_v30, %v1256_v2  ;;  %v1262_v13 = vrot.slane %v10387_v34, 1  ;;  %v2737_v9 = vrot.slane %v2735_v44, 3  ;;  %v8708_v43 = vld [vmem:[#allocation9 + $0x4e0] ss:$20 sps:$4 sm:$0xff]   ;;  %v10412_v23 = vld [vmem:[#allocation2 + $0xd0] sm:$0xff]  ;;  %4663 = vmatprep.subr.bf16.mxu0 %v8713_v35 }
 0x223   : > { %v10400_v21 = vor.u32 %v2659_v27, %v2656_v1  ;;  %v2740_v39 = vrot.slane %v2738_v28, 4  ;;  %vm12197_vm15 = vsmask.f32 4352  ;;  %v1268_v30 = vrot.slane %v10393_v42, 1  ;;  %v1182_v11 = vld [vmem:[#allocation2 + $0x180] sm:$0x7f]  ;;  %5033 = vmatpush1.bf16.msra.mxu1 %v8708_v43 }
 0x224   : > { %v10407_v38 = vsel %vm12197_vm15, %v10332_v32, %v2669_v24  ;;  %v1263_v6 = vsel %vm12199_vm7, %v1256_v2, %v1262_v13  ;;  %vm12200_vm8 = vmmov %vm12197_vm15  ;;  %v8716_v1 = vld [vmem:[#allocation9 + $0x50c] ss:$20 sps:$4 sm:$0xff]   ;;  %v1280_v41 = vrot.slane %v10402_v20, 1  ;;  %v1761_v2 = vpack.c.bf16 %v1182_v11, %v1182_v11 }
 0x225   : > { %12198 = vst [vmem:[#allocation44_spill] sm:$0xff] %v10407_v38  ;;  %8400 = vrot.lane.b32.xlu1 %v8399_v52, %s9270_s4  ;;  %4529 = vmatprep.mubr.bf16.mxu0 %v10407_v38  ;;  %v10419_v44 = vsel %vm12200_vm8, %v10339_v4, %v10400_v21  ;;  %v2741_v32 = vor.u32 %v2740_v39, %v2737_v9  ;;  %v1274_v52 = vrot.slane %v10397_v58, 1  ;;  %v10428_v4 = vld [vmem:[#allocation2 + $0xe8] sm:$0xff]  ;;  %v10430_v28 = vld [vmem:[#allocation2 + $0x100] sm:$0xff]  ;;  %vm12202_vm15 = vmmov %vm12200_vm8  ;;  %vm12353_vm14 = vsmask.f32 4352 }
 0x226   : > { %4981 = vmatprep.mubr.bf16.mxu1 %v10407_v38  ;;  %12201 = vst [vmem:[#allocation33_spill] sm:$0xff] %v10419_v44  ;;  %v8404_v48 = vpack.i.bf16 %v1263_v6, %v1257_v50  ;;  %4530 = vmatmul.mubr.bf16.gmra.mrb[56].mxu0 %v10419_v44  ;;  %v1269_v35 = vsel %vm12196_vm3, %v1262_v13, %v1268_v30  ;;  %vm12204_vm7 = vmmov %vm12196_vm3  ;;  %v1286_v6 = vrot.slane %v10412_v23, 1  ;;  %v1292_v43 = vrot.slane %v10428_v4, 1  ;;  %v1178_v54 = vld [vmem:[#allocation2 + $0x160] sm:$0xff] }
 0x227   : > { %4982 = vmatmul.mubr.bf16.gmra.mrb[40].mxu1 %v10419_v44  ;;  %v10434_v9 = vsel %vm12202_vm15, %v2669_v24, %v2741_v32  ;;  %v1275_v39 = vsel %vm12204_vm7, %v1268_v30, %v1274_v52  ;;  %v1281_v50 = vsel %vm12196_vm3, %v1274_v52, %v1280_v41  ;;  %v10443_v24 = vld [vmem:[#allocation2 + $0x118] sm:$0xff]  ;;  %v10445_v32 = vld [vmem:[#allocation2 + $0x130] sm:$0xff]  ;;  %vm12205_vm15 = vmmov %vm12196_vm3  ;;  %v1298_v13 = vrot.slane %v10430_v28, 1  ;;  %5115 = vmatprep.subr.bf16.mxu1 %v8716_v1 }
 0x228   : > { %12203 = vst [vmem:[#allocation45_spill] sm:$0xff] %v10434_v9  ;;  %8405 = vrot.lane.b32.xlu0 %v8404_v48, %s9270_s4  ;;  %4539 = vmatprep.mubr.bf16.mxu0 %v10434_v9  ;;  %v8409_v27 = vpack.i.bf16 %v1275_v39, %v1269_v35  ;;  %v1287_v48 = vsel %vm12205_vm15, %v1280_v41, %v1286_v6  ;;  %v2726_v52 = vshrl.u32 %v1761_v2, 16  ;;  %v2729_v11 = vshll.u32 %v1761_v2, 16  ;;  %v10453_v39 = vld [vmem:[#allocation2 + $0x148] sm:$0xff]  ;;  %vm12206_vm7 = vmmov %vm12196_vm3  ;;  %v1187_v2 = vld [vmem:[#allocation2 + $0x190] sm:$0xff] }
 0x229   : > { %4991 = vmatprep.mubr.bf16.mxu1 %v10434_v9  ;;  %v8414_v35 = vpack.i.bf16 %v1287_v48, %v1281_v50  ;;  %v1293_v46 = vsel %vm12206_vm7, %v1286_v6, %v1292_v43  ;;  %v1299_v30 = vsel %vm12196_vm3, %v1292_v43, %v1298_v13  ;;  %v1304_v41 = vrot.slane %v10443_v24, 1  ;;  %v1181_v48 = vld [vmem:[#allocation2 + $0x178] sm:$0xff]  ;;  %vm12207_vm15 = vmmov %vm12196_vm3 }
 0x22a   : > { %8410 = vrot.lane.b32.xlu1 %v8409_v27, %s9270_s4  ;;  %v1310_v40 = vrot.slane %v10445_v32, 1  ;;  %v2728_v22 = vrot.slane %v2726_v52, 3  ;;  %v2731_v27 = vrot.slane %v2729_v11, 4  ;;  %v8419_v50 = vpack.i.bf16 %v1299_v30, %v1293_v46  ;;  %vm12208_vm7 = vmmov %vm12196_vm3  ;;  %v1188_v52 = vld [vmem:[#allocation2 + $0x18] sm:$0xfe] }
 0x22b   : > { %v1305_v6 = vsel %vm12207_vm15, %v1298_v13, %v1304_v41  ;;  %v1316_v8 = vrot.slane %v10453_v39, 1  ;;  %v1328_v11 = vrot.slane %v1181_v48, 1  ;;  %v1334_v59 = vrot.slane %v1187_v2, 1  ;;  %vm12209_vm15 = vmmov %vm12200_vm8 }
 0x22c   : > { %8415 = vrot.lane.b32.xlu0 %v8414_v35, %s9270_s4  ;;  %v1311_v43 = vsel %vm12208_vm7, %v1304_v41, %v1310_v40  ;;  %v2732_v62 = vor.u32 %v2731_v27, %v2728_v22  ;;  %v1322_v35 = vrot.slane %v1178_v54, 1  ;;  %vm12211_vm7 = vmmov %vm12196_vm3  ;;  %v12213_v2 = vrot.slane %v9780_v61, 2 }
 0x22d   : > { %v8424_v1 = vpack.i.bf16 %v1311_v43, %v1305_v6  ;;  %v1317_v30 = vsel %vm12196_vm3, %v1310_v40, %v1316_v8  ;;  %vm12212_vm8 = vmmov %vm12196_vm3  ;;  %v12214_v6 = vld [vmem:[#allocation26_spill] sm:$0xff] }
 0x22e   : > { %8420 = vrot.lane.b32.xlu1 %v8419_v50, %s9270_s4  ;;  %v10473_v9 = vsel %vm12209_vm15, %v10400_v21, %v2732_v62  ;;  %v1323_v22 = vsel %vm12211_vm7, %v1316_v8, %v1322_v35  ;;  %v1329_v40 = vsel %vm12196_vm3, %v1322_v35, %v1328_v11  ;;  %v1335_v27 = vsel %vm12212_vm8, %v1328_v11, %v1334_v59 }
 0x22f   : > { %12210 = vst [vmem:[#allocation50_spill] sm:$0xff] %v10473_v9  ;;  %4540 = vmatmul.mubr.bf16.gmra.mrb[60].mxu0 %v10473_v9  ;;  %4992 = vmatmul.mubr.bf16.gmra.mrb[44].mxu1 %v10473_v9  ;;  %v8429_v54 = vpack.i.bf16 %v1323_v22, %v1317_v30  ;;  %v1530_v50 = vrot.slane %v1188_v52, 2  ;;  %v8434_v48 = vpack.i.bf16 %v1335_v27, %v1329_v40  ;;  %v12215_v62 = vrot.slane %v12214_v6, 2 }
 0x230   : > { %8425 = vrot.lane.b32.xlu0 %v8424_v1, %s9270_s4  ;;  %vm12216_vm15 = vcmask 1045504   ;;  %v12217_v1 = vrot.slane %v9793_v12, 2  ;;  %v12218_v8 = vmov %v12213_v2  ;;  %v12220_v30 = vrot.slane %v12164_v29, 2 }
 0x231   : > { %v1540_v21 = vsel %vm12216_vm15, %v12215_v62, %v12213_v2  ;;  %vm12219_vm7 = vmmov %vm12216_vm15  ;;  %v12223_v52 = vmov %v12215_v62  ;;  %v12225_v27 = vrot.slane %v9851_v47, 2  ;;  %v12228_v62 = vrot.slane %v12184_v63, 2 }
 0x232   : > { %v1546_v43 = vsel %vm12219_vm7, %v12218_v8, %v12217_v1  ;;  %v12221_v35 = vmov %v12217_v1  ;;  %vm12222_vm3 = vmmov %vm12219_vm7  ;;  %8430 = vrot.lane.b32.xlu1 %v8429_v54, %s9270_s4  ;;  %v12226_v2 = vmov %v12220_v30  ;;  %v12231_v6 = vrot.slane %v12192_v7, 2 }
 0x233   : > { %v1552_v11 = vsel %vm12222_vm3, %v12221_v35, %v12220_v30  ;;  %vm12224_vm8 = vmmov %vm12222_vm3  ;;  %v1710_v40 = vpack.c.bf16 %v1546_v43, %v1540_v21  ;;  %v12229_v1 = vmov %v12225_v27  ;;  %v12232_v21 = vmov %v12228_v62 }
 0x234   : > { %v1534_v22 = vsel %vm12224_vm8, %v1530_v50, %v12223_v52  ;;  %vm12227_vm15 = vmmov %vm12222_vm3  ;;  %8435 = vrot.lane.b32.xlu0 %v8434_v48, %s9270_s4  ;;  %v1570_v43 = vsel %vm12222_vm3, %v12232_v21, %v12231_v6  ;;  %v12233_v29 = vrot.slane %v12194_v0, 2  ;;  %v12234_v30 = vmov %v12231_v6 }
 0x235   : > { %v1558_v61 = vsel %vm12227_vm15, %v12226_v2, %v12225_v27  ;;  %vm12230_vm7 = vmmov %vm12222_vm3  ;;  %v1702_v54 = vpack.c.bf16 %v1534_v22, %v1530_v50  ;;  %v2251_v52 = vshrl.u32 %v1710_v40, 16  ;;  %v2254_v47 = vshll.u32 %v1710_v40, 16 }
 0x236   : > { %v1564_v12 = vsel %vm12230_vm7, %v12229_v1, %v12228_v62  ;;  %v1718_v8 = vpack.c.bf16 %v1558_v61, %v1552_v11  ;;  %vm12235_vm8 = vmmov %vm12222_vm3  ;;  %v12236_v2 = vrot.slane %v9982_v57, 2  ;;  %v12237_v50 = vmov %v12233_v29  ;;  %1436 = vrot.lane.b32.xlu1 %v1334_v59, %s9270_s4 }
 0x237   : > { %v1576_v35 = vsel %vm12235_vm8, %v12234_v30, %v12233_v29  ;;  %v1726_v27 = vpack.c.bf16 %v1570_v43, %v1564_v12  ;;  %vm12238_vm15 = vmmov %vm12222_vm3  ;;  %v2243_v11 = vshrl.u32 %v1702_v54, 16  ;;  %v2246_v22 = vshll.u32 %v1702_v54, 16 }
 0x238   : > { %v1582_v48 = vsel %vm12238_vm15, %v12237_v50, %v12236_v2  ;;  %v2339_v63 = vshrl.u32 %v1718_v8, 16  ;;  %v2342_v61 = vshll.u32 %v1718_v8, 16  ;;  %v2253_v62 = vrot.slane %v2251_v52, 3  ;;  %vm12241_vm7 = vmmov %vm12222_vm3 }
 0x239   : > { %v2256_v1 = vrot.slane %v2254_v47, 4  ;;  %v1734_v7 = vpack.c.bf16 %v1582_v48, %v1576_v35  ;;  %v12239_v6 = vrot.slane %v10048_v36, 2  ;;  %v12240_v40 = vmov %v12236_v2 }
 0x23a   : > { %v2245_v21 = vrot.slane %v2243_v11, 3  ;;  %v2248_v43 = vrot.slane %v2246_v22, 4  ;;  %v2341_v0 = vrot.slane %v2339_v63, 3  ;;  %v2344_v29 = vrot.slane %v2342_v61, 4 }
 0x23b   : > { %v1588_v12 = vsel %vm12241_vm7, %v12240_v40, %v12239_v6  ;;  %v2257_v30 = vor.u32 %v2256_v1, %v2253_v62  ;;  %v2411_v2 = vshrl.u32 %v1726_v27, 16  ;;  %v2414_v54 = vshll.u32 %v1726_v27, 16  ;;  %vm12248_vm7 = vmmov %vm12222_vm3 }
 0x23c   : > { %v2483_v50 = vshrl.u32 %v1734_v7, 16  ;;  %v2249_v8 = vor.u32 %v2248_v43, %v2245_v21  ;;  %v2345_v41 = vor.u32 %v2344_v29, %v2341_v0  ;;  %v2486_v59 = vshll.u32 %v1734_v7, 16 }
 0x23d   : > { %v12242_v52 = vrot.slane %v10058_v17, 2  ;;  %v12243_v35 = vmov %v12239_v6  ;;  %v2413_v57 = vrot.slane %v2411_v2, 3  ;;  %v2416_v48 = vrot.slane %v2414_v54, 4 }
 0x23e   : > { %v2485_v6 = vrot.slane %v2483_v50, 3  ;;  %vm12244_vm8 = vsmask.f32 4352  ;;  %v2488_v27 = vrot.slane %v2486_v59, 4  ;;  %v12246_v61 = vrot.slane %v10117_v55, 2 }
 0x23f   : > { %v1594_v47 = vsel %vm12222_vm3, %v12243_v35, %v12242_v52  ;;  %v10538_v22 = vsel %vm12244_vm8, %v2249_v8, %v2257_v30  ;;  %vm12245_vm15 = vmmov %vm12244_vm8  ;;  %v12247_v62 = vmov %v12242_v52  ;;  %v2417_v36 = vor.u32 %v2416_v48, %v2413_v57  ;;  %v1136_v59 = vld [vmem:[#allocation2 + $0x10] sm:$0x80]  ;;  %v10563_v52 = vpop.permute.xlu0 %8315 }
 0x240   : > { %v1742_v11 = vpack.c.bf16 %v1594_v47, %v1588_v12  ;;  %v10541_v63 = vsel %vm12245_vm15, %v2257_v30, %v2345_v41  ;;  %v1600_v1 = vsel %vm12248_vm7, %v12247_v62, %v12246_v61  ;;  %v12249_v21 = vrot.slane %v10132_v53, 2  ;;  %vm12253_vm8 = vmmov %vm12222_vm3  ;;  %v1191_v47 = vld [vmem:[#allocation2 + $0x198] sm:$0x1] }
 0x241   : > { %v12250_v12 = vmov %v12246_v61  ;;  %v2489_v0 = vor.u32 %v2488_v27, %v2485_v6  ;;  %v12251_v30 = vrot.slane %v10159_v26, 2  ;;  %v12254_v17 = vrot.slane %v10190_v10, 2  ;;  %vm12256_vm15 = vmmov %vm12222_vm3 }
 0x242   : > { %v2555_v7 = vshrl.u32 %v1742_v11, 16  ;;  %v2558_v40 = vshll.u32 %v1742_v11, 16  ;;  %v1606_v43 = vsel %vm12222_vm3, %v12250_v12, %v12249_v21  ;;  %v12252_v2 = vmov %v12249_v21 }
 0x243   : > { %v1750_v29 = vpack.c.bf16 %v1606_v43, %v1600_v1  ;;  %v1612_v54 = vsel %vm12253_vm8, %v12252_v2, %v12251_v30  ;;  %v12255_v50 = vmov %v12251_v30  ;;  %vm12257_vm7 = vsmask.f32 4352  ;;  %vm12262_vm8 = vmmov %vm12222_vm3  ;;  %v1190_v30 = vld [vmem:[#allocation2 + $0x28] sm:$0xfe]  ;;  %v10592_v46 = vpop.permute.xlu0 %8320 }
 0x244   : > { %v1618_v8 = vsel %vm12256_vm15, %v12255_v50, %v12254_v17  ;;  %v10566_v55 = vsel %vm12257_vm7, %v2345_v41, %v2417_v36  ;;  %v12258_v57 = vrot.slane %v10383_v45, 2  ;;  %v12259_v53 = vrot.slane %v10377_v14, 2  ;;  %vm12263_vm15 = vmmov %vm12257_vm7 }
 0x245   : > { %v1758_v35 = vpack.c.bf16 %v1618_v8, %v1612_v54  ;;  %v12260_v6 = vrot.slane %v10387_v34, 2  ;;  %v11991_v27 = vunpack.i.h.bf16 %v10563_v52  ;;  %v8317_v61 = vunpack.i.l.bf16 %v10563_v52  ;;  %v10587_v8 = vld [vmem:[#allocation2 + $0x20] sm:$0xfe] }
 0x246   : > { %v1544_v48 = vsel %vm12222_vm3, %v12259_v53, %v12258_v57  ;;  %v12261_v26 = vmov %v12258_v57  ;;  %v10581_v41 = vsel %vm12263_vm15, %v2417_v36, %v2489_v0  ;;  %v2557_v62 = vrot.slane %v2555_v7, 3 }
 0x247   : > { %v1550_v11 = vsel %vm12262_vm8, %v12261_v26, %v12260_v6  ;;  %v2560_v1 = vrot.slane %v2558_v40, 4  ;;  %v2627_v21 = vshrl.u32 %v1750_v29, 16  ;;  %v2630_v12 = vshll.u32 %v1750_v29, 16 }
 0x248   : > { %v2699_v43 = vshrl.u32 %v1758_v35, 16  ;;  %vm12264_vm7 = vcmask 523264   ;;  %v2702_v17 = vshll.u32 %v1758_v35, 16  ;;  %v1623_v50 = vrot.slane %v1191_v47, 2 }
 0x249   : > { %v1438_v2 = vsel %vm12264_vm7, %v8317_v61, %v11991_v27  ;;  %vm12265_vm3 = vmmov %vm12264_vm7  ;;  %v2561_v57 = vor.u32 %v2560_v1, %v2557_v62  ;;  %v2629_v53 = vrot.slane %v2627_v21, 3  ;;  %v2632_v36 = vrot.slane %v2630_v12, 4 }
 0x24a   : > { %v1680_v54 = vsel %vm12265_vm3, %v1136_v59, %v8317_v61  ;;  %v2701_v6 = vrot.slane %v2699_v43, 3  ;;  %v2704_v7 = vrot.slane %v2702_v17, 4  ;;  %v12266_v40 = vrot.slane %v10190_v10, 2  ;;  %vm12268_vm7 = vmmov %vm12262_vm8  ;;  %v10611_v17 = vpop.permute.xlu1 %8325 }
 0x24b   : > { %v1532_v26 = vrot.slane %v1190_v30, 2  ;;  %v1712_v13 = vpack.c.bf16 %v1550_v11, %v1544_v48  ;;  %v10595_v27 = vsel %vm12263_vm15, %v2489_v0, %v2561_v57  ;;  %v2633_v59 = vor.u32 %v2632_v36, %v2629_v53  ;;  %vm12269_vm3 = vmmov %vm12263_vm15 }
 0x24c   : > { %v1624_v29 = vsel %vm12262_vm8, %v12266_v40, %v1623_v50  ;;  %v1531_v47 = vrot.slane %v10587_v8, 2  ;;  %v11993_v61 = vunpack.i.h.bf16 %v10592_v46  ;;  %v8322_v62 = vunpack.i.l.bf16 %v10592_v46  ;;  %vm12272_vm0 = vmmov %vm12269_vm3 }
 0x24d   : > { %v1766_v35 = vpack.c.bf16 %v1624_v29, %v1624_v29  ;;  %v2705_v1 = vor.u32 %v2704_v7, %v2701_v6  ;;  %v12267_v10 = vrot.slane %v10377_v14, 2  ;;  %v10604_v48 = vsel %vm12269_vm3, %v2561_v57, %v2633_v59 }
 0x24e   : > { %vm12270_vm8 = vcmask 523264   ;;  %v2285_v8 = vshrl.u32 %v1712_v13, 16  ;;  %v11994_v57 = vunpack.i.h.bf16 %v10611_v17  ;;  %v8327_v6 = vunpack.i.l.bf16 %v10611_v17 }
 0x24f   : > { %v1538_v21 = vsel %vm12268_vm7, %v1532_v26, %v12267_v10  ;;  %v2771_v11 = vshrl.u32 %v1766_v35, 16  ;;  %v2774_v12 = vshll.u32 %v1766_v35, 16  ;;  %v1440_v43 = vsel %vm12270_vm8, %v8322_v62, %v11993_v61  ;;  %vm12271_vm15 = vmmov %vm12270_vm8 }
 0x250   : > { %v1704_v0 = vpack.c.bf16 %v1538_v21, %v1532_v26  ;;  %v1681_v30 = vsel %vm12271_vm15, %v10357_v51, %v8322_v62  ;;  %v10614_v50 = vsel %vm12272_vm0, %v2633_v59, %v2705_v1  ;;  %v1700_v36 = vpack.c.bf16 %v1440_v43, %v1438_v2  ;;  %vm12273_vm7 = vmmov %vm12270_vm8  ;;  %v10623_v62 = vpop.permute.xlu1 %8330 }
 0x251   : > { %v1699_v53 = vpack.c.bf16 %v1681_v30, %v1680_v54  ;;  %v2773_v7 = vrot.slane %v2771_v11, 3  ;;  %v2776_v40 = vrot.slane %v2774_v12, 4  ;;  %v1442_v51 = vsel %vm12273_vm7, %v8327_v6, %v11994_v57  ;;  %vm12274_vm0 = vmmov %vm12273_vm7 }
 0x252   : > { %v2277_v29 = vshrl.u32 %v1704_v0, 16  ;;  %v2280_v26 = vshll.u32 %v1704_v0, 16  ;;  %v1682_v59 = vsel %vm12274_vm0, %v10377_v14, %v8327_v6  ;;  %v2209_v2 = vshrl.u32 %v1700_v36, 16  ;;  %vm12277_vm15 = vmmov %vm12274_vm0 }
 0x253   : > { %v2192_v35 = vshrl.u32 %v1699_v53, 16  ;;  %v2195_v10 = vshll.u32 %v1699_v53, 16  ;;  %v2212_v54 = vshll.u32 %v1700_v36, 16  ;;  %v2777_v21 = vor.u32 %v2776_v40, %v2773_v7  ;;  %vm12278_vm7 = vmmov %vm12274_vm0 }
 0x254   : > { %v2279_v43 = vrot.slane %v2277_v29, 3  ;;  %v11995_v12 = vunpack.i.h.bf16 %v10623_v62  ;;  %v8332_v0 = vunpack.i.l.bf16 %v10623_v62  ;;  %v2211_v53 = vrot.slane %v2209_v2, 3 }
 0x255   : > { %v2194_v30 = vrot.slane %v2192_v35, 3  ;;  %v2197_v11 = vrot.slane %v2195_v10, 4  ;;  %v2214_v61 = vrot.slane %v2212_v54, 4  ;;  %v10628_v56 = vsel %vm12269_vm3, %v2705_v1, %v2777_v21 }
 0x256   : > { %v12275_v57 = vrot.slane %v9752_v25, 2  ;;  %vm12276_vm8 = vcmask 1045504   ;;  %v1444_v36 = vsel %vm12277_vm15, %v8332_v0, %v11995_v12  ;;  %v1683_v6 = vsel %vm12278_vm7, %v10383_v45, %v8332_v0  ;;  %v10648_v25 = vpop.permute.xlu0 %8335  ;;  %vm12286_vm15 = vmmov %vm12278_vm7 }
 0x257   : > { %v2198_v7 = vor.u32 %v2197_v11, %v2194_v30  ;;  %v12279_v40 = vrot.slane %v9785_v3, 2  ;;  %vm12281_vm0 = vmmov %vm12276_vm8  ;;  %v1707_v1 = vpack.c.bf16 %v1683_v6, %v1682_v59  ;;  %v1708_v10 = vpack.c.bf16 %v1444_v36, %v1442_v51 }
 0x258   : > { %v1536_v14 = vsel %vm12276_vm8, %v1531_v47, %v12275_v57  ;;  %v12280_v29 = vmov %v12275_v57  ;;  %v2215_v2 = vor.u32 %v2214_v61, %v2211_v53  ;;  %v12282_v54 = vrot.slane %v12163_v18, 2  ;;  %vm12284_vm3 = vmmov %vm12281_vm0 }
 0x259   : > { %v1542_v35 = vsel %vm12281_vm0, %v12280_v29, %v12279_v40  ;;  %v12283_v57 = vmov %v12279_v40  ;;  %v2282_v12 = vrot.slane %v2280_v26, 4  ;;  %v2287_v9 = vrot.slane %v2285_v8, 3  ;;  %vm12285_vm8 = vmmov %vm12278_vm7 }
 0x25a   : > { %v1548_v21 = vsel %vm12284_vm3, %v12283_v57, %v12282_v54  ;;  %v2288_v44 = vshll.u32 %v1712_v13, 16  ;;  %v1703_v45 = vpack.c.bf16 %v1536_v14, %v1531_v47  ;;  %v2200_v30 = vshrl.u32 %v1707_v1, 16  ;;  %vm12289_vm7 = vmmov %vm12281_vm0  ;;  %v8711_v54 = vld [vmem:[#allocation9 + $0x500] ss:$20 sps:$4 sm:$0xff]   ;;  %v10710_v49 = vpop.permute.xlu0 %8345 }
 0x25b   : > { %v2203_v11 = vshll.u32 %v1707_v1, 16  ;;  %v2217_v0 = vshrl.u32 %v1708_v10, 16  ;;  %v2220_v38 = vshll.u32 %v1708_v10, 16  ;;  %v2283_v40 = vor.u32 %v2282_v12, %v2279_v43  ;;  %v10659_v43 = vpop.permute.xlu1 %8340 }
 0x25c   : > { %v2290_v59 = vrot.slane %v2288_v44, 4  ;;  %v1711_v51 = vpack.c.bf16 %v1548_v21, %v1542_v35  ;;  %v2260_v61 = vshrl.u32 %v1703_v45, 16  ;;  %v2202_v53 = vrot.slane %v2200_v30, 3  ;;  %v8714_v30 = vld [vmem:[#allocation9 + $0x508] ss:$20 sps:$4 sm:$0xff]  }
 0x25d   : > { %v2205_v36 = vrot.slane %v2203_v11, 4  ;;  %v12000_v3 = vunpack.i.h.bf16 %v10648_v25  ;;  %v8337_v6 = vunpack.i.l.bf16 %v10648_v25  ;;  %v2219_v26 = vrot.slane %v2217_v0, 3 }
 0x25e   : > { %v2222_v8 = vrot.slane %v2220_v38, 4  ;;  %v10652_v13 = vor.u32 %v2290_v59, %v2287_v9  ;;  %v2262_v47 = vrot.slane %v2260_v61, 3  ;;  %v12287_v29 = vrot.slane %v10393_v42, 2 }
 0x25f   : > { %v1446_v14 = vsel %vm12285_vm8, %v8337_v6, %v12000_v3  ;;  %v1684_v44 = vsel %vm12286_vm15, %v10387_v34, %v8337_v6  ;;  %v10661_v12 = vor.u32 %v2205_v36, %v2202_v53  ;;  %v12288_v35 = vrot.slane %v10387_v34, 2  ;;  %vm12293_vm15 = vmmov %vm12285_vm8  ;;  %v8722_v36 = vld [vmem:[#allocation9 + $0x534] ss:$20 sps:$4 sm:$0xff]  }
 0x260   : > { %v11999_v9 = vunpack.i.h.bf16 %v10659_v43  ;;  %v8342_v1 = vunpack.i.l.bf16 %v10659_v43  ;;  %v10670_v10 = vor.u32 %v2222_v8, %v2219_v26  ;;  %vm12290_vm0 = vsmask.f32 4352 }
 0x261   : > { %v1556_v38 = vsel %vm12289_vm7, %v12288_v35, %v12287_v29  ;;  %v10674_v57 = vsel %vm12290_vm0, %v2283_v40, %v10652_v13  ;;  %vm12291_vm3 = vmmov %vm12290_vm0  ;;  %v2263_v11 = vshll.u32 %v1703_v45, 16  ;;  %v2268_v34 = vshrl.u32 %v1711_v51, 16  ;;  %v8719_v40 = vld [vmem:[#allocation9 + $0x52c] ss:$20 sps:$4 sm:$0xff]  }
 0x262   : > { %v10678_v21 = vsel %vm12291_vm3, %v2198_v7, %v10661_v12  ;;  %v2271_v0 = vshll.u32 %v1711_v51, 16  ;;  %v1448_v59 = vsel %vm12285_vm8, %v8342_v1, %v11999_v9  ;;  %v1685_v61 = vsel %vm12293_vm15, %v10393_v42, %v8342_v1  ;;  %vm12294_vm7 = vmmov %vm12290_vm0 }
 0x263   : > { %12292 = vst [vmem:[#allocation52_spill] sm:$0xff] %v10678_v21  ;;  %v10687_v53 = vsel %vm12294_vm7, %v2215_v2, %v10670_v10  ;;  %v12296_v7 = vrot.slane %v10397_v58, 2  ;;  %v12297_v6 = vmov %v12287_v29  ;;  %vm12298_vm0 = vcmask 1045504   ;;  %v8717_v2 = vld [vmem:[#allocation9 + $0x528] ss:$20 sps:$4 sm:$0xff]   ;;  %vm12305_vm15 = vmmov %vm12294_vm7 }
 0x264   : > { %12295 = vst [vmem:[#allocation53_spill] sm:$0xff] %v10687_v53  ;;  %v1715_v51 = vpack.c.bf16 %v1685_v61, %v1684_v44  ;;  %v1716_v26 = vpack.c.bf16 %v1448_v59, %v1446_v14  ;;  %4582 = vmatprep.mubr.bf16.mxu0 %v10687_v53  ;;  %5034 = vmatprep.mubr.bf16.mxu1 %v10687_v53  ;;  %v2265_v8 = vrot.slane %v2263_v11, 4  ;;  %v2270_v29 = vrot.slane %v2268_v34, 3  ;;  %vm12301_vm3 = vmmov %vm12298_vm0  ;;  %v8720_v34 = vld [vmem:[#allocation9 + $0x530] ss:$20 sps:$4 sm:$0xff]  }
 0x265   : > { %v1562_v45 = vsel %vm12298_vm0, %v12297_v6, %v12296_v7  ;;  %4583 = vmatmul.mubr.bf16.vlgmr.msra.gmra.mrb[32].mxu0 %v10678_v21  ;;  %5035 = vmatmul.mubr.bf16.vlgmr.msra.gmra.mrb[16].mxu1 %v10678_v21  ;;  %v2273_v35 = vrot.slane %v2271_v0, 4  ;;  %v12299_v9 = vrot.slane %v12168_v60, 2  ;;  %v12300_v42 = vrot.slane %v12163_v18, 2  ;;  %vm12304_vm8 = vmmov %vm12298_vm0 }
 0x266   : > { %v1720_v1 = vpack.c.bf16 %v1562_v45, %v1556_v38  ;;  %v12302_v14 = vrot.slane %v12183_v5, 2  ;;  %4664 = vmatpush1.bf16.msra.mxu0 %v8711_v54  ;;  %5116 = vmatpush1.bf16.msra.mxu1 %v8714_v30  ;;  %v2321_v61 = vshrl.u32 %v1716_v26, 16  ;;  %v2324_v7 = vshll.u32 %v1716_v26, 16  ;;  %v8725_v38 = vld [vmem:[#allocation9 + $0x554] ss:$20 sps:$4 sm:$0xff]   ;;  %vm12308_vm7 = vmmov %vm12298_vm0 }
 0x267   : > { %v1554_v44 = vsel %vm12301_vm3, %v12300_v42, %v12299_v9  ;;  %v12303_v59 = vmov %v12299_v9  ;;  %v2312_v6 = vshrl.u32 %v1715_v51, 16  ;;  %v2315_v0 = vshll.u32 %v1715_v51, 16  ;;  %4665 = vmatprep.subr.bf16.mxu0 %v8719_v40  ;;  %5117 = vmatprep.subr.bf16.mxu1 %v8722_v36  ;;  %v8728_v45 = vld [vmem:[#allocation9 + $0x55c] ss:$20 sps:$4 sm:$0xff]   ;;  %v8732_v51 = vld [vmem:[#allocation9 + $0x580] ss:$20 sps:$4 sm:$0xff]   ;;  %v10783_v31 = vpop.permute.xlu0 %8355 }
 0x268   : > { %v1560_v11 = vsel %vm12304_vm8, %v12303_v59, %v12302_v14  ;;  %v2266_v18 = vor.u32 %v2265_v8, %v2262_v47  ;;  %v10708_v3 = vor.u32 %v2273_v35, %v2270_v29  ;;  %v2357_v9 = vshrl.u32 %v1720_v1, 16  ;;  %v10718_v47 = vld [vmem:[#allocation2 + $0xc8] sm:$0xff]  ;;  %vm12311_vm8 = vmmov %vm12305_vm15 }
 0x269   : > { %v2360_v42 = vshll.u32 %v1720_v1, 16  ;;  %v2323_v60 = vrot.slane %v2321_v61, 3  ;;  %v2326_v14 = vrot.slane %v2324_v7, 4  ;;  %v2314_v54 = vrot.slane %v2312_v6, 3  ;;  %v8723_v7 = vld [vmem:[#allocation9 + $0x550] ss:$20 sps:$4 sm:$0xff]  }
 0x26a   : > { %v2317_v30 = vrot.slane %v2315_v0, 4  ;;  %v12002_v59 = vunpack.i.h.bf16 %v10710_v49  ;;  %v8347_v26 = vunpack.i.l.bf16 %v10710_v49  ;;  %v10716_v40 = vsel %vm12305_vm15, %v2266_v18, %v10708_v3  ;;  %4666 = vmatpush1.bf16.msra.mxu0 %v8717_v2  ;;  %5118 = vmatpush1.bf16.msra.mxu1 %v8720_v34  ;;  %v8726_v2 = vld [vmem:[#allocation9 + $0x558] ss:$20 sps:$4 sm:$0xff]   ;;  %vm12313_vm15 = vmmov %vm12311_vm8 }
 0x26b   : > { %v1719_v36 = vpack.c.bf16 %v1560_v11, %v1554_v44  ;;  %v10721_v8 = vor.u32 %v2326_v14, %v2323_v60  ;;  %v12306_v35 = vrot.slane %v10402_v20, 2  ;;  %v12307_v1 = vrot.slane %v10397_v58, 2  ;;  %v10733_v11 = vpop.permute.xlu1 %8350  ;;  %4667 = vmatprep.subr.bf16.mxu0 %v8725_v38  ;;  %5119 = vmatprep.subr.bf16.mxu1 %v8728_v45 }
 0x26c   : > { %v10723_v29 = vor.u32 %v2317_v30, %v2314_v54  ;;  %vm12309_vm0 = vcmask 523264   ;;  %v2359_v6 = vrot.slane %v2357_v9, 3  ;;  %v2362_v34 = vrot.slane %v2360_v42, 4  ;;  %v8731_v54 = vld [vmem:[#allocation9 + $0x57c] ss:$20 sps:$4 sm:$0xff]  }
 0x26d   : > { %v1568_v61 = vsel %vm12308_vm7, %v12307_v1, %v12306_v35  ;;  %v1450_v44 = vsel %vm12309_vm0, %v8347_v26, %v12002_v59  ;;  %vm12310_vm3 = vmmov %vm12309_vm0  ;;  %v12003_v18 = vunpack.i.h.bf16 %v10733_v11  ;;  %v8352_v60 = vunpack.i.l.bf16 %v10733_v11  ;;  %v8734_v30 = vld [vmem:[#allocation9 + $0x584] ss:$20 sps:$4 sm:$0xff]  }
 0x26e   : > { %v1686_v0 = vsel %vm12310_vm3, %v10397_v58, %v8347_v26  ;;  %v10742_v14 = vsel %vm12311_vm8, %v10670_v10, %v10721_v8  ;;  %v10749_v38 = vsel %vm12313_vm15, %v10661_v12, %v10723_v29  ;;  %v10751_v58 = vor.u32 %v2362_v34, %v2359_v6  ;;  %vm12317_vm3 = vmmov %vm12309_vm0  ;;  %4668 = vmatpush1.bf16.msra.mxu0 %v8723_v7  ;;  %v8729_v59 = vld [vmem:[#allocation9 + $0x578] ss:$20 sps:$4 sm:$0xff]  }
 0x26f   : > { %12312 = vst [vmem:[#allocation34_spill] sm:$0xff] %v10742_v14  ;;  %4592 = vmatprep.mubr.bf16.mxu0 %v10742_v14  ;;  %5044 = vmatprep.mubr.bf16.mxu1 %v10742_v14  ;;  %12314 = vst [vmem:[#allocation38_spill] sm:$0xff] %v10749_v38  ;;  %v2348_v45 = vshrl.u32 %v1719_v36, 16  ;;  %v12315_v9 = vrot.slane %v10412_v23, 2  ;;  %v12316_v42 = vmov %v12306_v35  ;;  %v1452_v26 = vsel %vm12309_vm0, %v8352_v60, %v12003_v18  ;;  %v10902_v14 = vld [vmem:[#allocation2 + $0x188] sm:$0xff] }
 0x270   : > { %v1687_v35 = vsel %vm12317_vm3, %v10402_v20, %v8352_v60  ;;  %4593 = vmatmul.mubr.bf16.gmra.mrb[36].mxu0 %v10749_v38  ;;  %5045 = vmatmul.mubr.bf16.gmra.mrb[20].mxu1 %v10749_v38  ;;  %v2351_v12 = vshll.u32 %v1719_v36, 16  ;;  %v1724_v34 = vpack.c.bf16 %v1452_v26, %v1450_v44  ;;  %v8737_v60 = vld [vmem:[#allocation9 + $0x5a4] ss:$20 sps:$4 sm:$0xff]   ;;  %v8740_v36 = vld [vmem:[#allocation9 + $0x5ac] ss:$20 sps:$4 sm:$0xff]   ;;  %v12318_v44 = vrot.slane %v12191_v19, 2  ;;  %vm12320_vm15 = vmmov %vm12308_vm7 }
 0x271   : > { %v1574_v10 = vsel %vm12308_vm7, %v12316_v42, %v12315_v9  ;;  %v1723_v6 = vpack.c.bf16 %v1687_v35, %v1686_v0  ;;  %5120 = vmatpush1.bf16.msra.mxu1 %v8726_v2  ;;  %v10768_v9 = vsel %vm12311_vm8, %v10652_v13, %v10751_v58  ;;  %v10770_v42 = vld [vmem:[#allocation2 + $0xe0] sm:$0xff]  ;;  %4669 = vmatprep.subr.bf16.mxu0 %v8731_v54  ;;  %v12319_v7 = vrot.slane %v12183_v5, 2  ;;  %vm12323_vm3 = vmmov %vm12311_vm8 }
 0x272   : > { %v1728_v1 = vpack.c.bf16 %v1574_v10, %v1568_v61  ;;  %5121 = vmatprep.subr.bf16.mxu1 %v8734_v30  ;;  %v2350_v61 = vrot.slane %v2348_v45, 3  ;;  %v12321_v0 = vrot.slane %v10718_v47, 2  ;;  %v12322_v13 = vmov %v12318_v44  ;;  %v8735_v30 = vld [vmem:[#allocation9 + $0x5a0] ss:$20 sps:$4 sm:$0xff]   ;;  %4670 = vmatpush1.bf16.msra.mxu0 %v8729_v59  ;;  %v8738_v19 = vld [vmem:[#allocation9 + $0x5a8] ss:$20 sps:$4 sm:$0xff]   ;;  %vm12324_vm8 = vmmov %vm12309_vm0 }
 0x273   : > { %v1566_v2 = vsel %vm12320_vm15, %v12319_v7, %v12318_v44  ;;  %v2393_v26 = vshrl.u32 %v1724_v34, 16  ;;  %v2396_v35 = vshll.u32 %v1724_v34, 16  ;;  %v2384_v18 = vshrl.u32 %v1723_v6, 16  ;;  %4671 = vmatprep.subr.bf16.mxu0 %v8737_v60  ;;  %v8743_v60 = vld [vmem:[#allocation9 + $0x5cc] ss:$20 sps:$4 sm:$0xff]   ;;  %vm12325_vm15 = vmmov %vm12323_vm3 }
 0x274   : > { %v1572_v10 = vsel %vm12308_vm7, %v12322_v13, %v12321_v0  ;;  %v2387_v54 = vshll.u32 %v1723_v6, 16  ;;  %v2353_v20 = vrot.slane %v2351_v12, 4  ;;  %v2429_v16 = vshrl.u32 %v1728_v1, 16  ;;  %vm12327_vm7 = vmmov %vm12323_vm3 }
 0x275   : > { %v2432_v45 = vshll.u32 %v1728_v1, 16  ;;  %v1727_v15 = vpack.c.bf16 %v1572_v10, %v1566_v2  ;;  %v2395_v5 = vrot.slane %v2393_v26, 3  ;;  %v2398_v44 = vrot.slane %v2396_v35, 4  ;;  %5122 = vmatpush1.bf16.msra.mxu1 %v8732_v51  ;;  %v10791_v10 = vld [vmem:[#allocation2 + $0xf8] sm:$0xff]  ;;  %v10797_v26 = vpop.permute.xlu1 %8360 }
 0x276   : > { %v2386_v7 = vrot.slane %v2384_v18, 3  ;;  %v2389_v37 = vrot.slane %v2387_v54, 4  ;;  %v12008_v0 = vunpack.i.h.bf16 %v10783_v31  ;;  %v8357_v34 = vunpack.i.l.bf16 %v10783_v31  ;;  %5123 = vmatprep.subr.bf16.mxu1 %v8740_v36  ;;  %v8746_v36 = vld [vmem:[#allocation9 + $0x5d4] ss:$20 sps:$4 sm:$0xff]   ;;  %4672 = vmatpush1.bf16.msra.mxu0 %v8735_v30 }
 0x277   : > { %v2354_v6 = vor.u32 %v2353_v20, %v2350_v61  ;;  %v2431_v12 = vrot.slane %v2429_v16, 3  ;;  %v10787_v13 = vor.u32 %v2398_v44, %v2395_v5  ;;  %v2434_v2 = vrot.slane %v2432_v45, 4  ;;  %v8741_v45 = vld [vmem:[#allocation9 + $0x5c8] ss:$20 sps:$4 sm:$0xff]   ;;  %v8744_v5 = vld [vmem:[#allocation9 + $0x5d0] ss:$20 sps:$4 sm:$0xff]   ;;  %4673 = vmatprep.subr.bf16.mxu0 %v8743_v60 }
 0x278   : > { %v10789_v1 = vor.u32 %v2389_v37, %v2386_v7  ;;  %v2420_v59 = vshrl.u32 %v1727_v15, 16  ;;  %v1454_v18 = vsel %vm12309_vm0, %v8357_v34, %v12008_v0  ;;  %v2423_v37 = vshll.u32 %v1727_v15, 16  ;;  %v8752_v44 = vld [vmem:[#allocation9 + $0x5fc] ss:$20 sps:$4 sm:$0xff]  }
 0x279   : > { %v10801_v16 = vsel %vm12323_vm3, %v10708_v3, %v2354_v6  ;;  %v1688_v20 = vsel %vm12324_vm8, %v10412_v23, %v8357_v34  ;;  %v12009_v61 = vunpack.i.h.bf16 %v10797_v26  ;;  %v8362_v35 = vunpack.i.l.bf16 %v10797_v26  ;;  %5124 = vmatpush1.bf16.msra.mxu1 %v8738_v19  ;;  %v8749_v3 = vld [vmem:[#allocation9 + $0x5f4] ss:$20 sps:$4 sm:$0xff]   ;;  %vm12333_vm3 = vmmov %vm12324_vm8 }
 0x27a   : > { %v10810_v54 = vsel %vm12325_vm15, %v10721_v8, %v10787_v13  ;;  %v10817_v15 = vsel %vm12327_vm7, %v10723_v29, %v10789_v1  ;;  %v10819_v7 = vor.u32 %v2434_v2, %v2431_v12  ;;  %v12330_v8 = vrot.slane %v10770_v42, 2  ;;  %vm12334_vm8 = vmmov %vm12333_vm3  ;;  %5125 = vmatprep.subr.bf16.mxu1 %v8746_v36  ;;  %4674 = vmatpush1.bf16.msra.mxu0 %v8741_v45 }
 0x27b   : > { %12326 = vst [vmem:[#allocation40_spill] sm:$0xff] %v10810_v54  ;;  %4602 = vmatprep.mubr.bf16.mxu0 %v10810_v54  ;;  %5054 = vmatprep.mubr.bf16.mxu1 %v10810_v54  ;;  %12328 = vst [vmem:[#allocation42_spill] sm:$0xff] %v10817_v15  ;;  %v12331_v30 = vrot.slane %v10718_v47, 2  ;;  %vm12332_vm0 = vcmask 1045504   ;;  %v1456_v34 = vsel %vm12333_vm3, %v8362_v35, %v12009_v61  ;;  %v1689_v0 = vsel %vm12334_vm8, %v10428_v4, %v8362_v35  ;;  %v8755_v4 = vld [vmem:[#allocation9 + $0x61c] ss:$20 sps:$4 sm:$0xff]  }
 0x27c   : > { %12329 = vst [vmem:[#allocation48_spill] sm:$0xff] %v10819_v7  ;;  %4603 = vmatmul.mubr.bf16.gmra.mrb[40].mxu0 %v10817_v15  ;;  %5055 = vmatmul.mubr.bf16.gmra.mrb[24].mxu1 %v10817_v15  ;;  %v2422_v29 = vrot.slane %v2420_v59, 3  ;;  %v2425_v12 = vrot.slane %v2423_v37, 4  ;;  %v1731_v2 = vpack.c.bf16 %v1689_v0, %v1688_v20  ;;  %v1732_v51 = vpack.c.bf16 %v1456_v34, %v1454_v18  ;;  %vm12335_vm15 = vmmov %vm12327_vm7  ;;  %v8994_v20 = vld [vmem:[#allocation2 + $0x110] sm:$0xff]  ;;  %v10849_v15 = vpop.permute.xlu0 %8365 }
 0x27d   : > { %v1578_v19 = vsel %vm12332_vm0, %v12331_v30, %v12330_v8  ;;  %v10836_v47 = vsel %vm12335_vm15, %v10751_v58, %v10819_v7  ;;  %5126 = vmatpush1.bf16.msra.mxu1 %v8744_v5  ;;  %v8747_v8 = vld [vmem:[#allocation9 + $0x5f0] ss:$20 sps:$4 sm:$0xff]   ;;  %v8750_v30 = vld [vmem:[#allocation9 + $0x5f8] ss:$20 sps:$4 sm:$0xff]   ;;  %v12336_v61 = vrot.slane %v10791_v10, 2  ;;  %v12337_v59 = vrot.slane %v10770_v42, 2  ;;  %vm12338_vm7 = vmmov %vm12332_vm0  ;;  %4675 = vmatprep.subr.bf16.mxu0 %v8749_v3 }
 0x27e   : > { %v10838_v35 = vor.u32 %v2425_v12, %v2422_v29  ;;  %v2465_v18 = vshrl.u32 %v1732_v51, 16  ;;  %v2468_v60 = vshll.u32 %v1732_v51, 16  ;;  %v2456_v36 = vshrl.u32 %v1731_v2, 16  ;;  %5127 = vmatprep.subr.bf16.mxu1 %v8752_v44  ;;  %v8758_v58 = vld [vmem:[#allocation9 + $0x624] ss:$20 sps:$4 sm:$0xff]   ;;  %vm12339_vm0 = vmmov %vm12335_vm15  ;;  %4676 = vmatpush1.bf16.msra.mxu0 %v8747_v8 }
 0x27f   : > { %v1584_v0 = vsel %vm12338_vm7, %v12337_v59, %v12336_v61  ;;  %v2459_v37 = vshll.u32 %v1731_v2, 16  ;;  %v1589_v45 = vrot.slane %v8994_v20, 2  ;;  %v8995_v3 = vld [vmem:[#allocation2 + $0x128] sm:$0xff]  ;;  %4677 = vmatprep.subr.bf16.mxu0 %v8755_v4  ;;  %vm12342_vm3 = vmmov %vm12338_vm7  ;;  %v12014_v8 = vunpack.i.h.bf16 %v10849_v15  ;;  %v8764_v4 = vld [vmem:[#allocation9 + $0x64c] ss:$20 sps:$4 sm:$0xff]  }
 0x280   : > { %v10847_v5 = vsel %vm12339_vm0, %v2354_v6, %v10838_v35  ;;  %v1735_v34 = vpack.c.bf16 %v1584_v0, %v1578_v19  ;;  %v2467_v29 = vrot.slane %v2465_v18, 3  ;;  %v2470_v12 = vrot.slane %v2468_v60, 4  ;;  %v8753_v6 = vld [vmem:[#allocation9 + $0x618] ss:$20 sps:$4 sm:$0xff]   ;;  %v8756_v19 = vld [vmem:[#allocation9 + $0x620] ss:$20 sps:$4 sm:$0xff]   ;;  %vm12343_vm8 = vmmov %vm12339_vm0 }
 0x281   : > { %12340 = vst [vmem:[#allocation26_spill] sm:$0xff] %v10847_v5  ;;  %v2458_v33 = vrot.slane %v2456_v36, 3  ;;  %v2461_v42 = vrot.slane %v2459_v37, 4  ;;  %5128 = vmatpush1.bf16.msra.mxu1 %v8750_v30  ;;  %v1595_v44 = vrot.slane %v8995_v3, 2  ;;  %v12341_v0 = vrot.slane %v10791_v10, 2  ;;  %v8996_v60 = vld [vmem:[#allocation2 + $0x140] sm:$0xff]  ;;  %vm12345_vm15 = vmmov %vm12339_vm0 }
 0x282   : > { %v2492_v51 = vshrl.u32 %v1735_v34, 16  ;;  %v2495_v61 = vshll.u32 %v1735_v34, 16  ;;  %v10851_v2 = vor.u32 %v2470_v12, %v2467_v29  ;;  %5129 = vmatprep.subr.bf16.mxu1 %v8758_v58  ;;  %v1601_v36 = vrot.slane %v8996_v60, 2  ;;  %v10872_v34 = vld [vmem:[#allocation2 + $0x158] sm:$0xff]  ;;  %v10875_v12 = vpop.permute.xlu1 %8370  ;;  %vm12347_vm7 = vmmov %vm12342_vm3  ;;  %4678 = vmatpush1.bf16.msra.mxu0 %v8753_v6  ;;  %v8767_v60 = vld [vmem:[#allocation9 + $0x66c] ss:$20 sps:$4 sm:$0xff]  }
 0x283   : > { %v10853_v59 = vor.u32 %v2461_v42, %v2458_v33  ;;  %v1590_v18 = vsel %vm12342_vm3, %v12341_v0, %v1589_v45  ;;  %v8367_v30 = vunpack.i.l.bf16 %v10849_v15  ;;  %v8761_v33 = vld [vmem:[#allocation9 + $0x644] ss:$20 sps:$4 sm:$0xff]   ;;  %v8372_v3 = vunpack.i.l.bf16 %v10875_v12  ;;  %v8770_v29 = vld [vmem:[#allocation9 + $0x674] ss:$20 sps:$4 sm:$0xff]  }
 0x284   : > { %v10863_v37 = vsel %vm12343_vm8, %v10787_v13, %v10851_v2  ;;  %v2494_v58 = vrot.slane %v2492_v51, 3  ;;  %v2497_v20 = vrot.slane %v2495_v61, 4  ;;  %v1596_v13 = vsel %vm12347_vm7, %v1589_v45, %v1595_v44  ;;  %v8762_v51 = vld [vmem:[#allocation9 + $0x648] ss:$20 sps:$4 sm:$0xff]   ;;  %4679 = vmatprep.subr.bf16.mxu0 %v8761_v33  ;;  %v10900_v38 = vpop.permute.xlu0 %8375 }
 0x285   : > { %12344 = vst [vmem:[#allocation62_spill] sm:$0xff] %v10863_v37  ;;  %4612 = vmatprep.mubr.bf16.mxu0 %v10863_v37  ;;  %5064 = vmatprep.mubr.bf16.mxu1 %v10863_v37  ;;  %v10870_v10 = vsel %vm12345_vm15, %v10789_v1, %v10853_v59  ;;  %v8759_v1 = vld [vmem:[#allocation9 + $0x640] ss:$20 sps:$4 sm:$0xff]   ;;  %vm12348_vm0 = vcmask 523264   ;;  %v1602_v45 = vsel %vm12342_vm3, %v1595_v44, %v1601_v36  ;;  %v12350_v6 = vunpack.i.h.bf16 %v10875_v12 }
 0x286   : > { %12346 = vst [vmem:[#allocation63_spill] sm:$0xff] %v10870_v10  ;;  %4613 = vmatmul.mubr.bf16.gmra.mrb[44].mxu0 %v10870_v10  ;;  %5065 = vmatmul.mubr.bf16.gmra.mrb[28].mxu1 %v10870_v10  ;;  %v2498_v61 = vor.u32 %v2497_v20, %v2494_v58  ;;  %v1458_v0 = vsel %vm12348_vm0, %v8367_v30, %v12014_v8  ;;  %vm12349_vm8 = vmmov %vm12348_vm0  ;;  %v8765_v8 = vld [vmem:[#allocation9 + $0x668] ss:$20 sps:$4 sm:$0xff]  }
 0x287   : > { %5130 = vmatpush1.bf16.msra.mxu1 %v8756_v19  ;;  %v1743_v10 = vpack.c.bf16 %v1596_v13, %v1590_v18  ;;  %v1690_v42 = vsel %vm12349_vm8, %v10430_v28, %v8367_v30  ;;  %vm12351_vm15 = vmmov %vm12348_vm0  ;;  %v12355_v18 = vrot.slane %v10872_v34, 2  ;;  %4680 = vmatpush1.bf16.msra.mxu0 %v8759_v1  ;;  %v8768_v28 = vld [vmem:[#allocation9 + $0x670] ss:$20 sps:$4 sm:$0xff]   ;;  %v8773_v30 = vld [vmem:[#allocation9 + $0x694] ss:$20 sps:$4 sm:$0xff]  }
 0x288   : > { %5131 = vmatprep.subr.bf16.mxu1 %v8764_v4  ;;  %v1460_v19 = vsel %vm12351_vm15, %v8372_v3, %v12350_v6  ;;  %vm12352_vm7 = vmmov %vm12348_vm0  ;;  %v10895_v20 = vsel %vm12353_vm14, %v10838_v35, %v2498_v61  ;;  %4681 = vmatprep.subr.bf16.mxu0 %v8767_v60  ;;  %v8776_v35 = vld [vmem:[#allocation9 + $0x69c] ss:$20 sps:$4 sm:$0xff]   ;;  %v8377_v60 = vunpack.i.l.bf16 %v10900_v38 }
 0x289   : > { %v1691_v58 = vsel %vm12352_vm7, %v10443_v24, %v8372_v3  ;;  %12354 = vst [vmem:[#allocation64_spill] sm:$0xff] %v10895_v20  ;;  %v1740_v4 = vpack.c.bf16 %v1460_v19, %v1458_v0  ;;  %vm12356_vm0 = vmmov %vm12342_vm3  ;;  %v2564_v13 = vshrl.u32 %v1743_v10, 16  ;;  %v2567_v6 = vshll.u32 %v1743_v10, 16 }
 0x28a   : > { %v1739_v33 = vpack.c.bf16 %v1691_v58, %v1690_v42  ;;  %v1608_v44 = vsel %vm12356_vm0, %v1601_v36, %v12355_v18  ;;  %v8998_v42 = vld [vmem:[#allocation2 + $0x170] sm:$0xff]  ;;  %v12020_v10 = vrot.slane %v10902_v14, 2  ;;  %vm12358_vm3 = vmmov %vm12353_vm14 }
 0x28b   : > { %5132 = vmatpush1.bf16.msra.mxu1 %v8762_v51  ;;  %v2537_v37 = vshrl.u32 %v1740_v4, 16  ;;  %v2540_v54 = vshll.u32 %v1740_v4, 16  ;;  %v1613_v0 = vrot.slane %v8998_v42, 2  ;;  %v2566_v19 = vrot.slane %v2564_v13, 3  ;;  %4682 = vmatpush1.bf16.msra.mxu0 %v8765_v8  ;;  %v8782_v42 = vld [vmem:[#allocation9 + $0x6c4] ss:$20 sps:$4 sm:$0xff]   ;;  %vm12361_vm8 = vmmov %vm12356_vm0 }
 0x28c   : > { %v2528_v24 = vshrl.u32 %v1739_v33, 16  ;;  %v2531_v3 = vshll.u32 %v1739_v33, 16  ;;  %5133 = vmatprep.subr.bf16.mxu1 %v8770_v29  ;;  %v2569_v58 = vrot.slane %v2567_v6, 4  ;;  %v12019_v4 = vunpack.i.h.bf16 %v10900_v38  ;;  %4683 = vmatprep.subr.bf16.mxu0 %v8773_v30  ;;  %v8774_v6 = vld [vmem:[#allocation9 + $0x698] ss:$20 sps:$4 sm:$0xff]   ;;  %vm12362_vm15 = vmmov %vm12358_vm3 }
 0x28d   : > { %v2539_v36 = vrot.slane %v2537_v37, 3  ;;  %v2542_v1 = vrot.slane %v2540_v54, 4  ;;  %v1751_v54 = vpack.c.bf16 %v1608_v44, %v1602_v45  ;;  %v8771_v37 = vld [vmem:[#allocation9 + $0x690] ss:$20 sps:$4 sm:$0xff]  }
 0x28e   : > { %v2530_v51 = vrot.slane %v2528_v24, 3  ;;  %v2533_v18 = vrot.slane %v2531_v3, 4  ;;  %v2570_v29 = vor.u32 %v2569_v58, %v2566_v19  ;;  %v10914_v3 = vpop.permute.xlu1 %8380  ;;  %v12360_v19 = vrot.slane %v10872_v34, 2 }
 0x28f   : > { %5134 = vmatpush1.bf16.msra.mxu1 %v8768_v28  ;;  %v10907_v33 = vor.u32 %v2542_v1, %v2539_v36  ;;  %v8779_v28 = vld [vmem:[#allocation9 + $0x6bc] ss:$20 sps:$4 sm:$0xff]   ;;  %v12024_v45 = vunpack.i.h.bf16 %v10914_v3  ;;  %v8382_v44 = vunpack.i.l.bf16 %v10914_v3  ;;  %v1462_v34 = vsel %vm12352_vm7, %v8377_v60, %v12019_v4  ;;  %4684 = vmatpush1.bf16.msra.mxu0 %v8771_v37 }
 0x290   : > { %v10909_v13 = vor.u32 %v2533_v18, %v2530_v51  ;;  %5135 = vmatprep.subr.bf16.mxu1 %v8776_v35  ;;  %v10912_v24 = vsel %vm12353_vm14, %v2498_v61, %v2570_v29  ;;  %v1614_v30 = vsel %vm12361_vm8, %v12360_v19, %v1613_v0  ;;  %v2639_v35 = vshll.u32 %v1751_v54, 16  ;;  %vm12364_vm14 = vmmov %vm12352_vm7  ;;  %v8777_v51 = vld [vmem:[#allocation9 + $0x6b8] ss:$20 sps:$4 sm:$0xff]   ;;  %v8780_v18 = vld [vmem:[#allocation9 + $0x6c0] ss:$20 sps:$4 sm:$0xff]   ;;  %4685 = vmatprep.subr.bf16.mxu0 %v8779_v28 }
 0x291   : > { %12357 = vst [vmem:[#allocation65_spill] sm:$0xff] %v10912_v24  ;;  %v10919_v8 = vsel %vm12358_vm3, %v10851_v2, %v10907_v33  ;;  %v2636_v2 = vshrl.u32 %v1751_v54, 16  ;;  %v1620_v58 = vsel %vm12356_vm0, %v1613_v0, %v12020_v10  ;;  %v1692_v36 = vsel %vm12364_vm14, %v10445_v32, %v8377_v60  ;;  %vm12365_vm3 = vmmov %vm12352_vm7  ;;  %v8785_v0 = vld [vmem:[#allocation9 + $0x6e4] ss:$20 sps:$4 sm:$0xff]   ;;  %v8788_v10 = vld [vmem:[#allocation9 + $0x6ec] ss:$20 sps:$4 sm:$0xff]  }
 0x292   : > { %12359 = vst [vmem:[#allocation66_spill] sm:$0xff] %v10919_v8  ;;  %4622 = vmatprep.mubr.bf16.mxu0 %v10919_v8  ;;  %5074 = vmatprep.mubr.bf16.mxu1 %v10919_v8  ;;  %v10931_v61 = vsel %vm12362_vm15, %v10853_v59, %v10909_v13  ;;  %v1464_v59 = vsel %vm12365_vm3, %v8382_v44, %v12024_v45  ;;  %vm12366_vm8 = vmmov %vm12365_vm3  ;;  %v8786_v37 = vld [vmem:[#allocation9 + $0x6e8] ss:$20 sps:$4 sm:$0xff]  }
 0x293   : > { %12363 = vst [vmem:[#allocation67_spill] sm:$0xff] %v10931_v61  ;;  %4623 = vmatmul.mubr.bf16.gmra.mrb[48].mxu0 %v10931_v61  ;;  %5075 = vmatmul.mubr.bf16.gmra.mrb[32].mxu1 %v10931_v61  ;;  %v1693_v1 = vsel %vm12366_vm8, %v10453_v39, %v8382_v44  ;;  %v2638_v19 = vrot.slane %v2636_v2, 3  ;;  %v1748_v4 = vpack.c.bf16 %v1464_v59, %v1462_v34  ;;  %v2641_v61 = vrot.slane %v2639_v35, 4  ;;  %v8783_v39 = vld [vmem:[#allocation9 + $0x6e0] ss:$20 sps:$4 sm:$0xff]   ;;  %v10948_v35 = vpop.permute.xlu0 %8385  ;;  %vm12368_vm7 = vmmov %vm12362_vm15 }
 0x294   : > { %5136 = vmatpush1.bf16.msra.mxu1 %v8774_v6  ;;  %v1747_v54 = vpack.c.bf16 %v1693_v1, %v1692_v36  ;;  %v1759_v32 = vpack.c.bf16 %v1620_v58, %v1614_v30  ;;  %4686 = vmatpush1.bf16.msra.mxu0 %v8777_v51  ;;  %v12026_v59 = vunpack.i.h.bf16 %v10948_v35  ;;  %vm12370_vm0 = vmmov %vm12368_vm7 }
 0x295   : > { %5137 = vmatprep.subr.bf16.mxu1 %v8782_v42  ;;  %v2609_v60 = vshrl.u32 %v1748_v4, 16  ;;  %v2612_v8 = vshll.u32 %v1748_v4, 16  ;;  %v2642_v6 = vor.u32 %v2641_v61, %v2638_v19  ;;  %4687 = vmatprep.subr.bf16.mxu0 %v8785_v0  ;;  %v8791_v42 = vld [vmem:[#allocation9 + $0x70c] ss:$20 sps:$4 sm:$0xff]   ;;  %v8387_v61 = vunpack.i.l.bf16 %v10948_v35  ;;  %vm12372_vm14 = vmmov %vm12370_vm0 }
 0x296   : > { %v2600_v21 = vshrl.u32 %v1747_v54, 16  ;;  %v2603_v45 = vshll.u32 %v1747_v54, 16  ;;  %v2708_v44 = vshrl.u32 %v1759_v32, 16  ;;  %v2711_v53 = vshll.u32 %v1759_v32, 16  ;;  %vm12374_vm8 = vmmov %vm12365_vm3 }
 0x297   : > { %v2611_v2 = vrot.slane %v2609_v60, 3  ;;  %v2614_v36 = vrot.slane %v2612_v8, 4  ;;  %v10951_v4 = vsel %vm12362_vm15, %v2570_v29, %v2642_v6  ;;  %v8792_v29 = vld [vmem:[#allocation9 + $0x710] ss:$20 sps:$4 sm:$0xff]   ;;  %v10970_v0 = vpop.permute.xlu0 %8395  ;;  %vm12375_vm15 = vmmov %vm12365_vm3 }
 0x298   : > { %5138 = vmatpush1.bf16.msra.mxu1 %v8780_v18  ;;  %v2602_v34 = vrot.slane %v2600_v21, 3  ;;  %v2605_v28 = vrot.slane %v2603_v45, 4  ;;  %12367 = vst [vmem:[#allocation68_spill] sm:$0xff] %v10951_v4  ;;  %v2710_v30 = vrot.slane %v2708_v44, 3  ;;  %v2713_v58 = vrot.slane %v2711_v53, 4  ;;  %4688 = vmatpush1.bf16.msra.mxu0 %v8783_v39  ;;  %v10961_v45 = vpop.permute.xlu1 %8390 }
 0x299   : > { %5139 = vmatprep.subr.bf16.mxu1 %v8788_v10  ;;  %v10955_v1 = vor.u32 %v2614_v36, %v2611_v2  ;;  %v8789_v21 = vld [vmem:[#allocation9 + $0x708] ss:$20 sps:$4 sm:$0xff]   ;;  %4689 = vmatprep.subr.bf16.mxu0 %v8791_v42  ;;  %v12030_v19 = vunpack.i.h.bf16 %v10961_v45  ;;  %v8392_v54 = vunpack.i.l.bf16 %v10961_v45  ;;  %v8397_v2 = vunpack.i.l.bf16 %v10970_v0  ;;  %v1184_v42 = vld [vmem:[#allocation2 + $0x190] sm:$0x7f] }
 0x29a   : > { %v10957_v51 = vor.u32 %v2605_v28, %v2602_v34  ;;  %v8794_v10 = vld [vmem:[#allocation9 + $0x714] ss:$20 sps:$4 sm:$0xff]   ;;  %v10959_v8 = vor.u32 %v2713_v58, %v2710_v30  ;;  %v1192_v18 = vld [vmem:[#allocation2 + $0x1a0] sm:$0x1]  ;;  %v8795_v30 = vld [vmem:[#allocation9 + $0x730] ss:$20 sps:$4 sm:$0xff]  }
 0x29b   : > { %v10966_v53 = vsel %vm12368_vm7, %v10907_v33, %v10955_v1  ;;  %v8797_v33 = vld [vmem:[#allocation9 + $0x734] ss:$20 sps:$4 sm:$0xff]   ;;  %v8800_v60 = vld [vmem:[#allocation9 + $0x73c] ss:$20 sps:$4 sm:$0xff]   ;;  %vm12377_vm7 = vmmov %vm12365_vm3  ;;  %v1625_v58 = vrot.slane %v1192_v18, 2 }
 0x29c   : > { %5140 = vmatpush1.bf16.msra.mxu1 %v8786_v37  ;;  %12369 = vst [vmem:[#allocation69_spill] sm:$0xff] %v10966_v53  ;;  %4632 = vmatprep.mubr.bf16.mxu0 %v10966_v53  ;;  %v10977_v32 = vsel %vm12370_vm0, %v10909_v13, %v10957_v51  ;;  %v10981_v39 = vsel %vm12372_vm14, %v2642_v6, %v10959_v8  ;;  %v10990_v13 = vld [vmem:[#allocation2 + $0x160] sm:$0xff]  ;;  %v10997_v34 = vld [vmem:[#allocation2 + $0x178] sm:$0xff]  ;;  %vm12379_vm0 = vmmov %vm12365_vm3 }
 0x29d   : > { %5084 = vmatprep.mubr.bf16.mxu1 %v10966_v53  ;;  %12371 = vst [vmem:[#allocation70_spill] sm:$0xff] %v10977_v32  ;;  %12373 = vst [vmem:[#allocation71_spill] sm:$0xff] %v10981_v39  ;;  %v1466_v37 = vsel %vm12365_vm3, %v8387_v61, %v12026_v59  ;;  %4633 = vmatmul.mubr.bf16.gmra.mrb[52].mxu0 %v10977_v32  ;;  %v1694_v36 = vsel %vm12374_vm8, %v10990_v13, %v8387_v61  ;;  %v8401_v39 = vpop.permute.xlu1 %8400  ;;  %v8803_v4 = vld [vmem:[#allocation9 + $0x75c] ss:$20 sps:$4 sm:$0xff]   ;;  %vm12382_vm3 = vcmask 1045504  }
 0x29e   : > { %5085 = vmatmul.mubr.bf16.gmra.mrb[36].mxu1 %v10977_v32  ;;  %v1468_v6 = vsel %vm12375_vm15, %v8392_v54, %v12030_v19  ;;  %12376 = vst [vmem:[#allocation72_spill] sm:$0xff] %v10997_v34  ;;  %v1695_v28 = vsel %vm12377_vm7, %v10997_v34, %v8392_v54  ;;  %4690 = vmatpush1.bf16.msra.mxu0 %v8789_v21  ;;  %v12378_v32 = vunpack.i.h.bf16 %v10970_v0  ;;  %vm12380_vm14 = vmmov %vm12379_vm0  ;;  %v8798_v19 = vld [vmem:[#allocation9 + $0x738] ss:$20 sps:$4 sm:$0xff]   ;;  %v8403_v20 = vunpack.i.h.bf16 %v8401_v39  ;;  %v8406_v34 = vpop.permute.xlu0 %8405 }
 0x29f   : > { %5141 = vmatprep.subr.bf16.mxu1 %v8794_v10  ;;  %v1755_v59 = vpack.c.bf16 %v1695_v28, %v1694_v36  ;;  %v1756_v44 = vpack.c.bf16 %v1468_v6, %v1466_v37  ;;  %v1696_v53 = vsel %vm12380_vm14, %v1184_v42, %v8397_v2  ;;  %v8402_v21 = vunpack.i.l.bf16 %v8401_v39  ;;  %4691 = vmatprep.subr.bf16.mxu0 %v8797_v33  ;;  %v8806_v10 = vld [vmem:[#allocation9 + $0x764] ss:$20 sps:$4 sm:$0xff]   ;;  %vm12384_vm8 = vmmov %vm12379_vm0 }
 0x2a0   : > { %v1470_v61 = vsel %vm12379_vm0, %v8397_v2, %v12378_v32  ;;  %5142 = vmatpush1.bf16.msra.mxu1 %v8792_v29  ;;  %v11005_v24 = vpack.c.bf16 %v1696_v53, %v1696_v53  ;;  %v8801_v2 = vld [vmem:[#allocation9 + $0x758] ss:$20 sps:$4 sm:$0xff]   ;;  %v12381_v29 = vrot.slane %v10902_v14, 2  ;;  %v12383_v42 = vunpack.i.h.bf16 %v10563_v52  ;;  %vm12386_vm15 = vmmov %vm12379_vm0 }
 0x2a1   : > { %v1764_v54 = vpack.c.bf16 %v1470_v61, %v1470_v61  ;;  %5143 = vmatprep.subr.bf16.mxu1 %v8800_v60  ;;  %v2681_v18 = vshrl.u32 %v1756_v44, 16  ;;  %v2684_v37 = vshll.u32 %v1756_v44, 16  ;;  %v2672_v36 = vshrl.u32 %v1755_v59, 16  ;;  %v8804_v61 = vld [vmem:[#allocation9 + $0x760] ss:$20 sps:$4 sm:$0xff]   ;;  %vm12388_vm7 = vmmov %vm12379_vm0 }
 0x2a2   : > { %v2675_v6 = vshll.u32 %v1755_v59, 16  ;;  %4692 = vmatpush1.bf16.msra.mxu0 %v8795_v30  ;;  %v11010_v53 = vsel %vm12382_vm3, %v12381_v29, %v1625_v58  ;;  %v1439_v33 = vsel %vm12384_vm8, %v12383_v42, %v8402_v21  ;;  %v12385_v60 = vunpack.i.h.bf16 %v10592_v46  ;;  %v8809_v30 = vld [vmem:[#allocation9 + $0x784] ss:$20 sps:$4 sm:$0xff]   ;;  %v8812_v58 = vld [vmem:[#allocation9 + $0x78c] ss:$20 sps:$4 sm:$0xff]   ;;  %vm12391_vm14 = vmmov %vm12379_vm0 }
 0x2a3   : > { %v2753_v28 = vshrl.u32 %v1764_v54, 16  ;;  %v2756_v32 = vshll.u32 %v1764_v54, 16  ;;  %v8408_v44 = vunpack.i.h.bf16 %v8406_v34  ;;  %v8407_v59 = vunpack.i.l.bf16 %v8406_v34  ;;  %4693 = vmatprep.subr.bf16.mxu0 %v8803_v4  ;;  %vm12393_vm3 = vmmov %vm12379_vm0 }
 0x2a4   : > { %v1441_v39 = vsel %vm12386_vm15, %v12385_v60, %v8403_v20  ;;  %5144 = vmatpush1.bf16.msra.mxu1 %v8798_v19  ;;  %v2683_v7 = vrot.slane %v2681_v18, 3  ;;  %v2686_v14 = vrot.slane %v2684_v37, 4  ;;  %v2674_v5 = vrot.slane %v2672_v36, 3  ;;  %v8411_v19 = vpop.permute.xlu1 %8410  ;;  %v8416_v36 = vpop.permute.xlu0 %8415  ;;  %vm12395_vm8 = vmmov %vm12379_vm0 }
 0x2a5   : > { %v1701_v54 = vpack.c.bf16 %v1441_v39, %v1439_v33  ;;  %5145 = vmatprep.subr.bf16.mxu1 %v8806_v10  ;;  %v2744_v52 = vshrl.u32 %v11005_v24, 16  ;;  %v12387_v21 = vunpack.i.h.bf16 %v10623_v62  ;;  %v12389_v20 = vunpack.i.h.bf16 %v10611_v17 }
 0x2a6   : > { %v2677_v4 = vrot.slane %v2675_v6, 4  ;;  %v8413_v18 = vunpack.i.h.bf16 %v8411_v19  ;;  %4694 = vmatpush1.bf16.msra.mxu0 %v8801_v2  ;;  %v2747_v10 = vshll.u32 %v11005_v24, 16  ;;  %v8412_v37 = vunpack.i.l.bf16 %v8411_v19 }
 0x2a7   : > { %v1445_v46 = vsel %vm12388_vm7, %v12387_v21, %v8408_v44  ;;  %v1443_v34 = vsel %vm12379_vm0, %v12389_v20, %v8407_v59  ;;  %v2226_v29 = vshrl.u32 %v1701_v54, 16  ;;  %v2229_v42 = vshll.u32 %v1701_v54, 16  ;;  %4776 = vmatprep.subr.bf16.mxu0 %v8809_v30  ;;  %vm12398_vm7 = vmmov %vm12379_vm0 }
 0x2a8   : > { %v1709_v33 = vpack.c.bf16 %v1445_v46, %v1443_v34  ;;  %v2687_v60 = vor.u32 %v2686_v14, %v2683_v7  ;;  %v2755_v39 = vrot.slane %v2753_v28, 3  ;;  %5146 = vmatpush1.bf16.msra.mxu1 %v8804_v61  ;;  %v2678_v17 = vor.u32 %v2677_v4, %v2674_v5  ;;  %v8421_v2 = vpop.permute.xlu1 %8420  ;;  %v8426_v19 = vpop.permute.xlu0 %8425 }
 0x2a9   : > { %v2758_v21 = vrot.slane %v2756_v32, 4  ;;  %5228 = vmatprep.subr.bf16.mxu1 %v8812_v58  ;;  %v11026_v59 = vrot.slane %v2226_v29, 3  ;;  %v11028_v6 = vrot.slane %v2229_v42, 4  ;;  %v8418_v54 = vunpack.i.h.bf16 %v8416_v36 }
 0x2aa   : > { %v2234_v62 = vshrl.u32 %v1709_v33, 16  ;;  %v2237_v44 = vshll.u32 %v1709_v33, 16  ;;  %v8417_v46 = vunpack.i.l.bf16 %v8416_v36  ;;  %v12390_v24 = vunpack.i.h.bf16 %v10648_v25 }
 0x2ab   : > { %v12392_v28 = vunpack.i.h.bf16 %v10659_v43  ;;  %v8423_v30 = vunpack.i.h.bf16 %v8421_v2  ;;  %v12394_v32 = vunpack.i.h.bf16 %v10733_v11  ;;  %v8422_v58 = vunpack.i.l.bf16 %v8421_v2 }
 0x2ac   : > { %v2236_v20 = vrot.slane %v2234_v62, 3  ;;  %v1447_v7 = vsel %vm12391_vm14, %v12390_v24, %v8412_v37  ;;  %v2239_v5 = vrot.slane %v2237_v44, 4  ;;  %vm12396_vm15 = vsmask.f32 4352  ;;  %vm12401_vm14 = vmmov %vm12379_vm0 }
 0x2ad   : > { %v1449_v61 = vsel %vm12393_vm3, %v12392_v28, %v8413_v18  ;;  %v1453_v14 = vsel %vm12395_vm8, %v12394_v32, %v8418_v54  ;;  %v11041_v34 = vsel %vm12396_vm15, %v10955_v1, %v2687_v60  ;;  %v12397_v25 = vunpack.i.h.bf16 %v10710_v49  ;;  %vm12402_vm3 = vmmov %vm12396_vm15 }
 0x2ae   : > { %v12399_v43 = vunpack.i.h.bf16 %v10797_v26  ;;  %4642 = vmatprep.mubr.bf16.mxu0 %v11041_v34  ;;  %5094 = vmatprep.mubr.bf16.mxu1 %v11041_v34  ;;  %v8428_v11 = vunpack.i.h.bf16 %v8426_v19  ;;  %v8427_v42 = vunpack.i.l.bf16 %v8426_v19  ;;  %v12400_v33 = vunpack.i.h.bf16 %v10783_v31  ;;  %vm12404_vm8 = vmmov %vm12379_vm0 }
 0x2af   : > { %v1451_v4 = vsel %vm12398_vm7, %v12397_v25, %v8417_v46  ;;  %v11056_v18 = vsel %vm12402_vm3, %v10957_v51, %v2678_v17  ;;  %v2759_v49 = vor.u32 %v2758_v21, %v2755_v39  ;;  %v2746_v37 = vrot.slane %v2744_v52, 3  ;;  %vm12406_vm15 = vmmov %vm12379_vm0  ;;  %v8431_v46 = vpop.permute.xlu1 %8430  ;;  %v8436_v39 = vpop.permute.xlu0 %8435 }
 0x2b0   : > { %v1457_v29 = vsel %vm12379_vm0, %v12399_v43, %v8423_v30  ;;  %v1455_v1 = vsel %vm12401_vm14, %v12400_v33, %v8422_v58  ;;  %v12403_v26 = vunpack.i.h.bf16 %v10875_v12  ;;  %v12405_v44 = vunpack.i.h.bf16 %v10849_v15  ;;  %4643 = vmatmul.mubr.bf16.gmra.mrb[56].mxu0 %v11056_v18  ;;  %5095 = vmatmul.mubr.bf16.gmra.mrb[40].mxu1 %v11056_v18  ;;  %vm12407_vm7 = vmmov %vm12402_vm3 }
 0x2b1   : > { %v1733_v36 = vpack.c.bf16 %v1457_v29, %v1455_v1  ;;  %v2749_v31 = vrot.slane %v2747_v10, 4  ;;  %v8433_v51 = vunpack.i.h.bf16 %v8431_v46  ;;  %v8432_v24 = vunpack.i.l.bf16 %v8431_v46  ;;  %vm12410_vm14 = vmmov %vm12379_vm0 }
 0x2b2   : > { %v1461_v62 = vsel %vm12404_vm8, %v12403_v26, %v8428_v11  ;;  %v1459_v54 = vsel %vm12406_vm15, %v12405_v44, %v8427_v42  ;;  %v11067_v52 = vsel %vm12407_vm7, %v2687_v60, %v2759_v49  ;;  %v1725_v12 = vpack.c.bf16 %v1453_v14, %v1451_v4  ;;  %vm12412_vm3 = vmmov %vm12379_vm0 }
 0x2b3   : > { %v1741_v2 = vpack.c.bf16 %v1461_v62, %v1459_v54  ;;  %4652 = vmatprep.mubr.bf16.mxu0 %v11067_v52  ;;  %5104 = vmatprep.mubr.bf16.mxu1 %v11067_v52  ;;  %v8438_v15 = vunpack.i.h.bf16 %v8436_v39  ;;  %v8437_v21 = vunpack.i.l.bf16 %v8436_v39  ;;  %v2750_v28 = vor.u32 %v2749_v31, %v2746_v37  ;;  %vm12414_vm8 = vmmov %vm12379_vm0  ;;  %v1437_v29 = vpop.permute.xlu1 %1436 }
 0x2b4   : > { %v12408_v30 = vunpack.i.h.bf16 %v10900_v38  ;;  %v12409_v10 = vunpack.i.h.bf16 %v10914_v3  ;;  %v11079_v60 = vpack.c.bf16 %v11010_v53, %v11010_v53  ;;  %v1717_v14 = vpack.c.bf16 %v1449_v61, %v1447_v7  ;;  %vm12416_vm15 = vmmov %vm12379_vm0 }
 0x2b5   : > { %v12411_v25 = vunpack.i.h.bf16 %v10961_v45  ;;  %v12413_v43 = vunpack.i.h.bf16 %v10948_v35  ;;  %v12415_v3 = vunpack.i.h.bf16 %v10970_v0  ;;  %v2232_v53 = vor.u32 %v11028_v6, %v11026_v59 }
 0x2b6   : > { %v1463_v32 = vsel %vm12379_vm0, %v12408_v30, %v8432_v24  ;;  %v1465_v58 = vsel %vm12410_vm14, %v12409_v10, %v8433_v51  ;;  %v11092_v33 = vor.u32 %v2239_v5, %v2236_v20  ;;  %v11095_v45 = vsel %vm12407_vm7, %v2678_v17, %v2750_v28  ;;  %vm12417_vm0 = vmmov %vm12407_vm7  ;;  %v8807_v30 = vld [vmem:[#allocation9 + $0x780] ss:$20 sps:$4 sm:$0xff]  }
 0x2b7   : > { %v1749_v19 = vpack.c.bf16 %v1465_v58, %v1463_v32  ;;  %v1469_v4 = vsel %vm12412_vm3, %v12411_v25, %v8438_v15  ;;  %v1467_v38 = vsel %vm12414_vm8, %v12413_v43, %v8437_v21  ;;  %v1471_v42 = vsel %vm12416_vm15, %v12415_v3, %v1437_v29  ;;  %vm12418_vm14 = vmmov %vm12417_vm0  ;;  %v8815_v25 = vld [vmem:[#allocation9 + $0x7ac] ss:$20 sps:$4 sm:$0xff]   ;;  %v8810_v29 = vld [vmem:[#allocation9 + $0x788] ss:$20 sps:$4 sm:$0xff]  }
 0x2b8   : > { %v1757_v11 = vpack.c.bf16 %v1469_v4, %v1467_v38  ;;  %v1765_v7 = vpack.c.bf16 %v1471_v42, %v1471_v42  ;;  %v2402_v61 = vshrl.u32 %v1725_v12, 16  ;;  %v2405_v1 = vshll.u32 %v1725_v12, 16  ;;  %4653 = vmatmul.mubr.bf16.gmra.mrb[60].mxu0 %v11095_v45  ;;  %5105 = vmatmul.mubr.bf16.gmra.mrb[44].mxu1 %v11095_v45  ;;  %vm12419_vm3 = vmmov %vm12417_vm0 }
 0x2b9   : > { %v2474_v35 = vshrl.u32 %v1733_v36, 16  ;;  %v2477_v49 = vshll.u32 %v1733_v36, 16  ;;  %v2546_v37 = vshrl.u32 %v1741_v2, 16  ;;  %v2549_v26 = vshll.u32 %v1741_v2, 16  ;;  %4695 = vmatprep.mubr.bf16.mxu0 %v10538_v22  ;;  %5147 = vmatprep.mubr.bf16.mxu1 %v10538_v22  ;;  %vm12420_vm8 = vmmov %vm12417_vm0 }
 0x2ba   : > { %v2762_v62 = vshrl.u32 %v1765_v7, 16  ;;  %v2765_v44 = vshll.u32 %v1765_v7, 16  ;;  %v2330_v0 = vshrl.u32 %v1717_v14, 16  ;;  %v2404_v59 = vrot.slane %v2402_v61, 3  ;;  %v8821_v7 = vld [vmem:[#allocation9 + $0x7b4] ss:$20 sps:$4 sm:$0xff]   ;;  %vm12421_vm15 = vmmov %vm12417_vm0 }
 0x2bb   : > { %v2407_v17 = vrot.slane %v2405_v1, 4  ;;  %v2476_v6 = vrot.slane %v2474_v35, 3  ;;  %v2479_v20 = vrot.slane %v2477_v49, 4  ;;  %v2548_v5 = vrot.slane %v2546_v37, 3  ;;  %v8813_v1 = vld [vmem:[#allocation9 + $0x7a8] ss:$20 sps:$4 sm:$0xff]   ;;  %vm12422_vm7 = vmmov %vm12417_vm0 }
 0x2bc   : > { %v2764_v54 = vrot.slane %v2762_v62, 3  ;;  %v2767_v36 = vrot.slane %v2765_v44, 4  ;;  %v2333_v46 = vshll.u32 %v1717_v14, 16  ;;  %v2551_v31 = vrot.slane %v2549_v26, 4  ;;  %v8818_v26 = vld [vmem:[#allocation9 + $0x7d4] ss:$20 sps:$4 sm:$0xff]  }
 0x2bd   : > { %v11101_v2 = vor.u32 %v2407_v17, %v2404_v59  ;;  %v2480_v51 = vor.u32 %v2479_v20, %v2476_v6  ;;  %v2618_v24 = vshrl.u32 %v1749_v19, 16  ;;  %v2621_v39 = vshll.u32 %v1749_v19, 16  ;;  %v8816_v6 = vld [vmem:[#allocation9 + $0x7d0] ss:$20 sps:$4 sm:$0xff]  }
 0x2be   : > { %v11105_v12 = vsel %vm12417_vm0, %v2232_v53, %v11092_v33  ;;  %v2552_v15 = vor.u32 %v2551_v31, %v2548_v5  ;;  %v2690_v21 = vshrl.u32 %v1757_v11, 16  ;;  %v2693_v28 = vshll.u32 %v1757_v11, 16  ;;  %v8827_v20 = vld [vmem:[#allocation9 + $0x7dc] ss:$20 sps:$4 sm:$0xff]   ;;  %v8828_v31 = vld [vmem:[#allocation9 + $0x800] ss:$20 sps:$4 sm:$0xff]  }
 0x2bf   : > { %v2332_v32 = vrot.slane %v2330_v0, 3  ;;  %v11109_v10 = vsel %vm12418_vm14, %v11101_v2, %v2480_v51  ;;  %v2620_v58 = vrot.slane %v2618_v24, 3  ;;  %v2623_v14 = vrot.slane %v2621_v39, 4  ;;  %v8819_v0 = vld [vmem:[#allocation9 + $0x7b0] ss:$20 sps:$4 sm:$0xff]   ;;  %vm12423_vm14 = vmmov %vm12417_vm0 }
 0x2c0   : > { %v11112_v4 = vsel %vm12419_vm3, %v2480_v51, %v2552_v15  ;;  %v2692_v19 = vrot.slane %v2690_v21, 3  ;;  %v2695_v43 = vrot.slane %v2693_v28, 4  ;;  %v2768_v38 = vor.u32 %v2767_v36, %v2764_v54  ;;  %4696 = vmatmul.mubr.bf16.vlgmr.msra.gmra.mrb[32].mxu0 %v11105_v12  ;;  %5148 = vmatmul.mubr.bf16.vlgmr.msra.gmra.mrb[16].mxu1 %v11105_v12  ;;  %v8824_v54 = vld [vmem:[#allocation9 + $0x7fc] ss:$20 sps:$4 sm:$0xff]   ;;  %v8825_v36 = vld [vmem:[#allocation9 + $0x7d8] ss:$20 sps:$4 sm:$0xff]   ;;  %vm12424_vm3 = vmmov %vm12417_vm0 }
 0x2c1   : > { %v2335_v3 = vrot.slane %v2333_v46, 4  ;;  %v2624_v42 = vor.u32 %v2623_v14, %v2620_v58  ;;  %v2780_v11 = vshrl.u32 %v11079_v60, 16  ;;  %v2783_v53 = vshll.u32 %v11079_v60, 16  ;;  %4777 = vmatpush1.bf16.msra.mxu0 %v8807_v30  ;;  %4705 = vmatprep.mubr.bf16.mxu0 %v10541_v63  ;;  %v8830_v46 = vld [vmem:[#allocation9 + $0x804] ss:$20 sps:$4 sm:$0xff]  }
 0x2c2   : > { %v2696_v61 = vor.u32 %v2695_v43, %v2692_v19  ;;  %5157 = vmatprep.mubr.bf16.mxu1 %v10541_v63  ;;  %4778 = vmatprep.subr.bf16.mxu0 %v8815_v25  ;;  %v8831_v51 = vld [vmem:[#allocation9 + $0x820] ss:$20 sps:$4 sm:$0xff]   ;;  %v8837_v21 = vld [vmem:[#allocation9 + $0x828] ss:$20 sps:$4 sm:$0xff]   ;;  %v8840_v58 = vld [vmem:[#allocation9 + $0x870] ss:$20 sps:$4 sm:$0xff]  }
 0x2c3   : > { %v11120_v35 = vsel %vm12420_vm8, %v2552_v15, %v2624_v42  ;;  %v2782_v49 = vrot.slane %v2780_v11, 3  ;;  %v2785_v37 = vrot.slane %v2783_v53, 4  ;;  %5229 = vmatpush1.bf16.msra.mxu1 %v8810_v29  ;;  %v2336_v44 = vor.u32 %v2335_v3, %v2332_v32  ;;  %v8839_v24 = vld [vmem:[#allocation9 + $0x82c] ss:$20 sps:$4 sm:$0xff]   ;;  %v8845_v28 = vld [vmem:[#allocation9 + $0x854] ss:$20 sps:$4 sm:$0xff]  }
 0x2c4   : > { %v11124_v60 = vsel %vm12421_vm15, %v2624_v42, %v2696_v61  ;;  %v11127_v62 = vsel %vm12422_vm7, %v2696_v61, %v2768_v38  ;;  %5230 = vmatprep.subr.bf16.mxu1 %v8821_v7  ;;  %v8836_v15 = vld [vmem:[#allocation9 + $0x84c] ss:$20 sps:$4 sm:$0xff]   ;;  %v8834_v30 = vld [vmem:[#allocation9 + $0x848] ss:$20 sps:$4 sm:$0xff]   ;;  %v8843_v32 = vld [vmem:[#allocation9 + $0x850] ss:$20 sps:$4 sm:$0xff]  }
 0x2c5   : > { %v2786_v59 = vor.u32 %v2785_v37, %v2782_v49  ;;  %4779 = vmatpush1.bf16.msra.mxu0 %v8813_v1  ;;  %v11135_v5 = vsel %vm12423_vm14, %v11092_v33, %v2336_v44  ;;  %v8833_v33 = vld [vmem:[#allocation9 + $0x824] ss:$20 sps:$4 sm:$0xff]   ;;  %v11143_v39 = vsel %vm12424_vm3, %v2336_v44, %v11101_v2  ;;  %v8842_v2 = vld [vmem:[#allocation9 + $0x874] ss:$20 sps:$4 sm:$0xff]   ;;  %v8848_v14 = vld [vmem:[#allocation9 + $0x87c] ss:$20 sps:$4 sm:$0xff]  }
 0x2c6   : > { %4780 = vmatprep.subr.bf16.mxu0 %v8818_v26  ;;  %v8846_v25 = vld [vmem:[#allocation9 + $0x878] ss:$20 sps:$4 sm:$0xff]   ;;  %v8851_v19 = vld [vmem:[#allocation9 + $0x89c] ss:$20 sps:$4 sm:$0xff]   ;;  %v8855_v3 = vld [vmem:[#allocation9 + $0x8a0] ss:$20 sps:$4 sm:$0xff]  }
 0x2c7   : > { %v11131_v17 = vsel %vm12417_vm0, %v10959_v8, %v2786_v59  ;;  %5231 = vmatpush1.bf16.msra.mxu1 %v8819_v0  ;;  %v8822_v8 = vld [vmem:[#allocation9 + $0x7f8] ss:$20 sps:$4 sm:$0xff]   ;;  %v8852_v42 = vld [vmem:[#allocation9 + $0x8c0] ss:$20 sps:$4 sm:$0xff]   ;;  %v8861_v7 = vld [vmem:[#allocation9 + $0x8c8] ss:$20 sps:$4 sm:$0xff]  }
 0x2c8   : > { %4706 = vmatmul.mubr.bf16.gmra.mrb[36].mxu0 %v11135_v5  ;;  %5158 = vmatmul.mubr.bf16.gmra.mrb[20].mxu1 %v11135_v5  ;;  %v8857_v43 = vld [vmem:[#allocation9 + $0x8a4] ss:$20 sps:$4 sm:$0xff]   ;;  %v8863_v11 = vld [vmem:[#allocation9 + $0x8cc] ss:$20 sps:$4 sm:$0xff]   ;;  %v8866_v61 = vld [vmem:[#allocation9 + $0x8f4] ss:$20 sps:$4 sm:$0xff]  }
 0x2c9   : > { %4715 = vmatprep.mubr.bf16.mxu0 %v10566_v55  ;;  %5167 = vmatprep.mubr.bf16.mxu1 %v10566_v55  ;;  %v8849_v38 = vld [vmem:[#allocation9 + $0x898] ss:$20 sps:$4 sm:$0xff]   ;;  %v8858_v1 = vld [vmem:[#allocation9 + $0x8e8] ss:$20 sps:$4 sm:$0xff]   ;;  %v8864_v49 = vld [vmem:[#allocation9 + $0x8f0] ss:$20 sps:$4 sm:$0xff]  }
 0x2ca   : > { %4781 = vmatpush1.bf16.msra.mxu0 %v8816_v6  ;;  %5232 = vmatprep.subr.bf16.mxu1 %v8827_v20  ;;  %v8854_v29 = vld [vmem:[#allocation9 + $0x8c4] ss:$20 sps:$4 sm:$0xff]   ;;  %v8860_v53 = vld [vmem:[#allocation9 + $0x8ec] ss:$20 sps:$4 sm:$0xff]   ;;  %v8869_v37 = vld [vmem:[#allocation9 + $0x914] ss:$20 sps:$4 sm:$0xff]  }
 0x2cb   : > { %4782 = vmatprep.subr.bf16.mxu0 %v8824_v54  ;;  %5233 = vmatpush1.bf16.msra.mxu1 %v8825_v36  ;;  %v8867_v26 = vld [vmem:[#allocation9 + $0x910] ss:$20 sps:$4 sm:$0xff]   ;;  %v8870_v0 = vld [vmem:[#allocation9 + $0x918] ss:$20 sps:$4 sm:$0xff]   ;;  %v8876_v54 = vld [vmem:[#allocation9 + $0x940] ss:$20 sps:$4 sm:$0xff]  }
 0x2cc   : > { %5234 = vmatprep.subr.bf16.mxu1 %v8830_v46  ;;  %v8872_v44 = vld [vmem:[#allocation9 + $0x91c] ss:$20 sps:$4 sm:$0xff]   ;;  %v8878_v6 = vld [vmem:[#allocation9 + $0x944] ss:$20 sps:$4 sm:$0xff]   ;;  %vm12425_vm8 = vcmask 523264   ;;  %vm12428_vm7 = vcmask 1045504  }
 0x2cd   : > { %v8875_v59 = vld [vmem:[#allocation9 + $0x93c] ss:$20 sps:$4 sm:$0xff]   ;;  %v8873_v20 = vld [vmem:[#allocation9 + $0x938] ss:$20 sps:$4 sm:$0xff]   ;;  %vm12426_vm15 = vmmov %vm12425_vm8 }
 0x2ce   : > { %4783 = vmatpush1.bf16.msra.mxu0 %v8822_v8  ;;  %v8879_v36 = vld [vmem:[#allocation9 + $0x150] ss:$20 sps:$4 sm:$0xff]   ;;  %vm12429_vm0 = vmmov %vm12428_vm7 }
 0x2cf   : > { %4784 = vmatprep.subr.bf16.mxu0 %v8833_v33  ;;  %5235 = vmatpush1.bf16.msra.mxu1 %v8828_v31  ;;  %v8881_v46 = vld [vmem:[#allocation9 + $0x3d0] ss:$20 sps:$4 sm:$0xff]   ;;  %v9003_v33 = vld [vmem:[#allocation2 + $0x100] sm:$0xff]  ;;  %vm12430_vm14 = vmmov %vm12425_vm8 }
 0x2d0   : > { %4716 = vmatmul.mubr.bf16.gmra.mrb[40].mxu0 %v11143_v39  ;;  %5168 = vmatmul.mubr.bf16.gmra.mrb[24].mxu1 %v11143_v39  ;;  %v9002_v8 = vld [vmem:[#allocation2 + $0xe8] sm:$0xff]  ;;  %vm12431_vm3 = vmmov %vm12425_vm8 }
 0x2d1   : > { %4725 = vmatprep.mubr.bf16.mxu0 %v10581_v41  ;;  %5177 = vmatprep.mubr.bf16.mxu1 %v10581_v41  ;;  %v1579_v31 = vrot.slane %v9002_v8, 2  ;;  %v8897_v8 = vld [vmem:[#allocation9 + $0x470] ss:$20 sps:$4 sm:$0xff]  }
 0x2d2   : > { %4785 = vmatpush1.bf16.msra.mxu0 %v8831_v51  ;;  %5236 = vmatprep.subr.bf16.mxu1 %v8839_v24  ;;  %v1585_v51 = vrot.slane %v9003_v33, 2  ;;  %v8880_v24 = vld [vmem:[#allocation9 + $0x10] ss:$20 sps:$4 sm:$0xff]  }
 0x2d3   : > { %4786 = vmatprep.subr.bf16.mxu0 %v8836_v15  ;;  %5237 = vmatpush1.bf16.msra.mxu1 %v8837_v21  ;;  %v12427_v15 = vrot.slane %v10412_v23, 2  ;;  %v8884_v23 = vld [vmem:[#allocation9 + $0x38] ss:$20 sps:$4 sm:$0xff]  }
 0x2d4   : > { %5238 = vmatprep.subr.bf16.mxu1 %v8845_v28  ;;  %v1586_v28 = vsel %vm12429_vm0, %v1579_v31, %v1585_v51 }
 0x2d5   : > { %v1580_v21 = vsel %vm12428_vm7, %v12427_v15, %v1579_v31  ;;  %vm12434_vm7 = vmmov %vm12431_vm3  ;;  %v8896_v15 = vld [vmem:[#allocation9 + $0xb0] ss:$20 sps:$4 sm:$0xff]  }
 0x2d6   : > { %4787 = vmatpush1.bf16.msra.mxu0 %v8834_v30  ;;  %v8882_v30 = vld [vmem:[#allocation9 + $0x290] ss:$20 sps:$4 sm:$0xff]  }
 0x2d7   : > { %4788 = vmatprep.subr.bf16.mxu0 %v8842_v2  ;;  %5239 = vmatpush1.bf16.msra.mxu1 %v8843_v32  ;;  %v8883_v2 = vld [vmem:[#allocation9 + $0x178] ss:$20 sps:$4 sm:$0xff]  }
 0x2d8   : > { %4726 = vmatmul.mubr.bf16.gmra.mrb[44].mxu0 %v11109_v10  ;;  %5178 = vmatmul.mubr.bf16.gmra.mrb[28].mxu1 %v11109_v10  ;;  %v8885_v32 = vld [vmem:[#allocation9 + $0x3f8] ss:$20 sps:$4 sm:$0xff]  }
 0x2d9   : > { %4735 = vmatprep.mubr.bf16.mxu0 %v10595_v27  ;;  %5187 = vmatprep.mubr.bf16.mxu1 %v10595_v27 }
 0x2da   : > { %4789 = vmatpush1.bf16.msra.mxu0 %v8840_v58  ;;  %5240 = vmatprep.subr.bf16.mxu1 %v8848_v14  ;;  %v1736_v58 = vpack.c.bf16 %v1586_v28, %v1580_v21  ;;  %v9004_v14 = vld [vmem:[#allocation2 + $0x118] sm:$0xff]  ;;  %v8898_v21 = vld [vmem:[#allocation9 + $0x330] ss:$20 sps:$4 sm:$0xff]  }
 0x2db   : > { %4790 = vmatprep.subr.bf16.mxu0 %v8851_v19  ;;  %5241 = vmatpush1.bf16.msra.mxu1 %v8846_v25  ;;  %v1591_v25 = vrot.slane %v9004_v14, 2  ;;  %v9005_v19 = vld [vmem:[#allocation2 + $0x130] sm:$0xff] }
 0x2dc   : > { %5242 = vmatprep.subr.bf16.mxu1 %v8857_v43  ;;  %v1597_v43 = vrot.slane %v9005_v19, 2  ;;  %v8899_v28 = vld [vmem:[#allocation9 + $0x218] ss:$20 sps:$4 sm:$0xff]  }
 0x2de   : > { %4791 = vmatpush1.bf16.msra.mxu0 %v8849_v38  ;;  %v8886_v38 = vld [vmem:[#allocation9 + $0x2b8] ss:$20 sps:$4 sm:$0xff]  }
 0x2df   : > { %4792 = vmatprep.subr.bf16.mxu0 %v8854_v29  ;;  %5243 = vmatpush1.bf16.msra.mxu1 %v8855_v3  ;;  %v8887_v29 = vld [vmem:[#allocation9 + $0x1a0] ss:$20 sps:$4 sm:$0xff]  }
 0x2e0   : > { %4736 = vmatmul.mubr.bf16.gmra.mrb[48].mxu0 %v11112_v4  ;;  %5188 = vmatmul.mubr.bf16.gmra.mrb[32].mxu1 %v11112_v4  ;;  %v8889_v3 = vld [vmem:[#allocation9 + $0x420] ss:$20 sps:$4 sm:$0xff]  }
 0x2e1   : > { %4745 = vmatprep.mubr.bf16.mxu0 %v10604_v48  ;;  %5197 = vmatprep.mubr.bf16.mxu1 %v10604_v48 }
 0x2e2   : > { %4793 = vmatpush1.bf16.msra.mxu0 %v8852_v42  ;;  %5244 = vmatprep.subr.bf16.mxu1 %v8863_v11  ;;  %v2501_v42 = vshrl.u32 %v1736_v58, 16  ;;  %v2504_v11 = vshll.u32 %v1736_v58, 16 }
 0x2e3   : > { %4794 = vmatprep.subr.bf16.mxu0 %v8860_v53  ;;  %5245 = vmatpush1.bf16.msra.mxu1 %v8861_v7 }
 0x2e4   : > { %5246 = vmatprep.subr.bf16.mxu1 %v8866_v61  ;;  %v8888_v61 = vld [vmem:[#allocation9 + $0x60] ss:$20 sps:$4 sm:$0xff]  }
 0x2e6   : > { %4795 = vmatpush1.bf16.msra.mxu0 %v8858_v1  ;;  %v8890_v1 = vld [vmem:[#allocation9 + $0x2e0] ss:$20 sps:$4 sm:$0xff]  }
 0x2e7   : > { %4796 = vmatprep.subr.bf16.mxu0 %v8869_v37  ;;  %5247 = vmatpush1.bf16.msra.mxu1 %v8864_v49  ;;  %v8891_v49 = vld [vmem:[#allocation9 + $0x1c8] ss:$20 sps:$4 sm:$0xff]  }
 0x2e8   : > { %4746 = vmatmul.mubr.bf16.gmra.mrb[52].mxu0 %v11120_v35  ;;  %5198 = vmatmul.mubr.bf16.gmra.mrb[36].mxu1 %v11120_v35  ;;  %v8893_v37 = vld [vmem:[#allocation9 + $0x448] ss:$20 sps:$4 sm:$0xff]  }
 0x2e9   : > { %4755 = vmatprep.mubr.bf16.mxu0 %v10614_v50  ;;  %5207 = vmatprep.mubr.bf16.mxu1 %v10614_v50 }
 0x2ea   : > { %4797 = vmatpush1.bf16.msra.mxu0 %v8867_v26  ;;  %5248 = vmatprep.subr.bf16.mxu1 %v8872_v44  ;;  %v2503_v26 = vrot.slane %v2501_v42, 3  ;;  %v2506_v44 = vrot.slane %v2504_v11, 4  ;;  %v8902_v42 = vld [vmem:[#allocation9 + $0x358] ss:$20 sps:$4 sm:$0xff]   ;;  %v8903_v11 = vld [vmem:[#allocation9 + $0x240] ss:$20 sps:$4 sm:$0xff]  }
 0x2eb   : > { %5249 = vmatpush1.bf16.msra.mxu1 %v8870_v0  ;;  %4798 = vmatprep.subr.bf16.mxu0 %v8875_v59  ;;  %v9006_v59 = vld [vmem:[#allocation2 + $0x148] sm:$0xff] }
 0x2ec   : > { %5250 = vmatprep.subr.bf16.mxu1 %v8878_v6  ;;  %v1603_v6 = vrot.slane %v9006_v59, 2  ;;  %v2507_v31 = vor.u32 %v2506_v44, %v2503_v26  ;;  %v8904_v26 = vld [vmem:[#allocation9 + $0x100] ss:$20 sps:$4 sm:$0xff]   ;;  %v1193_v44 = vld [vmem:[#allocation2 + $0x1a8] sm:$0x1] }
 0x2ed   : > { %v8907_v59 = vld [vmem:[#allocation9 + $0x268] ss:$20 sps:$4 sm:$0xff]  }
 0x2ee   : > { %4799 = vmatpush1.bf16.msra.mxu0 %v8873_v20  ;;  %v1609_v20 = vrot.slane %v10990_v13, 2 }
 0x2ef   : > { %5251 = vmatpush1.bf16.msra.mxu1 %v8876_v54  ;;  %7528 = vmatprep.subr.bf16.mxu0 %v8879_v36  ;;  %v8892_v54 = vld [vmem:[#allocation9 + $0x88] ss:$20 sps:$4 sm:$0xff]  }
 0x2f0   : > { %4756 = vmatmul.mubr.bf16.gmra.mrb[56].mxu0 %v11124_v60  ;;  %5208 = vmatmul.mubr.bf16.gmra.mrb[40].mxu1 %v11124_v60  ;;  %v8894_v36 = vld [vmem:[#allocation9 + $0x308] ss:$20 sps:$4 sm:$0xff]  }
 0x2f1   : > { %4765 = vmatprep.mubr.bf16.mxu0 %v10628_v56  ;;  %5217 = vmatprep.mubr.bf16.mxu1 %v10628_v56 }
 0x2f2   : > { %7592 = vmatprep.subr.bf16.mxu1 %v8881_v46  ;;  %v8895_v46 = vld [vmem:[#allocation9 + $0x1f0] ss:$20 sps:$4 sm:$0xff]  }
 0x2f8   : > { %4766 = vmatmul.mubr.bf16.gmra.mrb[60].mxu0 %v11127_v62  ;;  %5218 = vmatmul.mubr.bf16.gmra.mrb[44].mxu1 %v11127_v62 }
 0x2f9   : > { %7419 = vmatprep.mubr.msk.bf16.mxu0 %vm12425_vm8, %v10674_v57  ;;  %7427 = vmatprep.mubr.msk.bf16.mxu1 %vm12426_vm15, %v10674_v57  ;;  %vm12432_vm8 = vmmov %vm12429_vm0 }
 0x2fa   : > { %v1592_v53 = vsel %vm12432_vm8, %v1585_v51, %v1591_v25  ;;  %vm12433_vm15 = vmmov %vm12429_vm0 }
 0x2fb   : > { %v1598_v7 = vsel %vm12433_vm15, %v1591_v25, %v1597_v43  ;;  %vm12435_vm0 = vmmov %vm12431_vm3 }
 0x2fc   : > { %v1744_v0 = vpack.c.bf16 %v1598_v7, %v1592_v53  ;;  %vm12442_vm15 = vmmov %vm12435_vm0  ;;  %v8905_v53 = vld [vmem:[#allocation9 + $0x4c0] ss:$20 sps:$4 sm:$0xff]  }
 0x2fe   : > { %v2573_v33 = vshrl.u32 %v1744_v0, 16  ;;  %v2576_v51 = vshll.u32 %v1744_v0, 16  ;;  %v8906_v0 = vld [vmem:[#allocation9 + $0x380] ss:$20 sps:$4 sm:$0xff]  }
 0x300   : > { %4809 = vmatmul.mubr.bf16.vlgmr.msra.gmra.mrb[32].mxu0 %v10716_v40  ;;  %5261 = vmatmul.mubr.bf16.vlgmr.msra.gmra.mrb[16].mxu1 %v10716_v40  ;;  %v2575_v14 = vrot.slane %v2573_v33, 3  ;;  %v2578_v25 = vrot.slane %v2576_v51, 4  ;;  %v1627_v33 = vrot.slane %v1193_v44, 2  ;;  %v8908_v51 = vld [vmem:[#allocation9 + $0x128] ss:$20 sps:$4 sm:$0xff]  }
 0x301   : > { %7529 = vmatpush3.bf16.msra.mxu0 %v8880_v24  ;;  %7420 = vmatprep.mubr.msk.bf16.mxu0 %vm12430_vm14, %v10768_v9  ;;  %vm12436_vm14 = vmmov %vm12432_vm8  ;;  %v8913_v44 = vld [vmem:[#allocation9 + $0x790] ss:$20 sps:$4 sm:$0xff]  }
 0x302   : > { %7428 = vmatprep.mubr.msk.bf16.mxu1 %vm12431_vm3, %v10768_v9  ;;  %7593 = vmatpush3.bf16.msra.mxu1 %v8882_v30  ;;  %v1604_v24 = vsel %vm12436_vm14, %v1597_v43, %v1603_v6  ;;  %vm12437_vm3 = vmmov %vm12432_vm8  ;;  %v8901_v30 = vld [vmem:[#allocation9 + $0x498] ss:$20 sps:$4 sm:$0xff]   ;;  %vm12440_vm8 = vsmask.f32 4352  ;;  %v12441_v43 = vld [vmem:[#allocation72_spill] sm:$0xff]  ;;  %v2579_v7 = vor.u32 %v2578_v25, %v2575_v14 }
 0x303   : > { %7530 = vmatprep.subr.bf16.mxu0 %v8883_v2  ;;  %7594 = vmatprep.subr.bf16.mxu1 %v8885_v32  ;;  %v1610_v13 = vsel %vm12437_vm3, %v1603_v6, %v1609_v20  ;;  %v12438_v2 = vld [vmem:[#allocation26_spill] sm:$0xff]  ;;  %v12439_v32 = vld [vmem:[#allocation48_spill] sm:$0xff] }
 0x304   : > { %v11196_v58 = vsel %vm12440_vm8, %v12439_v32, %v2507_v31  ;;  %v1752_v19 = vpack.c.bf16 %v1610_v13, %v1604_v24  ;;  %v8909_v6 = vld [vmem:[#allocation9 + $0x4e8] ss:$20 sps:$4 sm:$0xff]   ;;  %v8911_v13 = vld [vmem:[#allocation9 + $0x650] ss:$20 sps:$4 sm:$0xff]  }
 0x305   : > { %7531 = vmatpush3.bf16.msra.mxu0 %v8884_v23  ;;  %v1615_v23 = vrot.slane %v12441_v43, 2  ;;  %v8910_v24 = vld [vmem:[#allocation9 + $0x3a8] ss:$20 sps:$4 sm:$0xff]  }
 0x306   : > { %7595 = vmatpush3.bf16.msra.mxu1 %v8886_v38  ;;  %7532 = vmatprep.subr.bf16.mxu0 %v8887_v29  ;;  %v9007_v38 = vld [vmem:[#allocation2 + $0x190] sm:$0xff] }
 0x307   : > { %7596 = vmatprep.subr.bf16.mxu1 %v8889_v3  ;;  %v1621_v29 = vrot.slane %v9007_v38, 2  ;;  %v8900_v3 = vld [vmem:[#allocation9 + $0xd8] ss:$20 sps:$4 sm:$0xff]  }
 0x308   : > { %4819 = vmatmul.mubr.bf16.gmra.mrb[36].mxu0 %v10801_v16  ;;  %5271 = vmatmul.mubr.bf16.gmra.mrb[20].mxu1 %v10801_v16  ;;  %v12452_v32 = vld [vmem:[#allocation65_spill] sm:$0xff] }
 0x309   : > { %7421 = vmatprep.mubr.msk.bf16.mxu0 %vm12434_vm7, %v10836_v47  ;;  %7429 = vmatprep.mubr.msk.bf16.mxu1 %vm12435_vm0, %v10836_v47  ;;  %vm12443_vm7 = vmmov %vm12435_vm0 }
 0x30a   : > { %7533 = vmatpush3.bf16.msra.mxu0 %v8888_v61  ;;  %7597 = vmatpush3.bf16.msra.mxu1 %v8890_v1  ;;  %v2645_v61 = vshrl.u32 %v1752_v19, 16  ;;  %v2648_v1 = vshll.u32 %v1752_v19, 16  ;;  %vm12444_vm0 = vmmov %vm12437_vm3 }
 0x30b   : > { %7534 = vmatprep.subr.bf16.mxu0 %v8891_v49  ;;  %7598 = vmatprep.subr.bf16.mxu1 %v8893_v37  ;;  %v1616_v49 = vsel %vm12444_vm0, %v1609_v20, %v1615_v23  ;;  %vm12445_vm14 = vmmov %vm12444_vm0 }
 0x30c   : > { %v1622_v37 = vsel %vm12445_vm14, %v1615_v23, %v1621_v29  ;;  %vm12447_vm3 = vmmov %vm12440_vm8  ;;  %v2650_v20 = vrot.slane %v2648_v1, 4 }
 0x30d   : > { %vm12448_vm8 = vmmov %vm12443_vm7 }
 0x30e   : > { %7535 = vmatpush3.bf16.msra.mxu0 %v8892_v54  ;;  %7599 = vmatpush3.bf16.msra.mxu1 %v8894_v36  ;;  %v12446_v54 = vld [vmem:[#allocation64_spill] sm:$0xff]  ;;  %v11208_v36 = vsel %vm12447_vm3, %v2507_v31, %v2579_v7  ;;  %vm12454_vm14 = vmmov %vm12448_vm8 }
 0x30f   : > { %7536 = vmatprep.subr.bf16.mxu0 %v8895_v46  ;;  %7600 = vmatprep.subr.bf16.mxu1 %v8897_v8  ;;  %v2647_v46 = vrot.slane %v2645_v61, 3  ;;  %v1760_v8 = vpack.c.bf16 %v1622_v37, %v1616_v49  ;;  %v12460_v61 = vld [vmem:[#allocation71_spill] sm:$0xff]  ;;  %v12462_v49 = vld [vmem:[#allocation36_spill] sm:$0xff]  ;;  %v12463_v37 = vld [vmem:[#allocation53_spill] sm:$0xff] }
 0x310   : > { %4829 = vmatmul.mubr.bf16.gmra.mrb[40].mxu0 %v12438_v2  ;;  %5281 = vmatmul.mubr.bf16.gmra.mrb[24].mxu1 %v12438_v2 }
 0x311   : > { %7422 = vmatprep.mubr.msk.bf16.mxu0 %vm12442_vm15, %v11196_v58  ;;  %7430 = vmatprep.mubr.msk.bf16.mxu1 %vm12443_vm7, %v11196_v58  ;;  %vm12449_vm15 = vmmov %vm12443_vm7  ;;  %v2717_v31 = vshrl.u32 %v1760_v8, 16 }
 0x312   : > { %7537 = vmatpush3.bf16.msra.mxu0 %v8896_v15  ;;  %7601 = vmatpush3.bf16.msra.mxu1 %v8898_v21  ;;  %v2651_v15 = vor.u32 %v2650_v20, %v2647_v46  ;;  %v2720_v21 = vshll.u32 %v1760_v8, 16  ;;  %vm12450_vm7 = vmmov %vm12444_vm0  ;;  %v12466_v46 = vld [vmem:[#allocation49_spill] sm:$0xff]  ;;  %v12467_v8 = vld [vmem:[#allocation34_spill] sm:$0xff] }
 0x313   : > { %7538 = vmatprep.subr.bf16.mxu0 %v8899_v28  ;;  %7602 = vmatprep.subr.bf16.mxu1 %v8901_v30  ;;  %v1628_v28 = vsel %vm12450_vm7, %v1621_v29, %v1627_v33  ;;  %v12451_v30 = vmov 0   ;;  %vm12453_vm0 = vmmov %vm12447_vm3  ;;  %v2719_v25 = vrot.slane %v2717_v31, 3  ;;  %v8915_v20 = vld [vmem:[#allocation9 + $0x538] ss:$20 sps:$4 sm:$0xff]  }
 0x314   : > { %v11219_v14 = vsel %vm12453_vm0, %v2579_v7, %v2651_v15  ;;  %v2722_v19 = vrot.slane %v2720_v21, 4  ;;  %v1768_v43 = vpack.c.bf16 %v1628_v28, %v1628_v28  ;;  %vm12455_vm3 = vmmov %vm12448_vm8  ;;  %v8916_v33 = vld [vmem:[#allocation9 + $0x7b8] ss:$20 sps:$4 sm:$0xff]   ;;  %v12470_v28 = vld [vmem:[#allocation56_spill] sm:$0xff] }
 0x315   : > { %vm12459_vm7 = vmmov %vm12455_vm3  ;;  %v12468_v31 = vld [vmem:[#allocation51_spill] sm:$0xff]  ;;  %v12469_v21 = vld [vmem:[#allocation38_spill] sm:$0xff] }
 0x316   : > { %7539 = vmatpush3.bf16.msra.mxu0 %v8900_v3  ;;  %7603 = vmatpush3.bf16.msra.mxu1 %v8902_v42  ;;  %v2723_v23 = vor.u32 %v2722_v19, %v2719_v25  ;;  %v2789_v38 = vshrl.u32 %v1768_v43, 16  ;;  %v2792_v29 = vshll.u32 %v1768_v43, 16  ;;  %v12456_v3 = vld [vmem:[#allocation68_spill] sm:$0xff] }
 0x317   : > { %7540 = vmatprep.subr.bf16.mxu0 %v8903_v11  ;;  %7604 = vmatprep.subr.bf16.mxu1 %v8905_v53  ;;  %v12471_v25 = vld [vmem:[#allocation40_spill] sm:$0xff] }
 0x318   : > { %4839 = vmatmul.mubr.bf16.gmra.mrb[44].mxu0 %v12446_v54  ;;  %5291 = vmatmul.mubr.bf16.gmra.mrb[28].mxu1 %v12446_v54  ;;  %v2791_v11 = vrot.slane %v2789_v38, 3  ;;  %v2794_v53 = vrot.slane %v2792_v29, 4  ;;  %v8920_v19 = vld [vmem:[#allocation9 + $0x808] ss:$20 sps:$4 sm:$0xff]   ;;  %v8923_v38 = vld [vmem:[#allocation9 + $0x830] ss:$20 sps:$4 sm:$0xff]  }
 0x319   : > { %7423 = vmatprep.mubr.msk.bf16.mxu0 %vm12448_vm8, %v11208_v36  ;;  %7431 = vmatprep.mubr.msk.bf16.mxu1 %vm12449_vm15, %v11208_v36  ;;  %vm12457_vm8 = vmmov %vm12453_vm0  ;;  %v8922_v43 = vld [vmem:[#allocation9 + $0x588] ss:$20 sps:$4 sm:$0xff]   ;;  %v8925_v29 = vld [vmem:[#allocation9 + $0x5b0] ss:$20 sps:$4 sm:$0xff]  }
 0x31a   : > { %7541 = vmatpush3.bf16.msra.mxu0 %v8904_v26  ;;  %7605 = vmatpush3.bf16.msra.mxu1 %v8906_v0  ;;  %v11228_v42 = vsel %vm12457_vm8, %v2651_v15, %v2723_v23  ;;  %vm12458_vm15 = vmmov %vm12455_vm3  ;;  %v2795_v7 = vor.u32 %v2794_v53, %v2791_v11  ;;  %v8912_v26 = vld [vmem:[#allocation9 + $0x510] ss:$20 sps:$4 sm:$0xff]   ;;  %v8914_v0 = vld [vmem:[#allocation9 + $0x678] ss:$20 sps:$4 sm:$0xff]  }
 0x31b   : > { %7542 = vmatprep.subr.bf16.mxu0 %v8907_v59  ;;  %7606 = vmatprep.subr.bf16.mxu1 %v8909_v6  ;;  %v12464_v59 = vld [vmem:[#allocation39_spill] sm:$0xff]  ;;  %v12465_v6 = vld [vmem:[#allocation52_spill] sm:$0xff]  ;;  %v12472_v53 = vld [vmem:[#allocation58_spill] sm:$0xff] }
 0x31c   : > { %v11237_v1 = vsel %vm12453_vm0, %v2723_v23, %v2795_v7  ;;  %v8921_v15 = vld [vmem:[#allocation9 + $0x6c8] ss:$20 sps:$4 sm:$0xff]   ;;  %v8924_v23 = vld [vmem:[#allocation9 + $0x6f0] ss:$20 sps:$4 sm:$0xff]   ;;  %v8928_v11 = vld [vmem:[#allocation9 + $0x718] ss:$20 sps:$4 sm:$0xff]  }
 0x31d   : > { %v12473_v7 = vld [vmem:[#allocation42_spill] sm:$0xff]  ;;  %vm12490_vm8 = vmmov %vm12455_vm3 }
 0x31e   : > { %7543 = vmatpush3.bf16.msra.mxu0 %v8908_v51  ;;  %7607 = vmatpush3.bf16.msra.mxu1 %v8910_v24  ;;  %v8917_v51 = vld [vmem:[#allocation9 + $0x6a0] ss:$20 sps:$4 sm:$0xff]   ;;  %vm12493_vm0 = vmmov %vm12455_vm3 }
 0x31f   : > { %7656 = vmatprep.subr.bf16.mxu0 %v8911_v13  ;;  %5632 = vmatprep.subr.bf16.mxu1 %v12451_v30  ;;  %v8918_v24 = vld [vmem:[#allocation9 + $0x560] ss:$20 sps:$4 sm:$0xff]  }
 0x320   : > { %4849 = vmatmul.mubr.bf16.gmra.mrb[48].mxu0 %v12452_v32  ;;  %5301 = vmatmul.mubr.bf16.gmra.mrb[32].mxu1 %v12452_v32  ;;  %v8919_v13 = vld [vmem:[#allocation9 + $0x7e0] ss:$20 sps:$4 sm:$0xff]  }
 0x321   : > { %7424 = vmatprep.mubr.msk.bf16.mxu0 %vm12454_vm14, %v11219_v14  ;;  %7432 = vmatprep.mubr.msk.bf16.mxu1 %vm12455_vm3, %v11219_v14  ;;  %vm12461_vm14 = vmmov %vm12455_vm3 }
 0x328   : > { %4859 = vmatmul.mubr.bf16.gmra.mrb[52].mxu0 %v12456_v3  ;;  %5311 = vmatmul.mubr.bf16.gmra.mrb[36].mxu1 %v12456_v3 }
 0x329   : > { %7425 = vmatprep.mubr.msk.bf16.mxu0 %vm12458_vm15, %v11228_v42  ;;  %7433 = vmatprep.mubr.msk.bf16.mxu1 %vm12459_vm7, %v11228_v42  ;;  %vm12491_vm15 = vmmov %vm12455_vm3 }
 0x32a   : > { %vm12492_vm7 = vmmov %vm12455_vm3 }
 0x330   : > { %4869 = vmatmul.mubr.bf16.gmra.mrb[56].mxu0 %v12460_v61  ;;  %5321 = vmatmul.mubr.bf16.gmra.mrb[40].mxu1 %v12460_v61 }
 0x331   : > { %7426 = vmatprep.mubr.msk.bf16.mxu0 %vm12461_vm14, %v11237_v1  ;;  %7434 = vmatprep.mubr.msk.bf16.mxu1 %vm12455_vm3, %v11237_v1  ;;  %vm12494_vm14 = vmmov %vm12493_vm0 }
 0x332   : > { %vm12495_vm3 = vmmov %vm12493_vm0 }
 0x338   : > { %4879 = vmatmul.mubr.bf16.gmra.mrb[60].mxu0 %v11131_v17  ;;  %5331 = vmatmul.mubr.bf16.gmra.mrb[44].mxu1 %v11131_v17 }
 0x339   : > { %5373 = vmatprep.mubr.bf16.mxu0 %v12462_v49  ;;  %5470 = vmatprep.mubr.bf16.mxu1 %v12463_v37  ;;  %v12474_v49 = vld [vmem:[#allocation60_spill] sm:$0xff]  ;;  %v12475_v37 = vld [vmem:[#allocation62_spill] sm:$0xff] }
 0x340   : > { %5374 = vmatmul.mubr.bf16.vlgmr.msra.gmra.mrb[64].mxu0 %v12464_v59  ;;  %5471 = vmatmul.mubr.bf16.vlgmr.msra.gmra.mrb[48].mxu1 %v12465_v6  ;;  %v8927_v59 = vld [vmem:[#allocation9 + $0x880] ss:$20 sps:$4 sm:$0xff]  }
 0x341   : > { %7657 = vmatpush3.bf16.msra.mxu0 %v8912_v26  ;;  %5381 = vmatprep.mubr.bf16.mxu0 %v12466_v46  ;;  %v8926_v26 = vld [vmem:[#allocation9 + $0x858] ss:$20 sps:$4 sm:$0xff]   ;;  %v8932_v6 = vld [vmem:[#allocation9 + $0x600] ss:$20 sps:$4 sm:$0xff]   ;;  %v8935_v46 = vld [vmem:[#allocation9 + $0x768] ss:$20 sps:$4 sm:$0xff]  }
 0x342   : > { %5478 = vmatprep.mubr.bf16.mxu1 %v12467_v8  ;;  %5633 = vmatpush1.bf16.msra.mxu1 %v8913_v44  ;;  %v8929_v44 = vld [vmem:[#allocation9 + $0x5d8] ss:$20 sps:$4 sm:$0xff]  }
 0x343   : > { %7658 = vmatprep.subr.bf16.mxu0 %v8914_v0  ;;  %5634 = vmatprep.subr.bf16.mxu1 %v12451_v30  ;;  %v8931_v0 = vld [vmem:[#allocation9 + $0x740] ss:$20 sps:$4 sm:$0xff]  }
 0x344   : > { %v12477_v8 = vld [vmem:[#allocation63_spill] sm:$0xff] }
 0x345   : > { %7659 = vmatpush3.bf16.msra.mxu0 %v8915_v20  ;;  %v12476_v20 = vld [vmem:[#allocation61_spill] sm:$0xff] }
 0x346   : > { %5635 = vmatpush1.bf16.msra.mxu1 %v8916_v33  ;;  %7660 = vmatprep.subr.bf16.mxu0 %v8917_v51  ;;  %v12478_v33 = vld [vmem:[#allocation41_spill] sm:$0xff]  ;;  %v12479_v51 = vld [vmem:[#allocation66_spill] sm:$0xff] }
 0x347   : > { %5636 = vmatprep.subr.bf16.mxu1 %v12451_v30 }
 0x348   : > { %5382 = vmatmul.mubr.bf16.gmra.mrb[68].mxu0 %v12468_v31  ;;  %5479 = vmatmul.mubr.bf16.gmra.mrb[52].mxu1 %v12469_v21  ;;  %v8933_v31 = vld [vmem:[#allocation9 + $0x8d0] ss:$20 sps:$4 sm:$0xff]  }
 0x349   : > { %5389 = vmatprep.mubr.bf16.mxu0 %v12470_v28  ;;  %5486 = vmatprep.mubr.bf16.mxu1 %v12471_v25  ;;  %v12480_v21 = vld [vmem:[#allocation29_spill] sm:$0xff]  ;;  %v12481_v28 = vld [vmem:[#allocation67_spill] sm:$0xff]  ;;  %v12482_v25 = vld [vmem:[#allocation32_spill] sm:$0xff] }
 0x34a   : > { %7661 = vmatpush3.bf16.msra.mxu0 %v8918_v24  ;;  %5637 = vmatpush1.bf16.msra.mxu1 %v8919_v13  ;;  %v8930_v24 = vld [vmem:[#allocation9 + $0x8a8] ss:$20 sps:$4 sm:$0xff]  }
 0x34b   : > { %5638 = vmatprep.subr.bf16.mxu1 %v12451_v30  ;;  %7662 = vmatprep.subr.bf16.mxu0 %v8921_v15  ;;  %v8936_v13 = vld [vmem:[#allocation9 + $0x628] ss:$20 sps:$4 sm:$0xff]  }
 0x34c   : > { %v8939_v15 = vld [vmem:[%s11916_s5 + $0x40] sm:$0xff]  }
 0x34e   : > { %5639 = vmatpush1.bf16.msra.mxu1 %v8920_v19  ;;  %7663 = vmatpush3.bf16.msra.mxu0 %v8922_v43  ;;  %v12483_v19 = vld [vmem:[#allocation69_spill] sm:$0xff] }
 0x34f   : > { %5640 = vmatprep.subr.bf16.mxu1 %v12451_v30  ;;  %7664 = vmatprep.subr.bf16.mxu0 %v8924_v23  ;;  %v8934_v43 = vld [vmem:[#allocation9 + $0x8f8] ss:$20 sps:$4 sm:$0xff]   ;;  %v8937_v23 = vld [vmem:[#allocation9 + $0x920] ss:$20 sps:$4 sm:$0xff]  }
 0x350   : > { %5390 = vmatmul.mubr.bf16.gmra.mrb[72].mxu0 %v12472_v53  ;;  %5487 = vmatmul.mubr.bf16.gmra.mrb[56].mxu1 %v12473_v7  ;;  %v8938_v53 = vld [vmem:[#allocation9 + $0x948] ss:$20 sps:$4 sm:$0xff]  }
 0x351   : > { %5397 = vmatprep.mubr.bf16.mxu0 %v12474_v49  ;;  %5494 = vmatprep.mubr.bf16.mxu1 %v12475_v37  ;;  %v8940_v7 = vld [vmem:[%s11916_s5 + $0xc0] sm:$0xff]   ;;  %v12487_v49 = vld [vmem:[#allocation33_spill] sm:$0xff] }
 0x352   : > { %5641 = vmatpush1.bf16.msra.mxu1 %v8923_v38  ;;  %7665 = vmatpush3.bf16.msra.mxu0 %v8925_v29  ;;  %v12484_v38 = vld [vmem:[#allocation43_spill] sm:$0xff]  ;;  %v12485_v29 = vld [vmem:[#allocation70_spill] sm:$0xff]  ;;  %v12488_v37 = vld [vmem:[#allocation45_spill] sm:$0xff] }
 0x353   : > { %5642 = vmatprep.subr.bf16.mxu1 %v12451_v30  ;;  %7666 = vmatprep.subr.bf16.mxu0 %v8928_v11  ;;  %v12486_v11 = vld [vmem:[#allocation44_spill] sm:$0xff] }
 0x356   : > { %5643 = vmatpush1.bf16.msra.mxu1 %v8926_v26  ;;  %7667 = vmatpush3.bf16.msra.mxu0 %v8929_v44  ;;  %v12489_v26 = vld [vmem:[#allocation50_spill] sm:$0xff] }
 0x357   : > { %5644 = vmatprep.subr.bf16.mxu1 %v12451_v30  ;;  %7668 = vmatprep.subr.bf16.mxu0 %v8931_v0  ;;  %v8951_v44 = vld [vmem:[%s11916_s5 + $0x58] sm:$0xff]  }
 0x358   : > { %5398 = vmatmul.mubr.bf16.gmra.mrb[76].mxu0 %v12476_v20  ;;  %5495 = vmatmul.mubr.bf16.gmra.mrb[60].mxu1 %v12477_v8  ;;  %v8952_v0 = vld [vmem:[%s11916_s5 + $0xd8] sm:$0xff]   ;;  %v8960_v20 = vld [vmem:[%s11916_s5 + $0xe8] sm:$0xff]  }
 0x359   : > { %5405 = vmatprep.mubr.bf16.mxu0 %v12478_v33  ;;  %5502 = vmatprep.mubr.bf16.mxu1 %v12479_v51  ;;  %v8961_v8 = vld [vmem:[%s11916_s5 + $0x28] sm:$0xff]   ;;  %v8967_v51 = vld [vmem:[%s11916_s5 + $0x78] sm:$0xff]  }
 0x35a   : > { %5645 = vmatpush1.bf16.msra.mxu1 %v8927_v59  ;;  %7669 = vmatpush3.bf16.msra.mxu0 %v8932_v6  ;;  %v8953_v59 = vld [vmem:[%s11916_s5 + $0x18] sm:$0xff]   ;;  %v8962_v33 = vld [vmem:[%s11916_s5 + $0xa8] sm:$0xff]  }
 0x35b   : > { %5646 = vmatprep.subr.bf16.mxu1 %v12451_v30  ;;  %7670 = vmatprep.subr.bf16.mxu0 %v8935_v46  ;;  %v8954_v6 = vld [vmem:[%s11916_s5 + $0x98] sm:$0xff]   ;;  %v8959_v46 = vld [vmem:[%s11916_s5 + $0x68] sm:$0xff]  }
 0x35e   : > { %5647 = vmatpush1.bf16.msra.mxu1 %v8930_v24  ;;  %7671 = vmatpush3.bf16.msra.mxu0 %v8936_v13  ;;  %v8968_v24 = vld [vmem:[%s11916_s5 + $0xf8] sm:$0xff]  }
 0x35f   : > { %5648 = vmatprep.subr.bf16.mxu1 %v12451_v30  ;;  %7720 = vmatprep.subr.bf16.mxu0 %v8939_v15  ;;  %v8969_v13 = vld [vmem:[%s11916_s5 + $0x38] sm:$0xff]  }
 0x360   : > { %5406 = vmatmul.mubr.bf16.gmra.mrb[80].mxu0 %v12480_v21  ;;  %5503 = vmatmul.mubr.bf16.gmra.mrb[64].mxu1 %v12481_v28  ;;  %v8970_v15 = vld [vmem:[%s11916_s5 + $0xb8] sm:$0xff]  }
 0x361   : > { %5413 = vmatprep.mubr.bf16.mxu0 %v12482_v25  ;;  %5510 = vmatprep.mubr.bf16.mxu1 %v12483_v19 }
 0x362   : > { %5649 = vmatpush1.bf16.msra.mxu1 %v8933_v31 }
 0x363   : > { %5650 = vmatprep.subr.bf16.mxu1 %v12451_v30 }
 0x366   : > { %5651 = vmatpush1.bf16.msra.mxu1 %v8934_v43 }
 0x367   : > { %5652 = vmatprep.subr.bf16.mxu1 %v12451_v30 }
 0x368   : > { %5414 = vmatmul.mubr.bf16.gmra.mrb[84].mxu0 %v12484_v38  ;;  %5511 = vmatmul.mubr.bf16.gmra.mrb[68].mxu1 %v12485_v29 }
 0x369   : > { %5421 = vmatprep.mubr.bf16.mxu0 %v12486_v11  ;;  %5518 = vmatprep.mubr.bf16.mxu1 %v11041_v34  ;;  %v8941_v34 = vld [vmem:[%s11916_s5] sm:$0xff]  }
 0x36a   : > { %5653 = vmatpush1.bf16.msra.mxu1 %v8937_v23 }
 0x36b   : > { %5654 = vmatprep.subr.bf16.mxu1 %v12451_v30 }
 0x36e   : > { %5655 = vmatpush1.bf16.msra.mxu1 %v8938_v53 }
 0x36f   : > { %7784 = vmatprep.subr.bf16.mxu1 %v8940_v7 }
 0x370   : > { %5422 = vmatmul.mubr.bf16.gmra.mrb[88].mxu0 %v12487_v49  ;;  %5519 = vmatmul.mubr.bf16.gmra.mrb[72].mxu1 %v11056_v18  ;;  %v8942_v18 = vld [vmem:[%s11916_s5 + $0x80] sm:$0xff]  }
 0x371   : > { %5429 = vmatprep.mubr.bf16.mxu0 %v12488_v37  ;;  %5526 = vmatprep.mubr.bf16.mxu1 %v11067_v52  ;;  %v8943_v52 = vld [vmem:[%s11916_s5 + $0x48] sm:$0xff]  }
 0x378   : > { %5430 = vmatmul.mubr.bf16.gmra.mrb[92].mxu0 %v12489_v26  ;;  %5527 = vmatmul.mubr.bf16.gmra.mrb[76].mxu1 %v11095_v45  ;;  %v8944_v45 = vld [vmem:[%s11916_s5 + $0xc8] sm:$0xff]  }
 0x379   : > { %5567 = vmatprep.mubr.bf16.mxu0 %v10538_v22  ;;  %7435 = vmatprep.mubr.msk.bf16.mxu1 %vm12490_vm8, %v10674_v57  ;;  %v8945_v22 = vld [vmem:[%s11916_s5 + $0x8] sm:$0xff]   ;;  %vm12496_vm8 = vmmov %vm12493_vm0 }
 0x37a   : > { %v8946_v57 = vld [vmem:[%s11916_s5 + $0x88] sm:$0xff]  }
 0x380   : > { %5568 = vmatmul.mubr.bf16.vlgmr.msra.gmra.mrb[96].mxu0 %v11105_v12  ;;  %5665 = vmatmul.mubr.bf16.vlgmr.msra.gmra.mrb[80].mxu1 %v10716_v40  ;;  %v8947_v40 = vld [vmem:[%s11916_s5 + $0x50] sm:$0xff]  }
 0x381   : > { %5575 = vmatprep.mubr.bf16.mxu0 %v10541_v63  ;;  %7436 = vmatprep.mubr.msk.bf16.mxu1 %vm12491_vm15, %v10768_v9  ;;  %v8948_v63 = vld [vmem:[%s11916_s5 + $0xd0] sm:$0xff]   ;;  %vm12497_vm15 = vmmov %vm12493_vm0 }
 0x382   : > { %7721 = vmatpush3.bf16.msra.mxu0 %v8941_v34  ;;  %7785 = vmatpush3.bf16.msra.mxu1 %v8942_v18  ;;  %v8949_v9 = vld [vmem:[%s11916_s5 + $0x10] sm:$0xff]  }
 0x383   : > { %7722 = vmatprep.subr.bf16.mxu0 %v8943_v52  ;;  %7786 = vmatprep.subr.bf16.mxu1 %v8944_v45  ;;  %v8950_v12 = vld [vmem:[%s11916_s5 + $0x90] sm:$0xff]  }
 0x386   : > { %7723 = vmatpush3.bf16.msra.mxu0 %v8945_v22  ;;  %7787 = vmatpush3.bf16.msra.mxu1 %v8946_v57 }
 0x387   : > { %7724 = vmatprep.subr.bf16.mxu0 %v8947_v40  ;;  %7788 = vmatprep.subr.bf16.mxu1 %v8948_v63 }
 0x388   : > { %5576 = vmatmul.mubr.bf16.gmra.mrb[100].mxu0 %v11135_v5  ;;  %5673 = vmatmul.mubr.bf16.gmra.mrb[84].mxu1 %v10801_v16  ;;  %v8955_v16 = vld [vmem:[%s11916_s5 + $0x60] sm:$0xff]  }
 0x389   : > { %5583 = vmatprep.mubr.bf16.mxu0 %v10566_v55  ;;  %7437 = vmatprep.mubr.msk.bf16.mxu1 %vm12492_vm7, %v10836_v47  ;;  %v8956_v55 = vld [vmem:[%s11916_s5 + $0xe0] sm:$0xff]  }
 0x38a   : > { %7725 = vmatpush3.bf16.msra.mxu0 %v8949_v9  ;;  %7789 = vmatpush3.bf16.msra.mxu1 %v8950_v12  ;;  %v8957_v47 = vld [vmem:[%s11916_s5 + $0x20] sm:$0xff]  }
 0x38b   : > { %7726 = vmatprep.subr.bf16.mxu0 %v8951_v44  ;;  %7790 = vmatprep.subr.bf16.mxu1 %v8952_v0  ;;  %v8958_v5 = vld [vmem:[%s11916_s5 + $0xa0] sm:$0xff]  }
 0x38e   : > { %7727 = vmatpush3.bf16.msra.mxu0 %v8953_v59  ;;  %7791 = vmatpush3.bf16.msra.mxu1 %v8954_v6  ;;  %v8972_v59 = vld [vmem:[%s11916_s5 + $0x108] sm:$0xff]  }
 0x38f   : > { %7728 = vmatprep.subr.bf16.mxu0 %v8955_v16  ;;  %7792 = vmatprep.subr.bf16.mxu1 %v8956_v55 }
 0x390   : > { %5584 = vmatmul.mubr.bf16.gmra.mrb[104].mxu0 %v11143_v39  ;;  %5681 = vmatmul.mubr.bf16.gmra.mrb[88].mxu1 %v12438_v2  ;;  %v8963_v39 = vld [vmem:[%s11916_s5 + $0x70] sm:$0xff]  }
 0x391   : > { %5591 = vmatprep.mubr.bf16.mxu0 %v10581_v41  ;;  %7438 = vmatprep.mubr.msk.bf16.mxu1 %vm12493_vm0, %v11196_v58  ;;  %v8964_v41 = vld [vmem:[%s11916_s5 + $0xf0] sm:$0xff]  }
 0x392   : > { %7729 = vmatpush3.bf16.msra.mxu0 %v8957_v47  ;;  %7793 = vmatpush3.bf16.msra.mxu1 %v8958_v5  ;;  %v8965_v2 = vld [vmem:[%s11916_s5 + $0x30] sm:$0xff]  }
 0x393   : > { %7730 = vmatprep.subr.bf16.mxu0 %v8959_v46  ;;  %7794 = vmatprep.subr.bf16.mxu1 %v8960_v20  ;;  %v8966_v58 = vld [vmem:[%s11916_s5 + $0xb0] sm:$0xff]  }
 0x396   : > { %7731 = vmatpush3.bf16.msra.mxu0 %v8961_v8  ;;  %7795 = vmatpush3.bf16.msra.mxu1 %v8962_v33 }
 0x397   : > { %7732 = vmatprep.subr.bf16.mxu0 %v8963_v39  ;;  %7796 = vmatprep.subr.bf16.mxu1 %v8964_v41 }
 0x398   : > { %5592 = vmatmul.mubr.bf16.gmra.mrb[108].mxu0 %v11109_v10  ;;  %5689 = vmatmul.mubr.bf16.gmra.mrb[92].mxu1 %v12446_v54 }
 0x399   : > { %5599 = vmatprep.mubr.bf16.mxu0 %v10595_v27  ;;  %7439 = vmatprep.mubr.msk.bf16.mxu1 %vm12494_vm14, %v11208_v36  ;;  %v8971_v27 = vld [vmem:[%s11916_s5 + $0x100] sm:$0xff]   ;;  %vm12505_vm14 = vmmov %vm12493_vm0 }
 0x39a   : > { %7733 = vmatpush3.bf16.msra.mxu0 %v8965_v2  ;;  %7797 = vmatpush3.bf16.msra.mxu1 %v8966_v58 }
 0x39b   : > { %7734 = vmatprep.subr.bf16.mxu0 %v8967_v51  ;;  %7798 = vmatprep.subr.bf16.mxu1 %v8968_v24  ;;  %v8973_v24 = vld [vmem:[%s11916_s5 + $0x110] sm:$0xff]  }
 0x39e   : > { %7735 = vmatpush3.bf16.msra.mxu0 %v8969_v13  ;;  %7799 = vmatpush3.bf16.msra.mxu1 %v8970_v15 }
 0x39f   : > { %7928 = vmatprep.subr.bf16.mxu1 %v12451_v30  ;;  %7896 = vmatprep.subr.bf16.mxu0 %v8971_v27 }
 0x3a0   : > { %5600 = vmatmul.mubr.bf16.gmra.mrb[112].mxu0 %v11112_v4  ;;  %5697 = vmatmul.mubr.bf16.gmra.mrb[96].mxu1 %v12452_v32 }
 0x3a1   : > { %5607 = vmatprep.mubr.bf16.mxu0 %v10604_v48  ;;  %7440 = vmatprep.mubr.msk.bf16.mxu1 %vm12495_vm3, %v11219_v14  ;;  %v11428_v48 = vld [vmem:[#allocation10] sm:$0x1f]  ;;  %vm12507_vm3 = vmmov %vm12493_vm0 }
 0x3a8   : > { %5608 = vmatmul.mubr.bf16.gmra.mrb[116].mxu0 %v11120_v35  ;;  %5705 = vmatmul.mubr.bf16.gmra.mrb[100].mxu1 %v12456_v3 }
 0x3a9   : > { %5615 = vmatprep.mubr.bf16.mxu0 %v10614_v50  ;;  %7441 = vmatprep.mubr.msk.bf16.mxu1 %vm12496_vm8, %v11228_v42  ;;  %v12498_v50 = vld [vmem:[#allocation21_spill] sm:$0xff]  ;;  %vm12509_vm8 = vmmov %vm12493_vm0 }
 0x3aa   : > { %v2145_v10 = vsub.s32 3, %v12498_v50  ;;  %v12499_v4 = vsub.s32 0, %v12498_v50  ;;  %v12500_v35 = vsub.s32 2, %v12498_v50  ;;  %v12501_v54 = vsub.s32 1, %v12498_v50 }
 0x3b0   : > { %5616 = vmatmul.mubr.bf16.gmra.mrb[120].mxu0 %v11124_v60  ;;  %5713 = vmatmul.mubr.bf16.gmra.mrb[104].mxu1 %v12460_v61  ;;  %v11439_v60 = vrot.slane %v11428_v48, %v12500_v35 }
 0x3b1   : > { %5623 = vmatprep.mubr.bf16.mxu0 %v10628_v56  ;;  %7442 = vmatprep.mubr.msk.bf16.mxu1 %vm12497_vm15, %v11237_v1  ;;  %v11434_v56 = vrot.slane %v11428_v48, %v12499_v4 }
 0x3b8   : > { %5624 = vmatmul.mubr.bf16.gmra.mrb[124].mxu0 %v11127_v62  ;;  %5721 = vmatmul.mubr.bf16.gmra.mrb[108].mxu1 %v11131_v17  ;;  %v11444_v62 = vrot.slane %v11428_v48, %v12501_v54  ;;  %v11447_v17 = vrot.slane %v11428_v48, %v2145_v10 }
 0x3d3   : > { %v4810_v36 = vpop.f32.mrb[32].mxu0  ;;  %v5262_v32 = vpop.f32.mrb[16].mxu1 }
 0x3d4   : > { %v7952_v14 = vadd.f32 %v4810_v36, %v11434_v56  ;;  %v7984_v3 = vadd.f32 %v5262_v32, %v11439_v60  ;;  %v4812_v42 = vpop.f32.mrb[33].mxu0  ;;  %v5264_v61 = vpop.f32.mrb[17].mxu1 }
 0x3d5   : > { %v7953_v1 = vadd.f32 %v4812_v42, %v11444_v62  ;;  %v7985_v31 = vadd.f32 %v5264_v61, %v11447_v17  ;;  %v4814_v21 = vpop.f32.mrb[34].mxu0  ;;  %v5266_v28 = vpop.f32.mrb[18].mxu1 }
 0x3d6   : > { %v7954_v25 = vadd.f32 %v4814_v21, %v11434_v56  ;;  %v7986_v19 = vadd.f32 %v5266_v28, %v11439_v60  ;;  %v4816_v43 = vpop.f32.mrb[35].mxu0  ;;  %v5268_v23 = vpop.f32.mrb[19].mxu1  ;;  %v5729_v11 = vmax.f32 %v7952_v14, 0.0  ;;  %v5731_v53 = vmax.f32 %v7984_v3, 0.0 }
 0x3d7   : > { %v7955_v38 = vadd.f32 %v4816_v43, %v11444_v62  ;;  %v7987_v29 = vadd.f32 %v5268_v23, %v11447_v17  ;;  %v5730_v37 = vmax.f32 %v7953_v1, 0.0  ;;  %v5732_v26 = vmax.f32 %v7985_v31, 0.0  ;;  %v8974_v31 = vld [vmem:[%s11916_s5 + $0x118] sm:$0xff]  }
 0x3d8   : > { %v5734_v7 = vmax.f32 %v7954_v25, 0.0  ;;  %v5736_v49 = vmax.f32 %v7986_v19, 0.0 }
 0x3d9   : > { %v5735_v34 = vmax.f32 %v7955_v38, 0.0  ;;  %v5737_v18 = vmax.f32 %v7987_v29, 0.0 }
 0x3da   : > { %v5809_v52 = vpack.c.bf16 %v5734_v7, %v5729_v11  ;;  %v5811_v45 = vpack.c.bf16 %v5736_v49, %v5731_v53 }
 0x3db   : > { %v5810_v22 = vpack.c.bf16 %v5735_v34, %v5730_v37  ;;  %v5812_v57 = vpack.c.bf16 %v5737_v18, %v5732_v26  ;;  %v4820_v40 = vpop.f32.mrb[36].mxu0  ;;  %v5272_v63 = vpop.f32.mrb[20].mxu1  ;;  %v8975_v34 = vld [vmem:[%s11916_s5 + $0x120] sm:$0xff]  }
 0x3dc   : > { %v7956_v9 = vadd.f32 %v4820_v40, %v11434_v56  ;;  %v7988_v12 = vadd.f32 %v5272_v63, %v11439_v60  ;;  %v4822_v44 = vpop.f32.mrb[37].mxu0  ;;  %v5274_v0 = vpop.f32.mrb[21].mxu1 }
 0x3dd   : > { %v7957_v6 = vadd.f32 %v4822_v44, %v11444_v62  ;;  %v7989_v16 = vadd.f32 %v5274_v0, %v11447_v17  ;;  %v4824_v55 = vpop.f32.mrb[38].mxu0  ;;  %v5276_v47 = vpop.f32.mrb[22].mxu1  ;;  %6208 = vmatprep.mubr.bf16.mxu0 %v5810_v22  ;;  %6305 = vmatprep.mubr.bf16.mxu1 %v5812_v57 }
 0x3de   : > { %v7958_v5 = vadd.f32 %v4824_v55, %v11434_v56  ;;  %v7990_v46 = vadd.f32 %v5276_v47, %v11439_v60  ;;  %v4826_v20 = vpop.f32.mrb[39].mxu0  ;;  %v5278_v8 = vpop.f32.mrb[23].mxu1  ;;  %6209 = vmatmul.mubr.bf16.vlgmr.msra.gmra.mrb[128].mxu0 %v5809_v52  ;;  %6306 = vmatmul.mubr.bf16.vlgmr.msra.gmra.mrb[112].mxu1 %v5811_v45  ;;  %v5739_v41 = vmax.f32 %v7956_v9, 0.0  ;;  %v5741_v2 = vmax.f32 %v7988_v12, 0.0  ;;  %v8976_v55 = vld [vmem:[%s11916_s5 + $0x128] sm:$0xff]  }
 0x3df   : > { %v7959_v33 = vadd.f32 %v4826_v20, %v11444_v62  ;;  %v7991_v39 = vadd.f32 %v5278_v8, %v11447_v17  ;;  %7897 = vmatpush3.bf16.msra.mxu0 %v8971_v27  ;;  %v5740_v13 = vmax.f32 %v7957_v6, 0.0  ;;  %v5742_v15 = vmax.f32 %v7989_v16, 0.0 }
 0x3e0   : > { %v5744_v58 = vmax.f32 %v7958_v5, 0.0  ;;  %v5746_v51 = vmax.f32 %v7990_v46, 0.0  ;;  %7898 = vmatprep.subr.bf16.mxu0 %v8972_v59 }
 0x3e1   : > { %v5745_v10 = vmax.f32 %v7959_v33, 0.0  ;;  %v5747_v4 = vmax.f32 %v7991_v39, 0.0 }
 0x3e2   : > { %v5814_v35 = vpack.c.bf16 %v5744_v58, %v5739_v41  ;;  %v5816_v54 = vpack.c.bf16 %v5746_v51, %v5741_v2 }
 0x3e3   : > { %v5815_v36 = vpack.c.bf16 %v5745_v10, %v5740_v13  ;;  %v5817_v32 = vpack.c.bf16 %v5747_v4, %v5742_v15  ;;  %v4830_v14 = vpop.f32.mrb[40].mxu0  ;;  %v5282_v3 = vpop.f32.mrb[24].mxu1  ;;  %7899 = vmatpush3.bf16.msra.mxu0 %v8972_v59  ;;  %v8977_v10 = vld [vmem:[%s11916_s5 + $0x130] sm:$0xff]  }
 0x3e4   : > { %v7960_v27 = vadd.f32 %v4830_v14, %v11434_v56  ;;  %v7992_v42 = vadd.f32 %v5282_v3, %v11439_v60  ;;  %v4832_v61 = vpop.f32.mrb[41].mxu0  ;;  %v5284_v1 = vpop.f32.mrb[25].mxu1  ;;  %7900 = vmatprep.subr.bf16.mxu0 %v8973_v24 }
 0x3e5   : > { %v7961_v21 = vadd.f32 %v4832_v61, %v11444_v62  ;;  %v7993_v28 = vadd.f32 %v5284_v1, %v11447_v17  ;;  %v4834_v25 = vpop.f32.mrb[42].mxu0  ;;  %v5286_v19 = vpop.f32.mrb[26].mxu1  ;;  %6216 = vmatprep.mubr.bf16.mxu0 %v5815_v36  ;;  %6313 = vmatprep.mubr.bf16.mxu1 %v5817_v32 }
 0x3e6   : > { %v7962_v43 = vadd.f32 %v4834_v25, %v11434_v56  ;;  %v7994_v23 = vadd.f32 %v5286_v19, %v11439_v60  ;;  %v4836_v38 = vpop.f32.mrb[43].mxu0  ;;  %v5288_v29 = vpop.f32.mrb[27].mxu1  ;;  %6217 = vmatmul.mubr.bf16.gmra.mrb[132].mxu0 %v5814_v35  ;;  %6314 = vmatmul.mubr.bf16.gmra.mrb[116].mxu1 %v5816_v54  ;;  %v5749_v7 = vmax.f32 %v7960_v27, 0.0  ;;  %v5751_v49 = vmax.f32 %v7992_v42, 0.0  ;;  %v8978_v25 = vld [vmem:[%s11916_s5 + $0x138] sm:$0xff]  }
 0x3e7   : > { %v7963_v11 = vadd.f32 %v4836_v38, %v11444_v62  ;;  %v7995_v53 = vadd.f32 %v5288_v29, %v11447_v17  ;;  %7901 = vmatpush3.bf16.msra.mxu0 %v8973_v24  ;;  %v5750_v18 = vmax.f32 %v7961_v21, 0.0  ;;  %v5752_v52 = vmax.f32 %v7993_v28, 0.0 }
 0x3e8   : > { %v5754_v37 = vmax.f32 %v7962_v43, 0.0  ;;  %v5756_v26 = vmax.f32 %v7994_v23, 0.0  ;;  %7902 = vmatprep.subr.bf16.mxu0 %v8974_v31 }
 0x3e9   : > { %v5755_v45 = vmax.f32 %v7963_v11, 0.0  ;;  %v5757_v22 = vmax.f32 %v7995_v53, 0.0 }
 0x3ea   : > { %v5819_v57 = vpack.c.bf16 %v5754_v37, %v5749_v7  ;;  %v5821_v40 = vpack.c.bf16 %v5756_v26, %v5751_v49 }
 0x3eb   : > { %v5820_v63 = vpack.c.bf16 %v5755_v45, %v5750_v18  ;;  %v5822_v9 = vpack.c.bf16 %v5757_v22, %v5752_v52  ;;  %v4840_v12 = vpop.f32.mrb[44].mxu0  ;;  %v5292_v44 = vpop.f32.mrb[28].mxu1  ;;  %7903 = vmatpush3.bf16.msra.mxu0 %v8974_v31 }
 0x3ec   : > { %v7964_v0 = vadd.f32 %v4840_v12, %v11434_v56  ;;  %v7996_v59 = vadd.f32 %v5292_v44, %v11439_v60  ;;  %v4842_v6 = vpop.f32.mrb[45].mxu0  ;;  %v5294_v16 = vpop.f32.mrb[29].mxu1  ;;  %7904 = vmatprep.subr.bf16.mxu0 %v8975_v34 }
 0x3ed   : > { %v7965_v47 = vadd.f32 %v4842_v6, %v11444_v62  ;;  %v7997_v5 = vadd.f32 %v5294_v16, %v11447_v17  ;;  %v4844_v46 = vpop.f32.mrb[46].mxu0  ;;  %v5296_v20 = vpop.f32.mrb[30].mxu1  ;;  %6224 = vmatprep.mubr.bf16.mxu0 %v5820_v63  ;;  %6321 = vmatprep.mubr.bf16.mxu1 %v5822_v9 }
 0x3ee   : > { %v7966_v8 = vadd.f32 %v4844_v46, %v11434_v56  ;;  %v7998_v33 = vadd.f32 %v5296_v20, %v11439_v60  ;;  %v4846_v39 = vpop.f32.mrb[47].mxu0  ;;  %v5298_v41 = vpop.f32.mrb[31].mxu1  ;;  %6225 = vmatmul.mubr.bf16.gmra.mrb[136].mxu0 %v5819_v57  ;;  %6322 = vmatmul.mubr.bf16.gmra.mrb[120].mxu1 %v5821_v40  ;;  %v5759_v51 = vmax.f32 %v7964_v0, 0.0  ;;  %v5761_v24 = vmax.f32 %v7996_v59, 0.0 }
 0x3ef   : > { %v7967_v2 = vadd.f32 %v4846_v39, %v11444_v62  ;;  %v7999_v58 = vadd.f32 %v5298_v41, %v11447_v17  ;;  %7905 = vmatpush3.bf16.msra.mxu0 %v8975_v34  ;;  %v5760_v4 = vmax.f32 %v7965_v47, 0.0  ;;  %v5762_v35 = vmax.f32 %v7997_v5, 0.0 }
 0x3f0   : > { %v5764_v13 = vmax.f32 %v7966_v8, 0.0  ;;  %v5766_v15 = vmax.f32 %v7998_v33, 0.0  ;;  %7906 = vmatprep.subr.bf16.mxu0 %v8976_v55 }
 0x3f1   : > { %v5765_v54 = vmax.f32 %v7967_v2, 0.0  ;;  %v5767_v36 = vmax.f32 %v7999_v58, 0.0 }
 0x3f2   : > { %v5824_v32 = vpack.c.bf16 %v5764_v13, %v5759_v51  ;;  %v5826_v14 = vpack.c.bf16 %v5766_v15, %v5761_v24 }
 0x3f3   : > { %v5825_v3 = vpack.c.bf16 %v5765_v54, %v5760_v4  ;;  %v5827_v27 = vpack.c.bf16 %v5767_v36, %v5762_v35  ;;  %v4850_v42 = vpop.f32.mrb[48].mxu0  ;;  %v5302_v61 = vpop.f32.mrb[32].mxu1  ;;  %7907 = vmatpush3.bf16.msra.mxu0 %v8976_v55 }
 0x3f4   : > { %v7968_v1 = vadd.f32 %v4850_v42, %v11434_v56  ;;  %v8000_v31 = vadd.f32 %v5302_v61, %v11439_v60  ;;  %v4852_v21 = vpop.f32.mrb[49].mxu0  ;;  %v5304_v28 = vpop.f32.mrb[33].mxu1  ;;  %7908 = vmatprep.subr.bf16.mxu0 %v8977_v10 }
 0x3f5   : > { %v7969_v19 = vadd.f32 %v4852_v21, %v11444_v62  ;;  %v8001_v43 = vadd.f32 %v5304_v28, %v11447_v17  ;;  %v4854_v23 = vpop.f32.mrb[50].mxu0  ;;  %v5306_v38 = vpop.f32.mrb[34].mxu1  ;;  %6232 = vmatprep.mubr.bf16.mxu0 %v5825_v3  ;;  %6329 = vmatprep.mubr.bf16.mxu1 %v5827_v27 }
 0x3f6   : > { %v7970_v29 = vadd.f32 %v4854_v23, %v11434_v56  ;;  %v8002_v11 = vadd.f32 %v5306_v38, %v11439_v60  ;;  %v4856_v53 = vpop.f32.mrb[51].mxu0  ;;  %v5308_v7 = vpop.f32.mrb[35].mxu1  ;;  %6233 = vmatmul.mubr.bf16.gmra.mrb[140].mxu0 %v5824_v32  ;;  %6330 = vmatmul.mubr.bf16.gmra.mrb[124].mxu1 %v5826_v14  ;;  %v5769_v26 = vmax.f32 %v7968_v1, 0.0  ;;  %v5771_v34 = vmax.f32 %v8000_v31, 0.0 }
 0x3f7   : > { %v7971_v49 = vadd.f32 %v4856_v53, %v11444_v62  ;;  %v8003_v37 = vadd.f32 %v5308_v7, %v11447_v17  ;;  %7909 = vmatpush3.bf16.msra.mxu0 %v8977_v10  ;;  %v5770_v45 = vmax.f32 %v7969_v19, 0.0  ;;  %v5772_v22 = vmax.f32 %v8001_v43, 0.0 }
 0x3f8   : > { %v5774_v18 = vmax.f32 %v7970_v29, 0.0  ;;  %v5776_v52 = vmax.f32 %v8002_v11, 0.0  ;;  %7910 = vmatprep.subr.bf16.mxu0 %v8978_v25 }
 0x3f9   : > { %v5775_v57 = vmax.f32 %v7971_v49, 0.0  ;;  %v5777_v40 = vmax.f32 %v8003_v37, 0.0 }
 0x3fa   : > { %v5829_v63 = vpack.c.bf16 %v5774_v18, %v5769_v26  ;;  %v5831_v9 = vpack.c.bf16 %v5776_v52, %v5771_v34 }
 0x3fb   : > { %v5830_v12 = vpack.c.bf16 %v5775_v57, %v5770_v45  ;;  %v5832_v44 = vpack.c.bf16 %v5777_v40, %v5772_v22  ;;  %v4860_v0 = vpop.f32.mrb[52].mxu0  ;;  %v5312_v59 = vpop.f32.mrb[36].mxu1  ;;  %7911 = vmatpush3.bf16.msra.mxu0 %v8978_v25 }
 0x3fc   : > { %v7972_v6 = vadd.f32 %v4860_v0, %v11434_v56  ;;  %v8004_v16 = vadd.f32 %v5312_v59, %v11439_v60  ;;  %v4862_v55 = vpop.f32.mrb[53].mxu0  ;;  %v5314_v47 = vpop.f32.mrb[37].mxu1  ;;  %6788 = vmatprep.subr.bf16.mxu0 %v12451_v30 }
 0x3fd   : > { %v7973_v5 = vadd.f32 %v4862_v55, %v11444_v62  ;;  %v8005_v46 = vadd.f32 %v5314_v47, %v11447_v17  ;;  %v4864_v20 = vpop.f32.mrb[54].mxu0  ;;  %v5316_v8 = vpop.f32.mrb[38].mxu1  ;;  %6240 = vmatprep.mubr.bf16.mxu0 %v5830_v12  ;;  %6337 = vmatprep.mubr.bf16.mxu1 %v5832_v44 }
 0x3fe   : > { %v7974_v33 = vadd.f32 %v4864_v20, %v11434_v56  ;;  %v8006_v39 = vadd.f32 %v5316_v8, %v11439_v60  ;;  %v4866_v41 = vpop.f32.mrb[55].mxu0  ;;  %v5318_v2 = vpop.f32.mrb[39].mxu1  ;;  %6241 = vmatmul.mubr.bf16.gmra.mrb[144].mxu0 %v5829_v63  ;;  %6338 = vmatmul.mubr.bf16.gmra.mrb[128].mxu1 %v5831_v9  ;;  %v5779_v24 = vmax.f32 %v7972_v6, 0.0  ;;  %v5781_v13 = vmax.f32 %v8004_v16, 0.0 }
 0x3ff   : > { %v7975_v58 = vadd.f32 %v4866_v41, %v11444_v62  ;;  %v8007_v51 = vadd.f32 %v5318_v2, %v11447_v17  ;;  %v5780_v4 = vmax.f32 %v7973_v5, 0.0  ;;  %v5782_v35 = vmax.f32 %v8005_v46, 0.0 }
 0x400   : > { %v5784_v15 = vmax.f32 %v7974_v33, 0.0  ;;  %v5786_v10 = vmax.f32 %v8006_v39, 0.0 }
 0x401   : > { %v5785_v54 = vmax.f32 %v7975_v58, 0.0  ;;  %v5787_v36 = vmax.f32 %v8007_v51, 0.0  ;;  %v2149_v51 = vsub.s32 4, %v12498_v50 }
 0x402   : > { %v5834_v32 = vpack.c.bf16 %v5784_v15, %v5779_v24  ;;  %v5836_v14 = vpack.c.bf16 %v5786_v10, %v5781_v13 }
 0x403   : > { %v5835_v3 = vpack.c.bf16 %v5785_v54, %v5780_v4  ;;  %v5837_v27 = vpack.c.bf16 %v5787_v36, %v5782_v35  ;;  %v4870_v42 = vpop.f32.mrb[56].mxu0  ;;  %v5322_v61 = vpop.f32.mrb[40].mxu1 }
 0x404   : > { %v7976_v1 = vadd.f32 %v4870_v42, %v11434_v56  ;;  %v8008_v31 = vadd.f32 %v5322_v61, %v11439_v60  ;;  %v4872_v21 = vpop.f32.mrb[57].mxu0  ;;  %v5324_v28 = vpop.f32.mrb[41].mxu1 }
 0x405   : > { %v7977_v25 = vadd.f32 %v4872_v21, %v11444_v62  ;;  %v8009_v19 = vadd.f32 %v5324_v28, %v11447_v17  ;;  %v4874_v43 = vpop.f32.mrb[58].mxu0  ;;  %v5326_v23 = vpop.f32.mrb[42].mxu1  ;;  %6248 = vmatprep.mubr.bf16.mxu0 %v5835_v3  ;;  %6345 = vmatprep.mubr.bf16.mxu1 %v5837_v27 }
 0x406   : > { %v7978_v38 = vadd.f32 %v4874_v43, %v11434_v56  ;;  %v8010_v29 = vadd.f32 %v5326_v23, %v11439_v60  ;;  %v4876_v11 = vpop.f32.mrb[59].mxu0  ;;  %v5328_v53 = vpop.f32.mrb[43].mxu1  ;;  %6249 = vmatmul.mubr.bf16.gmra.mrb[148].mxu0 %v5834_v32  ;;  %6346 = vmatmul.mubr.bf16.gmra.mrb[132].mxu1 %v5836_v14  ;;  %v5789_v37 = vmax.f32 %v7976_v1, 0.0  ;;  %v5791_v26 = vmax.f32 %v8008_v31, 0.0 }
 0x407   : > { %v7979_v7 = vadd.f32 %v4876_v11, %v11444_v62  ;;  %v8011_v49 = vadd.f32 %v5328_v53, %v11447_v17  ;;  %v5790_v52 = vmax.f32 %v7977_v25, 0.0  ;;  %v5792_v45 = vmax.f32 %v8009_v19, 0.0 }
 0x408   : > { %v5794_v34 = vmax.f32 %v7978_v38, 0.0  ;;  %v5796_v18 = vmax.f32 %v8010_v29, 0.0 }
 0x409   : > { %v5795_v22 = vmax.f32 %v7979_v7, 0.0  ;;  %v5797_v57 = vmax.f32 %v8011_v49, 0.0 }
 0x40a   : > { %v5839_v40 = vpack.c.bf16 %v5794_v34, %v5789_v37  ;;  %v5841_v63 = vpack.c.bf16 %v5796_v18, %v5791_v26 }
 0x40b   : > { %v5840_v9 = vpack.c.bf16 %v5795_v22, %v5790_v52  ;;  %v5842_v12 = vpack.c.bf16 %v5797_v57, %v5792_v45  ;;  %v4880_v44 = vpop.f32.mrb[60].mxu0  ;;  %v5332_v0 = vpop.f32.mrb[44].mxu1 }
 0x40c   : > { %v7980_v59 = vadd.f32 %v4880_v44, %v11434_v56  ;;  %v8012_v6 = vadd.f32 %v5332_v0, %v11439_v60  ;;  %v4882_v16 = vpop.f32.mrb[61].mxu0  ;;  %v5334_v55 = vpop.f32.mrb[45].mxu1 }
 0x40d   : > { %v7981_v47 = vadd.f32 %v4882_v16, %v11444_v62  ;;  %v8013_v5 = vadd.f32 %v5334_v55, %v11447_v17  ;;  %v4884_v46 = vpop.f32.mrb[62].mxu0  ;;  %v5336_v20 = vpop.f32.mrb[46].mxu1  ;;  %6256 = vmatprep.mubr.bf16.mxu0 %v5840_v9  ;;  %6353 = vmatprep.mubr.bf16.mxu1 %v5842_v12 }
 0x40e   : > { %v7982_v8 = vadd.f32 %v4884_v46, %v11434_v56  ;;  %v8014_v33 = vadd.f32 %v5336_v20, %v11439_v60  ;;  %v4886_v39 = vpop.f32.mrb[63].mxu0  ;;  %v5338_v41 = vpop.f32.mrb[47].mxu1  ;;  %6257 = vmatmul.mubr.bf16.gmra.mrb[152].mxu0 %v5839_v40  ;;  %6354 = vmatmul.mubr.bf16.gmra.mrb[136].mxu1 %v5841_v63  ;;  %v5799_v24 = vmax.f32 %v7980_v59, 0.0  ;;  %v5801_v13 = vmax.f32 %v8012_v6, 0.0 }
 0x40f   : > { %v7983_v2 = vadd.f32 %v4886_v39, %v11444_v62  ;;  %v8015_v58 = vadd.f32 %v5338_v41, %v11447_v17  ;;  %v5800_v4 = vmax.f32 %v7981_v47, 0.0  ;;  %v5802_v35 = vmax.f32 %v8013_v5, 0.0 }
 0x410   : > { %v5804_v15 = vmax.f32 %v7982_v8, 0.0  ;;  %v5806_v10 = vmax.f32 %v8014_v33, 0.0  ;;  %v11537_v62 = vrot.slane %v11428_v48, %v2149_v51 }
 0x411   : > { %v5805_v54 = vmax.f32 %v7983_v2, 0.0  ;;  %v5807_v56 = vmax.f32 %v8015_v58, 0.0 }
 0x412   : > { %v5844_v36 = vpack.c.bf16 %v5804_v15, %v5799_v24  ;;  %v5846_v60 = vpack.c.bf16 %v5806_v10, %v5801_v13 }
 0x413   : > { %v5845_v32 = vpack.c.bf16 %v5805_v54, %v5800_v4  ;;  %v5847_v14 = vpack.c.bf16 %v5807_v56, %v5802_v35  ;;  %v7544_v3 = vpop.f32.mrb[64].mxu0  ;;  %v7608_v27 = vpop.f32.mrb[48].mxu1 }
 0x414   : > { %v7545_v17 = vpop.f32.mrb[65].mxu0  ;;  %v7609_v42 = vpop.f32.mrb[49].mxu1 }
 0x415   : > { %v7546_v50 = vadd.f32 %v7545_v17, %v7544_v3  ;;  %v7610_v61 = vadd.f32 %v7609_v42, %v7608_v27  ;;  %v7547_v1 = vpop.f32.mrb[66].mxu0  ;;  %v7611_v31 = vpop.f32.mrb[50].mxu1  ;;  %6264 = vmatprep.mubr.bf16.mxu0 %v5845_v32  ;;  %6361 = vmatprep.mubr.bf16.mxu1 %v5847_v14 }
 0x416   : > { %v7548_v21 = vpop.f32.mrb[67].mxu0  ;;  %v7612_v28 = vpop.f32.mrb[51].mxu1  ;;  %6265 = vmatmul.mubr.bf16.gmra.mrb[156].mxu0 %v5844_v36  ;;  %6362 = vmatmul.mubr.bf16.gmra.mrb[140].mxu1 %v5846_v60 }
 0x417   : > { %v5376_v25 = vadd.f32 %v7546_v50, %v11537_v62  ;;  %v7549_v19 = vadd.f32 %v7548_v21, %v7547_v1  ;;  %v7613_v43 = vadd.f32 %v7612_v28, %v7611_v31 }
 0x419   : > { %v11540_v23 = vadd.f32 %v7610_v61, %v5376_v25  ;;  %v5379_v48 = vadd.f32 %v7549_v19, %v11537_v62 }
 0x41b   : > { %v11543_v38 = vadd.f32 %v7613_v43, %v5379_v48  ;;  %v7550_v29 = vpop.f32.mrb[68].mxu0  ;;  %v7614_v11 = vpop.f32.mrb[52].mxu1 }
 0x41c   : > { %v7551_v53 = vpop.f32.mrb[69].mxu0  ;;  %v7615_v7 = vpop.f32.mrb[53].mxu1 }
 0x41d   : > { %v7552_v49 = vadd.f32 %v7551_v53, %v7550_v29  ;;  %v7616_v37 = vadd.f32 %v7615_v7, %v7614_v11  ;;  %v7553_v26 = vpop.f32.mrb[70].mxu0  ;;  %v7617_v34 = vpop.f32.mrb[54].mxu1 }
 0x41e   : > { %v7554_v18 = vpop.f32.mrb[71].mxu0  ;;  %v7618_v52 = vpop.f32.mrb[55].mxu1 }
 0x41f   : > { %v5384_v45 = vadd.f32 %v7552_v49, %v11537_v62  ;;  %v7555_v22 = vadd.f32 %v7554_v18, %v7553_v26  ;;  %v7619_v57 = vadd.f32 %v7618_v52, %v7617_v34 }
 0x421   : > { %v11546_v40 = vadd.f32 %v7616_v37, %v5384_v45  ;;  %v5387_v63 = vadd.f32 %v7555_v22, %v11537_v62 }
 0x423   : > { %v11549_v9 = vadd.f32 %v7619_v57, %v5387_v63  ;;  %v7556_v12 = vpop.f32.mrb[72].mxu0  ;;  %v7620_v44 = vpop.f32.mrb[56].mxu1 }
 0x424   : > { %v7557_v0 = vpop.f32.mrb[73].mxu0  ;;  %v7621_v59 = vpop.f32.mrb[57].mxu1 }
 0x425   : > { %v7558_v6 = vadd.f32 %v7557_v0, %v7556_v12  ;;  %v7622_v16 = vadd.f32 %v7621_v59, %v7620_v44  ;;  %v7559_v55 = vpop.f32.mrb[74].mxu0  ;;  %v7623_v47 = vpop.f32.mrb[58].mxu1 }
 0x426   : > { %v7560_v5 = vpop.f32.mrb[75].mxu0  ;;  %v7624_v46 = vpop.f32.mrb[59].mxu1 }
 0x427   : > { %v5392_v20 = vadd.f32 %v7558_v6, %v11537_v62  ;;  %v7561_v8 = vadd.f32 %v7560_v5, %v7559_v55  ;;  %v7625_v33 = vadd.f32 %v7624_v46, %v7623_v47 }
 0x429   : > { %v11552_v39 = vadd.f32 %v7622_v16, %v5392_v20  ;;  %v5395_v41 = vadd.f32 %v7561_v8, %v11537_v62 }
 0x42b   : > { %v11555_v2 = vadd.f32 %v7625_v33, %v5395_v41  ;;  %v7562_v58 = vpop.f32.mrb[76].mxu0  ;;  %v7626_v51 = vpop.f32.mrb[60].mxu1 }
 0x42c   : > { %v7563_v24 = vpop.f32.mrb[77].mxu0  ;;  %v7627_v13 = vpop.f32.mrb[61].mxu1 }
 0x42d   : > { %v7564_v15 = vadd.f32 %v7563_v24, %v7562_v58  ;;  %v7628_v10 = vadd.f32 %v7627_v13, %v7626_v51  ;;  %v7565_v4 = vpop.f32.mrb[78].mxu0  ;;  %v7629_v35 = vpop.f32.mrb[62].mxu1 }
 0x42e   : > { %v7566_v54 = vpop.f32.mrb[79].mxu0  ;;  %v7630_v56 = vpop.f32.mrb[63].mxu1 }
 0x42f   : > { %v5400_v36 = vadd.f32 %v7564_v15, %v11537_v62  ;;  %v7567_v60 = vadd.f32 %v7566_v54, %v7565_v4  ;;  %v7631_v32 = vadd.f32 %v7630_v56, %v7629_v35 }
 0x431   : > { %v11558_v14 = vadd.f32 %v7628_v10, %v5400_v36  ;;  %v5403_v3 = vadd.f32 %v7567_v60, %v11537_v62 }
 0x433   : > { %v11561_v27 = vadd.f32 %v7631_v32, %v5403_v3  ;;  %v7568_v17 = vpop.f32.mrb[80].mxu0  ;;  %v7632_v42 = vpop.f32.mrb[64].mxu1 }
 0x434   : > { %v7569_v50 = vpop.f32.mrb[81].mxu0  ;;  %v7633_v61 = vpop.f32.mrb[65].mxu1 }
 0x435   : > { %v7570_v1 = vadd.f32 %v7569_v50, %v7568_v17  ;;  %v7634_v31 = vadd.f32 %v7633_v61, %v7632_v42  ;;  %v7571_v21 = vpop.f32.mrb[82].mxu0  ;;  %v7635_v28 = vpop.f32.mrb[66].mxu1 }
 0x436   : > { %v7572_v25 = vpop.f32.mrb[83].mxu0  ;;  %v7636_v19 = vpop.f32.mrb[67].mxu1 }
 0x437   : > { %v5408_v43 = vadd.f32 %v7570_v1, %v11537_v62  ;;  %v7573_v48 = vadd.f32 %v7572_v25, %v7571_v21  ;;  %v7637_v29 = vadd.f32 %v7636_v19, %v7635_v28 }
 0x439   : > { %v11564_v11 = vadd.f32 %v7634_v31, %v5408_v43  ;;  %v5411_v53 = vadd.f32 %v7573_v48, %v11537_v62 }
 0x43b   : > { %v11567_v7 = vadd.f32 %v7637_v29, %v5411_v53  ;;  %v7574_v49 = vpop.f32.mrb[84].mxu0  ;;  %v7638_v37 = vpop.f32.mrb[68].mxu1 }
 0x43c   : > { %v7575_v26 = vpop.f32.mrb[85].mxu0  ;;  %v7639_v34 = vpop.f32.mrb[69].mxu1 }
 0x43d   : > { %v7576_v18 = vadd.f32 %v7575_v26, %v7574_v49  ;;  %v7640_v52 = vadd.f32 %v7639_v34, %v7638_v37  ;;  %v7577_v45 = vpop.f32.mrb[86].mxu0  ;;  %v7641_v22 = vpop.f32.mrb[70].mxu1 }
 0x43e   : > { %v7578_v57 = vpop.f32.mrb[87].mxu0  ;;  %v7642_v63 = vpop.f32.mrb[71].mxu1 }
 0x43f   : > { %v5416_v12 = vadd.f32 %v7576_v18, %v11537_v62  ;;  %v7579_v44 = vadd.f32 %v7578_v57, %v7577_v45  ;;  %v7643_v0 = vadd.f32 %v7642_v63, %v7641_v22 }
 0x441   : > { %v11570_v59 = vadd.f32 %v7640_v52, %v5416_v12  ;;  %v5419_v6 = vadd.f32 %v7579_v44, %v11537_v62 }
 0x443   : > { %v11573_v16 = vadd.f32 %v7643_v0, %v5419_v6  ;;  %v7580_v55 = vpop.f32.mrb[88].mxu0  ;;  %v7644_v47 = vpop.f32.mrb[72].mxu1 }
 0x444   : > { %v7581_v5 = vpop.f32.mrb[89].mxu0  ;;  %v7645_v46 = vpop.f32.mrb[73].mxu1 }
 0x445   : > { %v7582_v20 = vadd.f32 %v7581_v5, %v7580_v55  ;;  %v7646_v8 = vadd.f32 %v7645_v46, %v7644_v47  ;;  %v7583_v33 = vpop.f32.mrb[90].mxu0  ;;  %v7647_v41 = vpop.f32.mrb[74].mxu1 }
 0x446   : > { %v7584_v58 = vpop.f32.mrb[91].mxu0  ;;  %v7648_v51 = vpop.f32.mrb[75].mxu1 }
 0x447   : > { %v5424_v24 = vadd.f32 %v7582_v20, %v11537_v62  ;;  %v7585_v13 = vadd.f32 %v7584_v58, %v7583_v33  ;;  %v7649_v15 = vadd.f32 %v7648_v51, %v7647_v41 }
 0x449   : > { %v11576_v10 = vadd.f32 %v7646_v8, %v5424_v24  ;;  %v5427_v4 = vadd.f32 %v7585_v13, %v11537_v62 }
 0x44b   : > { %v11579_v35 = vadd.f32 %v7649_v15, %v5427_v4  ;;  %v7586_v54 = vpop.f32.mrb[92].mxu0  ;;  %v7650_v56 = vpop.f32.mrb[76].mxu1 }
 0x44c   : > { %v7587_v36 = vpop.f32.mrb[93].mxu0  ;;  %v7651_v60 = vpop.f32.mrb[77].mxu1 }
 0x44d   : > { %v7588_v32 = vadd.f32 %v7587_v36, %v7586_v54  ;;  %v7652_v3 = vadd.f32 %v7651_v60, %v7650_v56  ;;  %v7589_v17 = vpop.f32.mrb[94].mxu0  ;;  %v7653_v42 = vpop.f32.mrb[78].mxu1 }
 0x44e   : > { %v7590_v50 = vpop.f32.mrb[95].mxu0  ;;  %v7654_v61 = vpop.f32.mrb[79].mxu1 }
 0x44f   : > { %v5432_v1 = vadd.f32 %v7588_v32, %v11537_v62  ;;  %v7591_v31 = vadd.f32 %v7590_v50, %v7589_v17  ;;  %v7655_v21 = vadd.f32 %v7654_v61, %v7653_v42 }
 0x451   : > { %v11582_v28 = vadd.f32 %v7652_v3, %v5432_v1  ;;  %v5435_v25 = vadd.f32 %v7591_v31, %v11537_v62 }
 0x453   : > { %v11585_v19 = vadd.f32 %v7655_v21, %v5435_v25  ;;  %v7672_v43 = vpop.f32.mrb[96].mxu0  ;;  %v5666_v48 = vpop.f32.mrb[80].mxu1 }
 0x454   : > { %v7673_v29 = vpop.f32.mrb[97].mxu0  ;;  %v5668_v53 = vpop.f32.mrb[81].mxu1 }
 0x455   : > { %v7674_v49 = vadd.f32 %v7673_v29, %v7672_v43  ;;  %v7675_v37 = vpop.f32.mrb[98].mxu0  ;;  %v5669_v26 = vpop.f32.mrb[82].mxu1 }
 0x456   : > { %v7676_v34 = vpop.f32.mrb[99].mxu0  ;;  %v5671_v18 = vpop.f32.mrb[83].mxu1 }
 0x457   : > { %v5570_v52 = vadd.f32 %v7674_v49, %v11540_v23  ;;  %v7677_v45 = vadd.f32 %v7676_v34, %v7675_v37 }
 0x459   : > { %v5667_v22 = vadd.f32 %v5666_v48, %v5570_v52  ;;  %v5573_v57 = vadd.f32 %v7677_v45, %v11543_v38 }
 0x45b   : > { %v5670_v63 = vadd.f32 %v5669_v26, %v5573_v57  ;;  %v7678_v12 = vpop.f32.mrb[100].mxu0  ;;  %v5674_v62 = vpop.f32.mrb[84].mxu1  ;;  %v5733_v6 = vmax.f32 %v5667_v22, 0.0 }
 0x45c   : > { %v7679_v44 = vpop.f32.mrb[101].mxu0  ;;  %v5676_v0 = vpop.f32.mrb[85].mxu1 }
 0x45d   : > { %v5738_v55 = vmax.f32 %v5670_v63, 0.0  ;;  %v7680_v47 = vadd.f32 %v7679_v44, %v7678_v12  ;;  %v7681_v5 = vpop.f32.mrb[102].mxu0  ;;  %v5677_v46 = vpop.f32.mrb[86].mxu1 }
 0x45e   : > { %v7682_v20 = vpop.f32.mrb[103].mxu0  ;;  %v5679_v8 = vpop.f32.mrb[87].mxu1 }
 0x45f   : > { %v5578_v33 = vadd.f32 %v7680_v47, %v11546_v40  ;;  %v7683_v41 = vadd.f32 %v7682_v20, %v7681_v5  ;;  %v5813_v23 = vpack.c.bf16 %v5738_v55, %v5733_v6 }
 0x461   : > { %v5675_v58 = vadd.f32 %v5674_v62, %v5578_v33  ;;  %v5581_v51 = vadd.f32 %v7683_v41, %v11549_v9  ;;  %7912 = vmatprep.mubr.bf16.mxu0 %v5813_v23 }
 0x463   : > { %v5678_v38 = vadd.f32 %v5677_v46, %v5581_v51  ;;  %v7684_v24 = vpop.f32.mrb[104].mxu0  ;;  %v5682_v13 = vpop.f32.mrb[88].mxu1  ;;  %v5743_v54 = vmax.f32 %v5675_v58, 0.0 }
 0x464   : > { %v7685_v15 = vpop.f32.mrb[105].mxu0  ;;  %v5684_v4 = vpop.f32.mrb[89].mxu1 }
 0x465   : > { %v5748_v56 = vmax.f32 %v5678_v38, 0.0  ;;  %v7686_v36 = vadd.f32 %v7685_v15, %v7684_v24  ;;  %v7687_v60 = vpop.f32.mrb[106].mxu0  ;;  %v5685_v32 = vpop.f32.mrb[90].mxu1 }
 0x466   : > { %v7688_v3 = vpop.f32.mrb[107].mxu0  ;;  %v5687_v17 = vpop.f32.mrb[91].mxu1 }
 0x467   : > { %v5818_v42 = vpack.c.bf16 %v5748_v56, %v5743_v54  ;;  %v5586_v40 = vadd.f32 %v7686_v36, %v11552_v39  ;;  %v7689_v50 = vadd.f32 %v7688_v3, %v7687_v60 }
 0x469   : > { %v5683_v61 = vadd.f32 %v5682_v13, %v5586_v40  ;;  %v5589_v9 = vadd.f32 %v7689_v50, %v11555_v2  ;;  %7913 = vmatmul.mubr.bf16.vlgmr.msra.gmra.mrb[160].mxu0 %v5818_v42 }
 0x46b   : > { %v5686_v1 = vadd.f32 %v5685_v32, %v5589_v9  ;;  %v7690_v31 = vpop.f32.mrb[108].mxu0  ;;  %v5690_v21 = vpop.f32.mrb[92].mxu1  ;;  %v5753_v48 = vmax.f32 %v5683_v61, 0.0 }
 0x46c   : > { %v7691_v25 = vpop.f32.mrb[109].mxu0  ;;  %v5692_v43 = vpop.f32.mrb[93].mxu1 }
 0x46d   : > { %v5758_v29 = vmax.f32 %v5686_v1, 0.0  ;;  %v7692_v53 = vadd.f32 %v7691_v25, %v7690_v31  ;;  %v7693_v49 = vpop.f32.mrb[110].mxu0  ;;  %v5693_v37 = vpop.f32.mrb[94].mxu1 }
 0x46e   : > { %v7694_v26 = vpop.f32.mrb[111].mxu0  ;;  %v5695_v34 = vpop.f32.mrb[95].mxu1 }
 0x46f   : > { %v5594_v18 = vadd.f32 %v7692_v53, %v11558_v14  ;;  %v7695_v39 = vadd.f32 %v7694_v26, %v7693_v49  ;;  %v5823_v52 = vpack.c.bf16 %v5758_v29, %v5753_v48 }
 0x471   : > { %v5691_v45 = vadd.f32 %v5690_v21, %v5594_v18  ;;  %v5597_v2 = vadd.f32 %v7695_v39, %v11561_v27  ;;  %7916 = vmatprep.mubr.bf16.mxu0 %v5823_v52 }
 0x473   : > { %v5694_v22 = vadd.f32 %v5693_v37, %v5597_v2  ;;  %v7696_v57 = vpop.f32.mrb[112].mxu0  ;;  %v5698_v63 = vpop.f32.mrb[96].mxu1  ;;  %v5763_v44 = vmax.f32 %v5691_v45, 0.0 }
 0x474   : > { %v7697_v12 = vpop.f32.mrb[113].mxu0  ;;  %v5700_v62 = vpop.f32.mrb[97].mxu1 }
 0x475   : > { %v5768_v0 = vmax.f32 %v5694_v22, 0.0  ;;  %v7698_v6 = vadd.f32 %v7697_v12, %v7696_v57  ;;  %v7699_v55 = vpop.f32.mrb[114].mxu0  ;;  %v5701_v47 = vpop.f32.mrb[98].mxu1 }
 0x476   : > { %v7700_v5 = vpop.f32.mrb[115].mxu0  ;;  %v5703_v46 = vpop.f32.mrb[99].mxu1 }
 0x477   : > { %v5602_v14 = vadd.f32 %v7698_v6, %v11564_v11  ;;  %v7701_v20 = vadd.f32 %v7700_v5, %v7699_v55  ;;  %v5828_v8 = vpack.c.bf16 %v5768_v0, %v5763_v44 }
 0x479   : > { %v5699_v33 = vadd.f32 %v5698_v63, %v5602_v14  ;;  %v5605_v27 = vadd.f32 %v7701_v20, %v11567_v7  ;;  %7917 = vmatmul.mubr.bf16.gmra.mrb[164].mxu0 %v5828_v8 }
 0x47b   : > { %v5702_v41 = vadd.f32 %v5701_v47, %v5605_v27  ;;  %v7702_v23 = vpop.f32.mrb[116].mxu0  ;;  %v5706_v58 = vpop.f32.mrb[100].mxu1  ;;  %v5773_v24 = vmax.f32 %v5699_v33, 0.0 }
 0x47c   : > { %v7703_v51 = vpop.f32.mrb[117].mxu0  ;;  %v5708_v38 = vpop.f32.mrb[101].mxu1 }
 0x47d   : > { %v5778_v13 = vmax.f32 %v5702_v41, 0.0  ;;  %v7704_v15 = vadd.f32 %v7703_v51, %v7702_v23  ;;  %v7705_v4 = vpop.f32.mrb[118].mxu0  ;;  %v5709_v54 = vpop.f32.mrb[102].mxu1 }
 0x47e   : > { %v7706_v56 = vpop.f32.mrb[119].mxu0  ;;  %v5711_v36 = vpop.f32.mrb[103].mxu1 }
 0x47f   : > { %v5610_v11 = vadd.f32 %v7704_v15, %v11570_v59  ;;  %v7707_v60 = vadd.f32 %v7706_v56, %v7705_v4  ;;  %v5833_v32 = vpack.c.bf16 %v5778_v13, %v5773_v24  ;;  %v11603_v4 = vld [vmem:[#allocation12] ss:$0 sm:$0xff] }
 0x481   : > { %v5707_v3 = vadd.f32 %v5706_v58, %v5610_v11  ;;  %v5613_v7 = vadd.f32 %v7707_v60, %v11573_v16  ;;  %7920 = vmatprep.mubr.bf16.mxu0 %v5833_v32 }
 0x483   : > { %v5710_v17 = vadd.f32 %v5709_v54, %v5613_v7  ;;  %v7708_v42 = vpop.f32.mrb[120].mxu0  ;;  %v5714_v40 = vpop.f32.mrb[104].mxu1  ;;  %v5783_v9 = vmax.f32 %v5707_v3, 0.0 }
 0x484   : > { %v7709_v50 = vpop.f32.mrb[121].mxu0  ;;  %v5716_v61 = vpop.f32.mrb[105].mxu1 }
 0x485   : > { %v5788_v1 = vmax.f32 %v5710_v17, 0.0  ;;  %v7710_v31 = vadd.f32 %v7709_v50, %v7708_v42  ;;  %v7711_v21 = vpop.f32.mrb[122].mxu0  ;;  %v5717_v25 = vpop.f32.mrb[106].mxu1 }
 0x486   : > { %v7712_v43 = vpop.f32.mrb[123].mxu0  ;;  %v5719_v48 = vpop.f32.mrb[107].mxu1 }
 0x487   : > { %v5618_v59 = vadd.f32 %v7710_v31, %v11576_v10  ;;  %v7713_v29 = vadd.f32 %v7712_v43, %v7711_v21  ;;  %v5838_v53 = vpack.c.bf16 %v5788_v1, %v5783_v9 }
 0x489   : > { %v5715_v49 = vadd.f32 %v5714_v40, %v5618_v59  ;;  %v5621_v16 = vadd.f32 %v7713_v29, %v11579_v35  ;;  %7921 = vmatmul.mubr.bf16.gmra.mrb[168].mxu0 %v5838_v53 }
 0x48b   : > { %v5718_v37 = vadd.f32 %v5717_v25, %v5621_v16  ;;  %v7714_v26 = vpop.f32.mrb[124].mxu0  ;;  %v5722_v34 = vpop.f32.mrb[108].mxu1  ;;  %v5793_v52 = vmax.f32 %v5715_v49, 0.0 }
 0x48c   : > { %v7715_v18 = vpop.f32.mrb[125].mxu0  ;;  %v5724_v39 = vpop.f32.mrb[109].mxu1 }
 0x48d   : > { %v5798_v45 = vmax.f32 %v5718_v37, 0.0  ;;  %v7716_v2 = vadd.f32 %v7715_v18, %v7714_v26  ;;  %v7717_v22 = vpop.f32.mrb[126].mxu0  ;;  %v5725_v57 = vpop.f32.mrb[110].mxu1 }
 0x48e   : > { %v7718_v63 = vpop.f32.mrb[127].mxu0  ;;  %v5727_v12 = vpop.f32.mrb[111].mxu1 }
 0x48f   : > { %v5626_v10 = vadd.f32 %v7716_v2, %v11582_v28  ;;  %v7719_v62 = vadd.f32 %v7718_v63, %v7717_v22  ;;  %v5843_v44 = vpack.c.bf16 %v5798_v45, %v5793_v52 }
 0x491   : > { %v5723_v0 = vadd.f32 %v5722_v34, %v5626_v10  ;;  %v5629_v35 = vadd.f32 %v7719_v62, %v11585_v19  ;;  %7924 = vmatprep.mubr.bf16.mxu0 %v5843_v44 }
 0x493   : > { %v5726_v6 = vadd.f32 %v5725_v57, %v5629_v35  ;;  %v5803_v55 = vmax.f32 %v5723_v0, 0.0 }
 0x495   : > { %v5808_v47 = vmax.f32 %v5726_v6, 0.0 }
 0x497   : > { %v5848_v5 = vpack.c.bf16 %v5808_v47, %v5803_v55 }
 0x499   : > { %7925 = vmatmul.mubr.bf16.gmra.mrb[172].mxu0 %v5848_v5 }
 0x4b1   : > { %v7736_v46 = vpop.f32.mrb[128].mxu0  ;;  %v7800_v14 = vpop.f32.mrb[112].mxu1 }
 0x4b2   : > { %v7737_v20 = vpop.f32.mrb[129].mxu0  ;;  %v7801_v8 = vpop.f32.mrb[113].mxu1 }
 0x4b3   : > { %v7738_v33 = vadd.f32 %v7737_v20, %v7736_v46  ;;  %v7802_v27 = vadd.f32 %v7801_v8, %v7800_v14  ;;  %v7739_v41 = vpop.f32.mrb[130].mxu0  ;;  %v7803_v23 = vpop.f32.mrb[114].mxu1 }
 0x4b4   : > { %v7740_v28 = vpop.f32.mrb[131].mxu0  ;;  %v7804_v58 = vpop.f32.mrb[115].mxu1 }
 0x4b5   : > { %v7741_v51 = vadd.f32 %v7740_v28, %v7739_v41  ;;  %v7805_v38 = vadd.f32 %v7804_v58, %v7803_v23  ;;  %v6211_v42 = vadd.f32 %v7738_v33, %v11603_v4 }
 0x4b7   : > { %v6214_v61 = vadd.f32 %v7741_v51, %v11603_v4  ;;  %v11611_v25 = vadd.f32 %v7802_v27, %v6211_v42 }
 0x4b9   : > { %v7742_v24 = vpop.f32.mrb[132].mxu0  ;;  %v7806_v19 = vpop.f32.mrb[116].mxu1  ;;  %v11615_v37 = vadd.f32 %v7805_v38, %v6214_v61 }
 0x4ba   : > { %v7743_v13 = vpop.f32.mrb[133].mxu0  ;;  %v7807_v15 = vpop.f32.mrb[117].mxu1 }
 0x4bb   : > { %v7744_v54 = vadd.f32 %v7743_v13, %v7742_v24  ;;  %v7808_v56 = vadd.f32 %v7807_v15, %v7806_v19  ;;  %v7745_v36 = vpop.f32.mrb[134].mxu0  ;;  %v7809_v11 = vpop.f32.mrb[118].mxu1 }
 0x4bc   : > { %v7746_v60 = vpop.f32.mrb[135].mxu0  ;;  %v7810_v32 = vpop.f32.mrb[119].mxu1 }
 0x4bd   : > { %v6219_v3 = vadd.f32 %v7744_v54, %v11603_v4  ;;  %v7747_v7 = vadd.f32 %v7746_v60, %v7745_v36  ;;  %v7811_v17 = vadd.f32 %v7810_v32, %v7809_v11 }
 0x4bf   : > { %v6222_v40 = vadd.f32 %v7747_v7, %v11603_v4  ;;  %v11608_v50 = vadd.f32 %v7808_v56, %v6219_v3 }
 0x4c1   : > { %v7748_v9 = vpop.f32.mrb[136].mxu0  ;;  %v7812_v1 = vpop.f32.mrb[120].mxu1  ;;  %v11613_v53 = vadd.f32 %v7811_v17, %v6222_v40 }
 0x4c2   : > { %v7749_v31 = vpop.f32.mrb[137].mxu0  ;;  %v7813_v21 = vpop.f32.mrb[121].mxu1 }
 0x4c3   : > { %v7750_v43 = vadd.f32 %v7749_v31, %v7748_v9  ;;  %v7814_v48 = vadd.f32 %v7813_v21, %v7812_v1  ;;  %v7751_v59 = vpop.f32.mrb[138].mxu0  ;;  %v7815_v29 = vpop.f32.mrb[122].mxu1 }
 0x4c4   : > { %v7752_v49 = vpop.f32.mrb[139].mxu0  ;;  %v7816_v16 = vpop.f32.mrb[123].mxu1 }
 0x4c5   : > { %v7753_v26 = vadd.f32 %v7752_v49, %v7751_v59  ;;  %v7817_v34 = vadd.f32 %v7816_v16, %v7815_v29  ;;  %v6227_v35 = vadd.f32 %v7750_v43, %v11603_v4 }
 0x4c7   : > { %v6230_v47 = vadd.f32 %v7753_v26, %v11603_v4  ;;  %v11623_v8 = vadd.f32 %v7814_v48, %v6227_v35 }
 0x4c9   : > { %v7754_v18 = vpop.f32.mrb[140].mxu0  ;;  %v7818_v39 = vpop.f32.mrb[124].mxu1  ;;  %v11627_v38 = vadd.f32 %v7817_v34, %v6230_v47 }
 0x4ca   : > { %v7755_v52 = vpop.f32.mrb[141].mxu0  ;;  %v7819_v45 = vpop.f32.mrb[125].mxu1 }
 0x4cb   : > { %v7756_v2 = vadd.f32 %v7755_v52, %v7754_v18  ;;  %v7820_v22 = vadd.f32 %v7819_v45, %v7818_v39  ;;  %v7757_v57 = vpop.f32.mrb[142].mxu0  ;;  %v7821_v63 = vpop.f32.mrb[126].mxu1 }
 0x4cc   : > { %v7758_v12 = vpop.f32.mrb[143].mxu0  ;;  %v7822_v10 = vpop.f32.mrb[127].mxu1 }
 0x4cd   : > { %v6235_v62 = vadd.f32 %v7756_v2, %v11603_v4  ;;  %v7759_v44 = vadd.f32 %v7758_v12, %v7757_v57  ;;  %v7823_v0 = vadd.f32 %v7822_v10, %v7821_v63 }
 0x4cf   : > { %v6238_v6 = vadd.f32 %v7759_v44, %v11603_v4  ;;  %v11620_v55 = vadd.f32 %v7820_v22, %v6235_v62 }
 0x4d1   : > { %v7760_v5 = vpop.f32.mrb[144].mxu0  ;;  %v7824_v46 = vpop.f32.mrb[128].mxu1  ;;  %v11625_v28 = vadd.f32 %v7823_v0, %v6238_v6 }
 0x4d2   : > { %v7761_v14 = vpop.f32.mrb[145].mxu0  ;;  %v7825_v20 = vpop.f32.mrb[129].mxu1 }
 0x4d3   : > { %v7762_v33 = vadd.f32 %v7761_v14, %v7760_v5  ;;  %v7826_v27 = vadd.f32 %v7825_v20, %v7824_v46  ;;  %v7763_v41 = vpop.f32.mrb[146].mxu0  ;;  %v7827_v23 = vpop.f32.mrb[130].mxu1 }
 0x4d4   : > { %v7764_v58 = vpop.f32.mrb[147].mxu0  ;;  %v7828_v51 = vpop.f32.mrb[131].mxu1 }
 0x4d5   : > { %v7765_v24 = vadd.f32 %v7764_v58, %v7763_v41  ;;  %v7829_v19 = vadd.f32 %v7828_v51, %v7827_v23  ;;  %v6243_v61 = vadd.f32 %v7762_v33, %v11603_v4 }
 0x4d7   : > { %v6246_v31 = vadd.f32 %v7765_v24, %v11603_v4  ;;  %v11635_v29 = vadd.f32 %v7826_v27, %v6243_v61  ;;  %v8979_v24 = vld [vmem:[%s11918_s7] sm:$0xff]  }
 0x4d8   : > { %7940 = vmatpush1.bf16.msra.mxu1 %v8979_v24  ;;  %6789 = vmatpush1.bf16.msra.mxu0 %v8979_v24  ;;  %v12515_v24 = vld [vmem:[#allocation31_spill] sm:$0xff] }
 0x4d9   : > { %v7766_v13 = vpop.f32.mrb[148].mxu0  ;;  %v7830_v15 = vpop.f32.mrb[132].mxu1  ;;  %v11639_v45 = vadd.f32 %v7829_v19, %v6246_v31  ;;  %v8980_v19 = vld [vmem:[%s11918_s7 + $0x8] sm:$0xff]   ;;  %7929 = vmatprep.subr.bf16.mxu1 %v12451_v30  ;;  %6790 = vmatprep.subr.bf16.mxu0 %v12451_v30  ;;  %vm12516_vm15 = vnez %v12515_v24 }
 0x4da   : > { %v7767_v54 = vpop.f32.mrb[149].mxu0  ;;  %v7831_v56 = vpop.f32.mrb[133].mxu1 }
 0x4db   : > { %v7768_v36 = vadd.f32 %v7767_v54, %v7766_v13  ;;  %v7832_v11 = vadd.f32 %v7831_v56, %v7830_v15  ;;  %v7769_v60 = vpop.f32.mrb[150].mxu0  ;;  %v7833_v32 = vpop.f32.mrb[134].mxu1  ;;  %v8982_v13 = vld [vmem:[%s11918_s7 + $0x18] sm:$0xff]   ;;  %v8983_v15 = vld [vmem:[%s11918_s7 + $0x20] sm:$0xff]   ;;  %v8984_v54 = vld [vmem:[%s11918_s7 + $0x28] sm:$0xff]  }
 0x4dc   : > { %v7770_v3 = vpop.f32.mrb[151].mxu0  ;;  %v7834_v7 = vpop.f32.mrb[135].mxu1  ;;  %7941 = vmatpush1.bf16.msra.mxu1 %v8980_v19  ;;  %6791 = vmatpush1.bf16.msra.mxu0 %v8980_v19  ;;  %v8985_v56 = vld [vmem:[%s11918_s7 + $0x30] sm:$0xff]   ;;  %v12518_v19 = vld [vmem:[#allocation28_spill] sm:$0xff] }
 0x4dd   : > { %v6251_v17 = vadd.f32 %v7768_v36, %v11603_v4  ;;  %v7771_v42 = vadd.f32 %v7770_v3, %v7769_v60  ;;  %v7835_v40 = vadd.f32 %v7834_v7, %v7833_v32  ;;  %7930 = vmatprep.subr.bf16.mxu1 %v12451_v30  ;;  %6792 = vmatprep.subr.bf16.mxu0 %v12451_v30  ;;  %v8986_v36 = vld [vmem:[%s11918_s7 + $0x38] sm:$0xff]   ;;  %v8988_v60 = vld [vmem:[%s11918_s7 + $0x48] sm:$0xff]   ;;  %v8989_v32 = vld [vmem:[%s11918_s7 + $0x50] sm:$0xff]  }
 0x4df   : > { %v6254_v9 = vadd.f32 %v7771_v42, %v11603_v4  ;;  %v11632_v1 = vadd.f32 %v7832_v11, %v6251_v17  ;;  %v8987_v11 = vld [vmem:[%s11918_s7 + $0x40] sm:$0xff]  }
 0x4e1   : > { %v7772_v21 = vpop.f32.mrb[152].mxu0  ;;  %v7836_v43 = vpop.f32.mrb[136].mxu1  ;;  %v11637_v18 = vadd.f32 %v7835_v40, %v6254_v9 }
 0x4e2   : > { %v7773_v48 = vpop.f32.mrb[153].mxu0  ;;  %v7837_v59 = vpop.f32.mrb[137].mxu1 }
 0x4e3   : > { %v7774_v49 = vadd.f32 %v7773_v48, %v7772_v21  ;;  %v7838_v16 = vadd.f32 %v7837_v59, %v7836_v43  ;;  %v7775_v26 = vpop.f32.mrb[154].mxu0  ;;  %v7839_v34 = vpop.f32.mrb[138].mxu1  ;;  %v12502_v48 = vld [vmem:[#allocation24_spill] sm:$0xff] }
 0x4e4   : > { %v7776_v39 = vpop.f32.mrb[155].mxu0  ;;  %v7840_v52 = vpop.f32.mrb[139].mxu1  ;;  %vm12503_vm7 = vnez %v12502_v48 }
 0x4e5   : > { %v7777_v2 = vadd.f32 %v7776_v39, %v7775_v26  ;;  %v7841_v22 = vadd.f32 %v7840_v52, %v7839_v34  ;;  %v6259_v20 = vadd.f32 %v7774_v49, %v11603_v4  ;;  %v8990_v34 = vld [vmem:[%s11918_s7 + $0x58] sm:$0xff]  }
 0x4e7   : > { %v6262_v41 = vadd.f32 %v7777_v2, %v11603_v4  ;;  %v11647_v23 = vadd.f32 %v7838_v16, %v6259_v20 }
 0x4e9   : > { %v7778_v57 = vpop.f32.mrb[156].mxu0  ;;  %v7842_v63 = vpop.f32.mrb[140].mxu1  ;;  %v11651_v51 = vadd.f32 %v7841_v22, %v6262_v41 }
 0x4ea   : > { %v7779_v12 = vpop.f32.mrb[157].mxu0  ;;  %v7843_v10 = vpop.f32.mrb[141].mxu1 }
 0x4eb   : > { %v7780_v62 = vadd.f32 %v7779_v12, %v7778_v57  ;;  %v7844_v44 = vadd.f32 %v7843_v10, %v7842_v63  ;;  %v7781_v0 = vpop.f32.mrb[158].mxu0  ;;  %v7845_v35 = vpop.f32.mrb[142].mxu1 }
 0x4ec   : > { %v7782_v6 = vpop.f32.mrb[159].mxu0  ;;  %v7846_v47 = vpop.f32.mrb[143].mxu1 }
 0x4ed   : > { %v6267_v5 = vadd.f32 %v7780_v62, %v11603_v4  ;;  %v7783_v46 = vadd.f32 %v7782_v6, %v7781_v0  ;;  %v7847_v14 = vadd.f32 %v7846_v47, %v7845_v35 }
 0x4ef   : > { %v6270_v33 = vadd.f32 %v7783_v46, %v11603_v4  ;;  %v11644_v27 = vadd.f32 %v7844_v44, %v6267_v5  ;;  %v8981_v4 = vld [vmem:[%s11918_s7 + $0x10] sm:$0xff]  }
 0x4f0   : > { %7942 = vmatpush1.bf16.msra.mxu1 %v8981_v4  ;;  %6793 = vmatpush1.bf16.msra.mxu0 %v8981_v4 }
 0x4f1   : > { %v11649_v58 = vadd.f32 %v7847_v14, %v6270_v33  ;;  %7931 = vmatprep.subr.bf16.mxu1 %v12451_v30  ;;  %6794 = vmatprep.subr.bf16.mxu0 %v12451_v30 }
 0x4f4   : > { %7943 = vmatpush1.bf16.msra.mxu1 %v8982_v13  ;;  %6795 = vmatpush1.bf16.msra.mxu0 %v8982_v13 }
 0x4f5   : > { %7932 = vmatprep.subr.bf16.mxu1 %v12451_v30  ;;  %6796 = vmatprep.subr.bf16.mxu0 %v12451_v30 }
 0x4f8   : > { %7944 = vmatpush1.bf16.msra.mxu1 %v8983_v15  ;;  %6797 = vmatpush1.bf16.msra.mxu0 %v8983_v15 }
 0x4f9   : > { %7933 = vmatprep.subr.bf16.mxu1 %v12451_v30  ;;  %6798 = vmatprep.subr.bf16.mxu0 %v12451_v30 }
 0x4fc   : > { %7945 = vmatpush1.bf16.msra.mxu1 %v8984_v54  ;;  %6799 = vmatpush1.bf16.msra.mxu0 %v8984_v54 }
 0x4fd   : > { %7934 = vmatprep.subr.bf16.mxu1 %v12451_v30  ;;  %6800 = vmatprep.subr.bf16.mxu0 %v12451_v30 }
 0x500   : > { %7946 = vmatpush1.bf16.msra.mxu1 %v8985_v56  ;;  %6801 = vmatpush1.bf16.msra.mxu0 %v8985_v56 }
 0x501   : > { %7935 = vmatprep.subr.bf16.mxu1 %v12451_v30  ;;  %6802 = vmatprep.subr.bf16.mxu0 %v12451_v30 }
 0x504   : > { %7947 = vmatpush1.bf16.msra.mxu1 %v8986_v36  ;;  %6803 = vmatpush1.bf16.msra.mxu0 %v8986_v36 }
 0x505   : > { %7936 = vmatprep.subr.bf16.mxu1 %v12451_v30  ;;  %6804 = vmatprep.subr.bf16.mxu0 %v12451_v30 }
 0x508   : > { %7948 = vmatpush1.bf16.msra.mxu1 %v8987_v11  ;;  %6805 = vmatpush1.bf16.msra.mxu0 %v8987_v11 }
 0x509   : > { %7937 = vmatprep.subr.bf16.mxu1 %v12451_v30  ;;  %6806 = vmatprep.subr.bf16.mxu0 %v12451_v30 }
 0x50c   : > { %7949 = vmatpush1.bf16.msra.mxu1 %v8988_v60  ;;  %6807 = vmatpush1.bf16.msra.mxu0 %v8988_v60 }
 0x50d   : > { %7938 = vmatprep.subr.bf16.mxu1 %v12451_v30  ;;  %6808 = vmatprep.subr.bf16.mxu0 %v12451_v30 }
 0x510   : > { %7950 = vmatpush1.bf16.msra.mxu1 %v8989_v32  ;;  %6809 = vmatpush1.bf16.msra.mxu0 %v8989_v32 }
 0x511   : > { %7939 = vmatprep.subr.bf16.mxu1 %v12451_v30  ;;  %6810 = vmatprep.subr.bf16.mxu0 %v12451_v30 }
 0x514   : > { %7951 = vmatpush1.bf16.msra.mxu1 %v8990_v34  ;;  %6811 = vmatpush1.bf16.msra.mxu0 %v8990_v34 }
 0x53c   : > { %v7914_v3 = vpop.f32.mrb[160].mxu0 }
 0x53d   : > { %v6413_v7 = vadd.f32 %v7914_v3, %v11608_v50  ;;  %v6404_v17 = vpop.f32.mrb[161].mxu0 }
 0x53e   : > { %v6405_v42 = vadd.f32 %v6404_v17, %v11611_v25  ;;  %v7915_v40 = vpop.f32.mrb[162].mxu0 }
 0x53f   : > { %v6469_v61 = vmax.f32 %v6413_v7, 0.0  ;;  %v6416_v9 = vadd.f32 %v7915_v40, %v11613_v53  ;;  %v6407_v31 = vpop.f32.mrb[163].mxu0 }
 0x540   : > { %v6467_v21 = vmax.f32 %v6405_v42, 0.0  ;;  %v6408_v43 = vadd.f32 %v6407_v31, %v11615_v37 }
 0x541   : > { %v6485_v59 = vsel %vm12503_vm7, %v6469_v61, 0.0  ;;  %v6470_v49 = vmax.f32 %v6416_v9, 0.0  ;;  %vm12517_vm7 = vmmov %vm12493_vm0 }
 0x542   : > { %6503 = vst.msk [vmem:[#allocation3 + $0x18] sm:$0xff] %vm12493_vm0, %v6485_v59  ;;  %v6483_v50 = vsel %vm9701_vm1, %v6467_v21, 0.0  ;;  %v6468_v16 = vmax.f32 %v6408_v43, 0.0  ;;  %vm12510_vm1 = vmmov %vm12493_vm0 }
 0x543   : > { %6501 = vst.msk [vmem:[#allocation3 + $0x8] sm:$0xff] %vm12505_vm14, %v6483_v50  ;;  %v6486_v26 = vsel %vm9719_vm5, %v6470_v49, 0.0  ;;  %vm12514_vm5 = vmmov %vm12493_vm0 }
 0x544   : > { %6504 = vst.msk [vmem:[#allocation3 + $0x20] sm:$0xff] %vm12507_vm3, %v6486_v26  ;;  %v6484_v37 = vsel %vm9706_vm2, %v6468_v16, 0.0  ;;  %vm12512_vm2 = vmmov %vm12493_vm0  ;;  %vm12519_vm0 = vnez %v12518_v19 }
 0x545   : > { %6502 = vst.msk [vmem:[#allocation3 + $0x10] sm:$0xff] %vm12509_vm8, %v6484_v37  ;;  %vm12520_vm14 = vmmov %vm12510_vm1 }
 0x546   : > { %vm12525_vm3 = vmmov %vm12510_vm1 }
 0x547   : > { %vm12527_vm8 = vmmov %vm12510_vm1 }
 0x549   : > { %v6535_v39 = vld [vmem:[#allocation3 + $0x18] sm:$0xff] }
 0x54b   : > { %v6536_v52 = vld [vmem:[#allocation3 + $0x20] sm:$0xff] }
 0x54c   : > { %v7918_v2 = vpop.f32.mrb[164].mxu0  ;;  %v8439_v22 = vpack.i.bf16 %v6536_v52, %v6535_v39  ;;  %v6549_v57 = vld [vmem:[#allocation3 + $0x9] sm:$0xff]  ;;  %v6550_v63 = vld [vmem:[#allocation3 + $0x11] sm:$0xff]  ;;  %v6551_v4 = vld [vmem:[#allocation3 + $0x19] sm:$0xff] }
 0x54d   : > { %v6429_v12 = vadd.f32 %v7918_v2, %v11620_v55  ;;  %v6420_v10 = vpop.f32.mrb[165].mxu0  ;;  %v6646_v62 = vpack.c.bf16 %v6550_v63, %v6549_v57  ;;  %v6534_v57 = vld [vmem:[#allocation3 + $0x10] sm:$0xff] }
 0x54e   : > { %v6421_v44 = vadd.f32 %v6420_v10, %v11623_v8  ;;  %v7919_v0 = vpop.f32.mrb[166].mxu0  ;;  %8440 = vrot.lane.b32.xlu0 %v8439_v22, %s9270_s4 }
 0x54f   : > { %v6473_v35 = vmax.f32 %v6429_v12, 0.0  ;;  %v6432_v6 = vadd.f32 %v7919_v0, %v11625_v28  ;;  %v6423_v47 = vpop.f32.mrb[167].mxu0  ;;  %7497 = vmatprep.mubr.msk.bf16.mxu0 %vm12510_vm1, %v6646_v62  ;;  %v6533_v0 = vld [vmem:[#allocation3 + $0x8] sm:$0xff] }
 0x550   : > { %v6471_v5 = vmax.f32 %v6421_v44, 0.0  ;;  %v6424_v46 = vadd.f32 %v6423_v47, %v11627_v38  ;;  %v8469_v47 = vpack.i.bf16 %v6534_v57, %v6533_v0 }
 0x551   : > { %v6489_v20 = vsel %vm9822_vm9, %v6473_v35, 0.0  ;;  %v6474_v55 = vmax.f32 %v6432_v6, 0.0  ;;  %vm12523_vm9 = vmmov %vm12510_vm1 }
 0x552   : > { %6507 = vst.msk [vmem:[#allocation3 + $0x38] sm:$0xff] %vm12512_vm2, %v6489_v20  ;;  %v6487_v8 = vsel %vm9761_vm6, %v6471_v5, 0.0  ;;  %v6472_v41 = vmax.f32 %v6424_v46, 0.0  ;;  %vm12521_vm6 = vmmov %vm12510_vm1 }
 0x553   : > { %6505 = vst.msk [vmem:[#allocation3 + $0x28] sm:$0xff] %vm12514_vm5, %v6487_v8  ;;  %v6490_v28 = vsel %vm12516_vm15, %v6474_v55, 0.0  ;;  %vm12536_vm2 = vmmov %vm12510_vm1 }
 0x554   : > { %6508 = vst.msk [vmem:[#allocation3 + $0x40] sm:$0xff] %vm12517_vm7, %v6490_v28  ;;  %v6488_v38 = vsel %vm12519_vm0, %v6472_v41, 0.0  ;;  %vm12540_vm15 = vmmov %vm12510_vm1 }
 0x555   : > { %6506 = vst.msk [vmem:[#allocation3 + $0x30] sm:$0xff] %vm12520_vm14, %v6488_v38  ;;  %vm12541_vm7 = vmmov %vm12510_vm1 }
 0x556   : > { %vm12542_vm0 = vmmov %vm12510_vm1 }
 0x557   : > { %vm12543_vm14 = vmmov %vm12542_vm0 }
 0x559   : > { %v6539_v54 = vld [vmem:[#allocation3 + $0x38] sm:$0xff] }
 0x55a   : > { %v6552_v13 = vld [vmem:[#allocation3 + $0x21] sm:$0xff] }
 0x55b   : > { %v6648_v15 = vpack.c.bf16 %v6552_v13, %v6551_v4  ;;  %v6540_v56 = vld [vmem:[#allocation3 + $0x40] sm:$0xff]  ;;  %v6537_v60 = vld [vmem:[#allocation3 + $0x28] sm:$0xff] }
 0x55c   : > { %v7922_v36 = vpop.f32.mrb[168].mxu0  ;;  %v8449_v11 = vpack.i.bf16 %v6540_v56, %v6539_v54  ;;  %v6538_v32 = vld [vmem:[#allocation3 + $0x30] sm:$0xff]  ;;  %v6520_v54 = vld [vmem:[#allocation3 + $0x1f] sm:$0xff] }
 0x55d   : > { %v6445_v3 = vadd.f32 %v7922_v36, %v11632_v1  ;;  %v6436_v7 = vpop.f32.mrb[169].mxu0  ;;  %7498 = vmatprep.mubr.msk.bf16.mxu1 %vm12521_vm6, %v6648_v15  ;;  %v8444_v17 = vpack.i.bf16 %v6538_v32, %v6537_v60  ;;  %v6519_v56 = vld [vmem:[#allocation3 + $0x17] sm:$0xff]  ;;  %v6553_v36 = vld [vmem:[#allocation3 + $0x29] sm:$0xff]  ;;  %vm12544_vm6 = vmmov %vm12542_vm0 }
 0x55e   : > { %v6437_v42 = vadd.f32 %v6436_v7, %v11635_v29  ;;  %v7923_v40 = vpop.f32.mrb[170].mxu0  ;;  %8450 = vrot.lane.b32.xlu0 %v8449_v11, %s9270_s4  ;;  %v6554_v11 = vld [vmem:[#allocation3 + $0x31] sm:$0xff] }
 0x55f   : > { %v6477_v61 = vmax.f32 %v6445_v3, 0.0  ;;  %v6448_v9 = vadd.f32 %v7923_v40, %v11637_v18  ;;  %v6439_v31 = vpop.f32.mrb[171].mxu0  ;;  %8445 = vrot.lane.b32.xlu1 %v8444_v17, %s9270_s4  ;;  %v6650_v7 = vpack.c.bf16 %v6554_v11, %v6553_v36  ;;  %v6523_v50 = vld [vmem:[#allocation3 + $0x37] sm:$0xff] }
 0x560   : > { %v6475_v21 = vmax.f32 %v6437_v42, 0.0  ;;  %v6440_v43 = vadd.f32 %v6439_v31, %v11639_v45  ;;  %v6522_v31 = vld [vmem:[#allocation3 + $0x2f] sm:$0xff] }
 0x561   : > { %v6493_v1 = vsel %vm9946_vm13, %v6477_v61, 0.0  ;;  %v6478_v59 = vmax.f32 %v6448_v9, 0.0  ;;  %v6521_v9 = vld [vmem:[#allocation3 + $0x27] sm:$0xff] }
 0x562   : > { %6511 = vst.msk [vmem:[#allocation3 + $0x58] sm:$0xff] %vm12523_vm9, %v6493_v1  ;;  %v6491_v29 = vsel %vm9873_vm11, %v6475_v21, 0.0  ;;  %v6476_v30 = vmax.f32 %v6440_v43, 0.0  ;;  %vm12530_vm11 = vmmov %vm12510_vm1 }
 0x563   : > { %6509 = vst.msk [vmem:[#allocation3 + $0x48] sm:$0xff] %vm12525_vm3, %v6491_v29  ;;  %v6494_v18 = vsel %vm12174_vm4, %v6478_v59, 0.0  ;;  %vm12533_vm4 = vmmov %vm12510_vm1  ;;  %v6555_v59 = vld [vmem:[#allocation3 + $0x39] sm:$0xff] }
 0x564   : > { %6512 = vst.msk [vmem:[#allocation3 + $0x60] sm:$0xff] %vm12527_vm8, %v6494_v18  ;;  %v6492_v45 = vsel %vm12178_vm10, %v6476_v30, 0.0  ;;  %vm12545_vm9 = vmmov %vm12542_vm0  ;;  %v6524_v18 = vld [vmem:[#allocation3 + $0x3f] sm:$0xff] }
 0x565   : > { %6510 = vst.msk [vmem:[#allocation3 + $0x50] sm:$0xff] %vm12510_vm1, %v6492_v45  ;;  %vm12546_vm3 = vmmov %vm12542_vm0 }
 0x566   : > { %vm12547_vm8 = vmmov %vm12542_vm0 }
 0x569   : > { %v6543_v25 = vld [vmem:[#allocation3 + $0x58] sm:$0xff] }
 0x56a   : > { %v6541_v34 = vld [vmem:[#allocation3 + $0x48] sm:$0xff] }
 0x56b   : > { %v6544_v26 = vld [vmem:[#allocation3 + $0x60] sm:$0xff] }
 0x56c   : > { %v7926_v53 = vpop.f32.mrb[172].mxu0  ;;  %v8459_v37 = vpack.i.bf16 %v6544_v26, %v6543_v25  ;;  %v6542_v39 = vld [vmem:[#allocation3 + $0x50] sm:$0xff]  ;;  %v6556_v21 = vld [vmem:[#allocation3 + $0x41] sm:$0xff] }
 0x56d   : > { %v6461_v52 = vadd.f32 %v7926_v53, %v11644_v27  ;;  %v6452_v2 = vpop.f32.mrb[173].mxu0  ;;  %v8454_v22 = vpack.i.bf16 %v6542_v39, %v6541_v34  ;;  %v6652_v30 = vpack.c.bf16 %v6556_v21, %v6555_v59  ;;  %v6557_v25 = vld [vmem:[#allocation3 + $0x49] sm:$0xff]  ;;  %v6558_v26 = vld [vmem:[#allocation3 + $0x51] sm:$0xff] }
 0x56e   : > { %v6453_v63 = vadd.f32 %v6452_v2, %v11647_v23  ;;  %v7927_v12 = vpop.f32.mrb[174].mxu0  ;;  %8460 = vrot.lane.b32.xlu0 %v8459_v37, %s9270_s4  ;;  %v12531_v23 = vld [vmem:[#allocation54_spill] sm:$0xff]  ;;  %v6654_v37 = vpack.c.bf16 %v6558_v26, %v6557_v25  ;;  %v6526_v57 = vld [vmem:[#allocation3 + $0x4f] sm:$0xff] }
 0x56f   : > { %v6481_v10 = vmax.f32 %v6461_v52, 0.0  ;;  %v6464_v62 = vadd.f32 %v7927_v12, %v11649_v58  ;;  %v6455_v44 = vpop.f32.mrb[175].mxu0  ;;  %8455 = vrot.lane.b32.xlu1 %v8454_v22, %s9270_s4  ;;  %vm12532_vm13 = vnez %v12531_v23  ;;  %v12534_v58 = vld [vmem:[#allocation59_spill] sm:$0xff] }
 0x570   : > { %v6479_v35 = vmax.f32 %v6453_v63, 0.0  ;;  %v6456_v6 = vadd.f32 %v6455_v44, %v11651_v51  ;;  %vm12535_vm10 = vnez %v12534_v58  ;;  %v12537_v51 = vld [vmem:[#allocation55_spill] sm:$0xff] }
 0x571   : > { %v6497_v5 = vsel %vm10093_vm12, %v6481_v10, 0.0  ;;  %v6482_v46 = vmax.f32 %v6464_v62, 0.0  ;;  %vm12538_vm5 = vnez %v12537_v51  ;;  %vm12539_vm12 = vmmov %vm12510_vm1  ;;  %v6525_v22 = vld [vmem:[#allocation3 + $0x47] sm:$0xff]  ;;  %v6528_v51 = vld [vmem:[#allocation3 + $0x5f] sm:$0xff] }
 0x572   : > { %6515 = vst.msk [vmem:[#allocation3 + $0x78] sm:$0xff] %vm12530_vm11, %v6497_v5  ;;  %v6495_v14 = vsel %vm12532_vm13, %v6479_v35, 0.0  ;;  %v6480_v20 = vmax.f32 %v6456_v6, 0.0  ;;  %8470 = vrot.lane.b32.xlu0 %v8469_v47, %s9270_s4  ;;  %vm12548_vm1 = vmmov %vm12542_vm0  ;;  %v6559_v6 = vld [vmem:[#allocation3 + $0x59] sm:$0xff]  ;;  %v6517_v5 = vld [vmem:[#allocation3 + $0x7] sm:$0xff] }
 0x573   : > { %6513 = vst.msk [vmem:[#allocation3 + $0x68] sm:$0xff] %vm12533_vm4, %v6495_v14  ;;  %v6498_v55 = vsel %vm12535_vm10, %v6482_v46, 0.0  ;;  %vm12549_vm11 = vmmov %vm12542_vm0  ;;  %v6518_v46 = vld [vmem:[#allocation3 + $0xf] sm:$0xff] }
 0x574   : > { %6516 = vst.msk [vmem:[#allocation3 + $0x80] sm:$0xff] %vm12536_vm2, %v6498_v55  ;;  %v6496_v33 = vsel %vm12538_vm5, %v6480_v20, 0.0  ;;  %vm12550_vm13 = vmmov %vm12542_vm0  ;;  %v6527_v55 = vld [vmem:[#allocation3 + $0x57] sm:$0xff] }
 0x575   : > { %6514 = vst.msk [vmem:[#allocation3 + $0x70] sm:$0xff] %vm12539_vm12, %v6496_v33  ;;  %vm12551_vm4 = vmmov %vm12542_vm0 }
 0x576   : > { %vm12552_vm10 = vmmov %vm12542_vm0 }
 0x577   : > { %vm12553_vm2 = vmmov %vm12542_vm0 }
 0x578   : > { %vm12554_vm5 = vmmov %vm12542_vm0 }
 0x579   : > { %v6547_v19 = vld [vmem:[#allocation3 + $0x78] sm:$0xff]  ;;  %vm12555_vm12 = vmmov %vm12542_vm0 }
 0x57a   : > { %v6545_v8 = vld [vmem:[#allocation3 + $0x68] sm:$0xff] }
 0x57b   : > { %v6548_v28 = vld [vmem:[#allocation3 + $0x80] sm:$0xff] }
 0x57c   : > { %v6546_v41 = vld [vmem:[#allocation3 + $0x70] sm:$0xff]  ;;  %v8474_v38 = vpack.i.bf16 %v6548_v28, %v6547_v19  ;;  %v6560_v63 = vld [vmem:[#allocation3 + $0x61] sm:$0xff] }
 0x57d   : > { %v8464_v24 = vpack.i.bf16 %v6546_v41, %v6545_v8  ;;  %v6656_v23 = vpack.c.bf16 %v6560_v63, %v6559_v6  ;;  %v6561_v41 = vld [vmem:[#allocation3 + $0x69] sm:$0xff]  ;;  %v6564_v36 = vld [vmem:[#allocation3 + $0x81] sm:$0xff] }
 0x57f   : > { %8465 = vrot.lane.b32.xlu1 %v8464_v24, %s9270_s4  ;;  %v6562_v24 = vld [vmem:[#allocation3 + $0x71] sm:$0xff] }
 0x580   : > { %v6658_v19 = vpack.c.bf16 %v6562_v24, %v6561_v41 }
 0x583   : > { %8475 = vrot.lane.b32.xlu1 %v8474_v38, %s9270_s4  ;;  %s7086_s4 = sshll.u32 %s9557_s19, 7 }
 0x584   : > { %s11813_s27 = scalar_lea.vmem [#allocation15], %s7086_s4 }
 0x585   : > { %s6947_s22 = sshll.u32 %s11813_s27, 4  ;;  %s11864_s22 = int_to_ptr.vmem [resolvable:$true] %s6947_s22 }
 0x586   : > { %s9178_s24 = scalar_lea.vmem %s11864_s22, 2048  ;;  %p9185_p1 = scmp.lt.s32.totalorder %s11864_s22, %s9183_s18 }
 0x587   : > { %p9179_p7 = scmp.ne.s32.totalorder %s11864_s22, %s9178_s24  ;;  %p9186_p3 = scmp.lt.s32.totalorder %s9184_s25, %s9178_s24 }
 0x589   : > { %p9180_p4 = pnand %p9179_p7, %p12577_p10  ;;  %p9187_p2 = por %p9186_p3, %p9185_p1 }
 0x58b   : > { %p9181_p13 = pneg %p9180_p4 }
 0x58d   : > { %p9188_p8 = pnand %p9187_p2, %p9181_p13 }
 0x5c0   : > { %v8441_v4 = vpop.permute.xlu0 %8440 }
 0x5c1   : > { %v8443_v13 = vunpack.i.h.bf16 %v8441_v4  ;;  %v8442_v15 = vunpack.i.l.bf16 %v8441_v4 }
 0x5c3   : > { %v6631_v60 = vsel %vm12540_vm15, %v6519_v56, %v8442_v15  ;;  %v6632_v32 = vsel %vm12541_vm7, %v6520_v54, %v8443_v13  ;;  %vm12556_vm15 = vmmov %vm12542_vm0  ;;  %v6529_v15 = vld [vmem:[#allocation3 + $0x67] sm:$0xff]  ;;  %v6530_v54 = vld [vmem:[#allocation3 + $0x6f] sm:$0xff] }
 0x5c4   : > { %v6647_v3 = vpack.c.bf16 %v6632_v32, %v6631_v60  ;;  %v6563_v56 = vld [vmem:[#allocation3 + $0x79] sm:$0xff]  ;;  %vm12557_vm7 = vmmov %vm12542_vm0 }
 0x5c6   : > { %6829 = vmatmul.mubr.bf16.vlgmr.msra.gmra.mrb[144].mxu1 %v6647_v3 }
 0x5c7   : > { %7499 = vmatprep.mubr.msk.bf16.mxu1 %vm12542_vm0, %v6650_v7 }
 0x5d0   : > { %v8451_v61 = vpop.permute.xlu0 %8450 }
 0x5d1   : > { %v8446_v17 = vpop.permute.xlu1 %8445  ;;  %v8453_v49 = vunpack.i.h.bf16 %v8451_v61  ;;  %v8452_v29 = vunpack.i.l.bf16 %v8451_v61  ;;  %v6532_v61 = vld [vmem:[#allocation3 + $0x7f] sm:$0xff] }
 0x5d2   : > { %v8448_v42 = vunpack.i.h.bf16 %v8446_v17  ;;  %v8447_v40 = vunpack.i.l.bf16 %v8446_v17 }
 0x5d3   : > { %v6635_v16 = vsel %vm12546_vm3, %v6523_v50, %v8452_v29  ;;  %v6636_v45 = vsel %vm12547_vm8, %v6524_v18, %v8453_v49  ;;  %vm12561_vm3 = vmmov %vm12542_vm0 }
 0x5d4   : > { %v6633_v43 = vsel %vm12543_vm14, %v6521_v9, %v8447_v40  ;;  %v6634_v48 = vsel %vm12544_vm6, %v6522_v31, %v8448_v42  ;;  %v6651_v53 = vpack.c.bf16 %v6636_v45, %v6635_v16  ;;  %v6660_v42 = vpack.c.bf16 %v6564_v36, %v6563_v56  ;;  %vm12558_vm14 = vmmov %vm12542_vm0  ;;  %v6531_v40 = vld [vmem:[#allocation3 + $0x77] sm:$0xff] }
 0x5d5   : > { %v6649_v1 = vpack.c.bf16 %v6634_v48, %v6633_v43  ;;  %vm12559_vm6 = vmmov %vm12542_vm0  ;;  %v11807_v43 = vld [vmem:[#allocation13] ss:$0 sm:$0xff] }
 0x5d6   : > { %vm12562_vm8 = vmmov %vm12542_vm0 }
 0x5d7   : > { %6837 = vmatmul.mubr.bf16.gmra.mrb[148].mxu1 %v6649_v1 }
 0x5d8   : > { %7500 = vmatprep.mubr.msk.bf16.mxu1 %vm12545_vm9, %v6652_v30  ;;  %vm12560_vm9 = vmmov %vm12542_vm0 }
 0x5df   : > { %6845 = vmatmul.mubr.bf16.gmra.mrb[152].mxu1 %v6651_v53 }
 0x5e0   : > { %v8461_v34 = vpop.permute.xlu0 %8460  ;;  %7501 = vmatprep.mubr.msk.bf16.mxu1 %vm12548_vm1, %v6654_v37  ;;  %vm12563_vm1 = vmmov %vm12542_vm0 }
 0x5e1   : > { %v8456_v39 = vpop.permute.xlu1 %8455  ;;  %v8463_v47 = vunpack.i.h.bf16 %v8461_v34  ;;  %v8462_v27 = vunpack.i.l.bf16 %v8461_v34 }
 0x5e2   : > { %v8458_v52 = vunpack.i.h.bf16 %v8456_v39  ;;  %v8457_v2 = vunpack.i.l.bf16 %v8456_v39 }
 0x5e3   : > { %v6639_v33 = vsel %vm12554_vm5, %v6527_v55, %v8462_v27  ;;  %v6640_v8 = vsel %vm12555_vm12, %v6528_v51, %v8463_v47  ;;  %vm12569_vm5 = vmmov %vm12542_vm0 }
 0x5e4   : > { %v8471_v12 = vpop.permute.xlu0 %8470  ;;  %v6637_v10 = vsel %vm12549_vm11, %v6525_v22, %v8457_v2  ;;  %v6638_v62 = vsel %vm12550_vm13, %v6526_v57, %v8458_v52  ;;  %v6655_v28 = vpack.c.bf16 %v6640_v8, %v6639_v33  ;;  %vm12564_vm11 = vmmov %vm12542_vm0 }
 0x5e5   : > { %v8473_v44 = vunpack.i.h.bf16 %v8471_v12  ;;  %v8472_v0 = vunpack.i.l.bf16 %v8471_v12  ;;  %v6653_v35 = vpack.c.bf16 %v6638_v62, %v6637_v10  ;;  %vm12565_vm13 = vmmov %vm12542_vm0 }
 0x5e6   : > { %vm12570_vm12 = vmmov %vm12542_vm0 }
 0x5e7   : > { %v6629_v14 = vsel %vm12551_vm4, %v6517_v5, %v8472_v0  ;;  %v6630_v20 = vsel %vm12552_vm10, %v6518_v46, %v8473_v44  ;;  %6853 = vmatmul.mubr.bf16.gmra.mrb[156].mxu1 %v6653_v35  ;;  %vm12566_vm4 = vmmov %vm12542_vm0 }
 0x5e8   : > { %v6645_v58 = vpack.c.bf16 %v6630_v20, %v6629_v14  ;;  %7502 = vmatprep.mubr.msk.bf16.mxu1 %vm12553_vm2, %v6656_v23  ;;  %vm12567_vm10 = vmmov %vm12542_vm0 }
 0x5e9   : > { %vm12568_vm2 = vmmov %vm12542_vm0 }
 0x5ea   : > { %6821 = vmatmul.mubr.bf16.vlgmr.msra.gmra.mrb[176].mxu0 %v6645_v58 }
 0x5ef   : > { %6861 = vmatmul.mubr.bf16.gmra.mrb[160].mxu1 %v6655_v28 }
 0x5f0   : > { %7503 = vmatprep.mubr.msk.bf16.mxu1 %vm12556_vm15, %v6658_v19  ;;  %vm12571_vm15 = vmmov %vm12542_vm0 }
 0x5f1   : > { %v8466_v38 = vpop.permute.xlu1 %8465 }
 0x5f2   : > { %v8468_v4 = vunpack.i.h.bf16 %v8466_v38  ;;  %v8467_v13 = vunpack.i.l.bf16 %v8466_v38 }
 0x5f4   : > { %v6641_v11 = vsel %vm12557_vm7, %v6529_v15, %v8467_v13  ;;  %v6642_v60 = vsel %vm12542_vm0, %v6530_v54, %v8468_v4  ;;  %vm12572_vm7 = vmmov %vm12542_vm0 }
 0x5f5   : > { %v8476_v32 = vpop.permute.xlu1 %8475  ;;  %v6657_v3 = vpack.c.bf16 %v6642_v60, %v6641_v11 }
 0x5f6   : > { %v8478_v7 = vunpack.i.h.bf16 %v8476_v32  ;;  %v8477_v17 = vunpack.i.l.bf16 %v8476_v32 }
 0x5f7   : > { %6869 = vmatmul.mubr.bf16.gmra.mrb[164].mxu1 %v6657_v3 }
 0x5f8   : > { %7504 = vmatprep.mubr.msk.bf16.mxu1 %vm12558_vm14, %v6660_v42  ;;  %v6643_v9 = vsel %vm12559_vm6, %v6531_v40, %v8477_v17  ;;  %v6644_v31 = vsel %vm12560_vm9, %v6532_v61, %v8478_v7  ;;  %vm12573_vm14 = vmmov %vm12542_vm0 }
 0x5f9   : > { %v6659_v21 = vpack.c.bf16 %v6644_v31, %v6643_v9  ;;  %vm12574_vm6 = vmmov %vm12542_vm0 }
 0x5fa   : > { %vm12576_vm9 = vmmov %vm12542_vm0 }
 0x5ff   : > { %6877 = vmatmul.mubr.bf16.gmra.mrb[168].mxu1 %v6659_v21 }
 0x699   : > { %v6830_v48 = vpop.f32.mrb[144].mxu1 }
 0x69a   : > { %v6831_v1 = vadd.f32 %v11807_v43, %v6830_v48  ;;  %v6832_v59 = vpop.f32.mrb[145].mxu1 }
 0x69b   : > { %v6833_v49 = vpop.f32.mrb[146].mxu1 }
 0x69c   : > { %v6887_v29 = vmax.f32 %v6831_v1, 0.0  ;;  %v6834_v30 = vadd.f32 %v11807_v43, %v6833_v49  ;;  %v6835_v50 = vpop.f32.mrb[147].mxu1 }
 0x69e   : > { %v6903_v18 = vsel %vm12561_vm3, %v6887_v29, 0.0  ;;  %v6888_v16 = vmax.f32 %v6834_v30, 0.0 }
 0x69f   : > { %6919 = vst [vmem:[%s11813_s27 + $0x10] sm:$0xff] %v6903_v18 }
 0x6a0   : > { %v6904_v45 = vsel %vm12562_vm8, %v6888_v16, 0.0 }
 0x6a1   : > { %6920 = vst [vmem:[%s11813_s27 + $0x18] sm:$0xff] %v6904_v45 }
 0x6aa   : > { %v6838_v25 = vpop.f32.mrb[148].mxu1 }
 0x6ab   : > { %v6839_v26 = vadd.f32 %v11807_v43, %v6838_v25  ;;  %v6840_v53 = vpop.f32.mrb[149].mxu1 }
 0x6ac   : > { %v6841_v37 = vpop.f32.mrb[150].mxu1 }
 0x6ad   : > { %v6889_v34 = vmax.f32 %v6839_v26, 0.0  ;;  %v6842_v39 = vadd.f32 %v11807_v43, %v6841_v37  ;;  %v6843_v52 = vpop.f32.mrb[151].mxu1 }
 0x6af   : > { %v6905_v2 = vsel %vm12563_vm1, %v6889_v34, 0.0  ;;  %v6890_v22 = vmax.f32 %v6842_v39, 0.0 }
 0x6b0   : > { %6921 = vst [vmem:[%s11813_s27 + $0x20] sm:$0xff] %v6905_v2 }
 0x6b1   : > { %v6906_v57 = vsel %vm12564_vm11, %v6890_v22, 0.0 }
 0x6b2   : > { %6922 = vst [vmem:[%s11813_s27 + $0x28] sm:$0xff] %v6906_v57  ;;  %v6846_v63 = vpop.f32.mrb[152].mxu1 }
 0x6b3   : > { %v6847_v12 = vadd.f32 %v11807_v43, %v6846_v63  ;;  %v6848_v10 = vpop.f32.mrb[153].mxu1 }
 0x6b4   : > { %v6849_v62 = vpop.f32.mrb[154].mxu1 }
 0x6b5   : > { %v6891_v44 = vmax.f32 %v6847_v12, 0.0  ;;  %v6850_v0 = vadd.f32 %v11807_v43, %v6849_v62  ;;  %v6851_v35 = vpop.f32.mrb[155].mxu1 }
 0x6b7   : > { %v6907_v6 = vsel %vm12565_vm13, %v6891_v44, 0.0  ;;  %v6892_v47 = vmax.f32 %v6850_v0, 0.0 }
 0x6b8   : > { %6923 = vst [vmem:[%s11813_s27 + $0x30] sm:$0xff] %v6907_v6 }
 0x6b9   : > { %v6908_v27 = vsel %vm12566_vm4, %v6892_v47, 0.0 }
 0x6ba   : > { %6924 = vst [vmem:[%s11813_s27 + $0x38] sm:$0xff] %v6908_v27  ;;  %v6854_v5 = vpop.f32.mrb[156].mxu1 }
 0x6bb   : > { %v6855_v46 = vadd.f32 %v11807_v43, %v6854_v5  ;;  %v6856_v23 = vpop.f32.mrb[157].mxu1 }
 0x6bc   : > { %v6857_v14 = vpop.f32.mrb[158].mxu1 }
 0x6bd   : > { %v6893_v20 = vmax.f32 %v6855_v46, 0.0  ;;  %v6858_v58 = vadd.f32 %v11807_v43, %v6857_v14  ;;  %v6822_v55 = vpop.f32.mrb[176].mxu0  ;;  %v6859_v51 = vpop.f32.mrb[159].mxu1 }
 0x6be   : > { %v6823_v33 = vadd.f32 %v11807_v43, %v6822_v55  ;;  %v6824_v8 = vpop.f32.mrb[177].mxu0 }
 0x6bf   : > { %v6909_v41 = vsel %vm12567_vm10, %v6893_v20, 0.0  ;;  %v6894_v24 = vmax.f32 %v6858_v58, 0.0  ;;  %v6825_v28 = vpop.f32.mrb[178].mxu0 }
 0x6c0   : > { %6925 = vst [vmem:[%s11813_s27 + $0x40] sm:$0xff] %v6909_v41  ;;  %v6885_v19 = vmax.f32 %v6823_v33, 0.0  ;;  %v6826_v38 = vadd.f32 %v11807_v43, %v6825_v28  ;;  %v6827_v4 = vpop.f32.mrb[179].mxu0 }
 0x6c1   : > { %v6910_v13 = vsel %vm12568_vm2, %v6894_v24, 0.0 }
 0x6c2   : > { %6926 = vst [vmem:[%s11813_s27 + $0x48] sm:$0xff] %v6910_v13  ;;  %v6901_v15 = vsel %vm12569_vm5, %v6885_v19, 0.0  ;;  %v6886_v54 = vmax.f32 %v6826_v38, 0.0  ;;  %v6862_v56 = vpop.f32.mrb[160].mxu1 }
 0x6c3   : > { %6917 = vst [vmem:[%s11813_s27] sm:$0xff] %v6901_v15  ;;  %v6863_v36 = vadd.f32 %v11807_v43, %v6862_v56  ;;  %v6864_v11 = vpop.f32.mrb[161].mxu1 }
 0x6c4   : > { %v6902_v60 = vsel %vm12570_vm12, %v6886_v54, 0.0  ;;  %v6865_v32 = vpop.f32.mrb[162].mxu1 }
 0x6c5   : > { %6918 = vst [vmem:[%s11813_s27 + $0x8] sm:$0xff] %v6902_v60  ;;  %v6895_v3 = vmax.f32 %v6863_v36, 0.0  ;;  %v6866_v7 = vadd.f32 %v11807_v43, %v6865_v32  ;;  %v6867_v17 = vpop.f32.mrb[163].mxu1 }
 0x6c7   : > { %v6911_v42 = vsel %vm12571_vm15, %v6895_v3, 0.0  ;;  %v6896_v40 = vmax.f32 %v6866_v7, 0.0 }
 0x6c8   : > { %6927 = vst [vmem:[%s11813_s27 + $0x50] sm:$0xff] %v6911_v42 }
 0x6c9   : > { %v6912_v61 = vsel %vm12572_vm7, %v6896_v40, 0.0 }
 0x6ca   : > { %6928 = vst [vmem:[%s11813_s27 + $0x58] sm:$0xff] %v6912_v61  ;;  %v6870_v9 = vpop.f32.mrb[164].mxu1 }
 0x6cb   : > { %v6871_v31 = vadd.f32 %v11807_v43, %v6870_v9  ;;  %v6872_v21 = vpop.f32.mrb[165].mxu1 }
 0x6cc   : > { %v6873_v48 = vpop.f32.mrb[166].mxu1 }
 0x6cd   : > { %v6897_v1 = vmax.f32 %v6871_v31, 0.0  ;;  %v6874_v59 = vadd.f32 %v11807_v43, %v6873_v48  ;;  %v6875_v49 = vpop.f32.mrb[167].mxu1 }
 0x6cf   : > { %v6913_v29 = vsel %vm12542_vm0, %v6897_v1, 0.0  ;;  %v6898_v30 = vmax.f32 %v6874_v59, 0.0 }
 0x6d0   : > { %6929 = vst [vmem:[%s11813_s27 + $0x60] sm:$0xff] %v6913_v29 }
 0x6d1   : > { %v6914_v50 = vsel %vm12573_vm14, %v6898_v30, 0.0 }
 0x6d2   : > { %6930 = vst [vmem:[%s11813_s27 + $0x68] sm:$0xff] %v6914_v50  ;;  %v6878_v18 = vpop.f32.mrb[168].mxu1 }
 0x6d3   : > { %v6879_v16 = vadd.f32 %v11807_v43, %v6878_v18  ;;  %v6880_v45 = vpop.f32.mrb[169].mxu1 }
 0x6d4   : > { %v6881_v25 = vpop.f32.mrb[170].mxu1 }
 0x6d5   : > { %v6899_v26 = vmax.f32 %v6879_v16, 0.0  ;;  %v6882_v53 = vadd.f32 %v11807_v43, %v6881_v25  ;;  %v6883_v37 = vpop.f32.mrb[171].mxu1 }
 0x6d7   : > { %v6915_v34 = vsel %vm12574_vm6, %v6899_v26, 0.0  ;;  %v6900_v39 = vmax.f32 %v6882_v53, 0.0 }
 0x6d8   : > { %6931 = vst [vmem:[%s11813_s27 + $0x70] sm:$0xff] %v6915_v34 }
 0x6d9   : > { %v6916_v52 = vsel %vm12576_vm9, %v6900_v39, 0.0 }
 0x6da   : > { %6932 = vst [vmem:[%s11813_s27 + $0x78] sm:$0xff] %v6916_v52 }
 0x6db   : > { %9191 = shalt.err (!%p9188_p8)
}
 0x6dc   : > { %s9192_s29 = scalar_lea.hbm %s11862_s28, 2048  ;;  %s9196_s27 = scalar_lea.hbm %s12575_s17, 4096 }
 0x6dd   : > { %p9193_p6 = scmp.ne.s32.totalorder %s11862_s28, %s9192_s29  ;;  %p9197_p0 = scmp.lt.u32.totalorder %s11862_s28, %s12575_s17 }
 0x6de   : > { %p9198_p5 = scmp.lt.u32.totalorder %s9196_s27, %s9192_s29  ;;  %p9200_p7 = scmp.lt.u32.totalorder %s9192_s29, %s11862_s28 }
 0x6df   : > { %p9194_p11 = pnand %p9193_p6, %p12577_p10 }
 0x6e0   : > { %p9199_p9 = por %p9198_p5, %p9197_p0 }
 0x6e1   : > { %p9195_p12 = pneg %p9194_p11 }
 0x6e2   : > { %p9201_p4 = por %p9200_p7, %p9199_p9 }
 0x6e4   : > { %p9202_p13 = pnand %p9201_p4, %p9195_p12 }
 0x6e6   : > { %9205 = shalt.err (!%p9202_p13)
}
 0x6e7   : > { %s9272_s16 = smov 128   ;;  %s9273_s24 = smov 8  }
 0x6e8   : > { %8230 = dma.vmem_to_hbm [thread:$0]  (%p12577_p10), %s11864_s22, 2048, %s11862_s28, %s6934_s15, %s9272_s16, %s9272_s16, %s9273_s24  }
 0x6e9 PF: > { %s6962_s13 = sand.u32 1, %s9244_s30   ;;  %p12578_p1 = scmp.ne.s32.totalorder %s12048_s9, 0 }
 0x6ea   : > { %p12579_p3 = scmp.ge.s32.totalorder %s9256_s12, 2  ;;  %s6963_s18 = scalar_lea.sflag [#allocation6], %s6962_s13 }
 0x6ec   : > { %p8253_p2 = pnand %p12579_p3, %p12578_p1 }
 0x6ee   : > { %9239 = dma.done.wait (!%p8253_p2), %s6963_s18, 2048  }
 0x6ef   : > { %9241 = vsyncadd (!%p8253_p2), %s6963_s18, 4294965248  ;;  %p25_p8 = scmp.ge.s32.totalorder %s9484_s21, 4   ;;  %s12580_s30 = smov %s9248_s10 }
 0x6f0   : > { %s12581_s10 = smov %s9252_s11  ;;  %s12582_s11 = smov %s9496_s2 }
 0x6f1   : > { %s12583_s12 = smov %s9484_s21  ;;  %27 = sbr.rel (!%p25_p8) target bundleno = 12 (0xc), region = 121 }
 0x6f8   :  { %6968 = vsyncpa [#allocation5], 1 }
 0x6f9   :  { %6970 = vsyncpa [#allocation5 + $0x1], 1 }
 0x6fa   :  { %6971 = vsyncpa [#allocation8], 1 }
 0x6fb   :  { %6972 = vsyncpa [#allocation11], 1 }
 0x6fc   :  { %6973 = vsyncpa [#allocation14], 1 }
 0x6fd   :  { %6974 = vsyncpa [#allocation6], 1 }
 0x6fe   :  { %6976 = vsyncpa [#allocation6 + $0x1], 1 }

</bundles_post_ra>
